<compile_context>
chip_gen: v7x
topology: tpu7x:2x2x1
jax: 0.10.0
libtpu: 0.0.40
codegen_flags: <defaults>
</compile_context>

<pallas_src>
import math
from functools import partial

import jax
import jax.numpy as jnp
from jax import lax
from jax.experimental import pallas as pl
from jax.experimental.pallas import tpu as pltpu

# ----------------------------- model config (small) -----------------------------
DIM = 256
N_LAYERS = 2
N_HEADS = 2
N_KV_HEADS = 1
HEAD_DIM = DIM // N_HEADS                    # 128
N_REP = N_HEADS // N_KV_HEADS
VOCAB = 128
MULTIPLE_OF = 256
NORM_EPS = 1e-5
MAX_BATCH = 8                                # cache capacity; also padded act rows
MAX_SEQ = 16
HQ = N_HEADS * HEAD_DIM                      # 256
HK = N_KV_HEADS * HEAD_DIM                   # 128

_ffn = int(2 * (4 * DIM) / 3)
FFN_HIDDEN = MULTIPLE_OF * ((_ffn + MULTIPLE_OF - 1) // MULTIPLE_OF)   # 768


# ----------------------------------- kernel --------------------------------------
def fused_decode_kernel(
    # inputs
    pos_ref,                                   # SMEM (1,) int32
    x0_ref,                                    # (MB, DIM) f32
    mask_ref,                                  # (MB*N_REP, MB*S) f32 additive mask
    attn_nw_ref, ffn_nw_ref,                   # (1, DIM) f32 per layer
    wq_ref, wk_ref, wv_ref, wo_ref,            # bf16 per-layer weights
    w1_ref, w2_ref, w3_ref,
    cos_q_ref, sinp_q_ref, sinm_q_ref,         # (1, HQ) f32 RoPE tables
    cos_k_ref, sinp_k_ref, sinm_k_ref,         # (1, HK) f32
    final_nw_ref, wout_ref,                    # (1, DIM) f32, (DIM, VOCAB) bf16
    cache_k_in, cache_v_in,                    # HBM (ANY) (L, S, MB, HK) f32
    # outputs
    logits_ref,                                # (MB, VOCAB) f32
    cache_k_out, cache_v_out,                  # HBM (ANY), aliased to the inputs
    # scratch
    h_ref, k_vmem, v_vmem, krow_ref, vrow_ref, rsem, wsem,
    *, n_heads, n_kv_heads, head_dim, eps, max_seq, batch,
):
    layer = pl.program_id(0)
    n_layers = pl.num_programs(0)
    pos = pos_ref[0]                           # scalar read before any DMA waits
    slot = layer % 2
    nxt_slot = 1 - slot
    n_rep = n_heads // n_kv_heads
    hd = head_dim
    hk = n_kv_heads * hd

    def start_kv_read(l, s):
        pltpu.make_async_copy(cache_k_in.at[l], k_vmem.at[s], rsem.at[s, 0]).start()
        pltpu.make_async_copy(cache_v_in.at[l], v_vmem.at[s], rsem.at[s, 1]).start()

    def wait_kv_read(s):
        pltpu.make_async_copy(cache_k_in.at[0], k_vmem.at[s], rsem.at[s, 0]).wait()
        pltpu.make_async_copy(cache_v_in.at[0], v_vmem.at[s], rsem.at[s, 1]).wait()

    # ---- prime layer-0 read; always prefetch the NEXT layer's block right away ----
    @pl.when(layer == 0)
    def _():
        start_kv_read(0, 0)
        h_ref[...] = x0_ref[...]

    @pl.when(layer + 1 < n_layers)
    def _():
        start_kv_read(layer + 1, nxt_slot)

    x = h_ref[...]                                           # (MB, DIM) f32
    mb = x.shape[0]

    # ---- attention RMSNorm ----
    xn = x * lax.rsqrt(jnp.mean(x * x, axis=-1, keepdims=True) + eps)
    xn = xn * attn_nw_ref[...]
    xn16 = xn.astype(jnp.bfloat16)

    # ---- QKV projections (bf16 weights, f32 accumulation on the MXU) ----
    xq = jnp.dot(xn16, wq_ref[...], preferred_element_type=jnp.float32)   # (MB, HQ)
    xk = jnp.dot(xn16, wk_ref[...], preferred_element_type=jnp.float32)   # (MB, HK)
    xv = jnp.dot(xn16, wv_ref[...], preferred_element_type=jnp.float32)   # (MB, HK)

    # ---- rotary embedding: 2 XLU rolls + precomputed signed/masked sin tables ----
    # out = x*cos + roll(x,+1)*sin_p + roll(x,-1)*sin_m  (pltpu.roll == jnp.roll)
    def rope(t, cos, sin_p, sin_m):
        d = t.shape[-1]
        return (t * cos
                + pltpu.roll(t, 1, 1) * sin_p
                + pltpu.roll(t, d - 1, 1) * sin_m)

    xq = rope(xq, cos_q_ref[...], sinp_q_ref[...], sinm_q_ref[...])
    xk = rope(xk, cos_k_ref[...], sinp_k_ref[...], sinm_k_ref[...])
    xk16 = xk.astype(jnp.bfloat16)
    xv16 = xv.astype(jnp.bfloat16)

    # ---- retire the PREVIOUS layer's fresh-row writes (they had a full layer
    #      of compute to complete) before krow/vrow are reused ----
    @pl.when(layer > 0)
    def _():
        prev = layer - 1
        pltpu.make_async_copy(
            krow_ref, cache_k_out.at[prev, pl.ds(pos, 1), pl.ds(0, batch), :],
            wsem.at[0]).wait()
        pltpu.make_async_copy(
            vrow_ref, cache_v_out.at[prev, pl.ds(pos, 1), pl.ds(0, batch), :],
            wsem.at[1]).wait()

    # ---- write ONLY the fresh row back to the (aliased) HBM caches (contiguous) ----
    krow_ref[...] = xk[0:batch, :].reshape(1, batch, hk)
    vrow_ref[...] = xv[0:batch, :].reshape(1, batch, hk)
    k_wr = pltpu.make_async_copy(
        krow_ref, cache_k_out.at[layer, pl.ds(pos, 1), pl.ds(0, batch), :], wsem.at[0])
    v_wr = pltpu.make_async_copy(
        vrow_ref, cache_v_out.at[layer, pl.ds(pos, 1), pl.ds(0, batch), :], wsem.at[1])
    k_wr.start()
    v_wr.start()

    # ---- wait for this layer's cache block (prefetched one step earlier) ----
    wait_kv_read(slot)

    at_pos = lax.broadcasted_iota(jnp.int32, (max_seq, 1, 1), 0) == pos
    k_all = jnp.where(at_pos, xk16[None, :, :],
                      k_vmem[slot].astype(jnp.bfloat16))      # (S, MB, HK) bf16

    # ---- attention as two lane-dense matmuls over the flattened (S*MB) axis ----
    mask = mask_ref[...]                                      # (MB*n_rep, MB*S)
    scale = 1.0 / math.sqrt(hd)
    outs = []
    for kv in range(n_kv_heads):                              # static tiny loop (GQA)
        k_g = k_all[:, :, kv * hd:(kv + 1) * hd].reshape(max_seq * mb, hd)
        q_g = xq[:, kv * n_rep * hd:(kv + 1) * n_rep * hd].reshape(
            mb * n_rep, hd).astype(jnp.bfloat16)
        s = lax.dot_general(q_g, k_g, (((1,), (1,)), ((), ())),
                            preferred_element_type=jnp.float32)        # (16, 128)
        s = s * scale + mask
        m = jnp.max(s, axis=-1, keepdims=True)
        e = jnp.exp(s - m)                                    # masked lanes -> exactly 0
        p = e * pl.reciprocal(jnp.sum(e, axis=-1, keepdims=True), approx=True)
        # compose V only now (shorter live range)
        v_g = jnp.where(
            at_pos, xv16[None, :, kv * hd:(kv + 1) * hd],
            v_vmem[slot][:, :, kv * hd:(kv + 1) * hd].astype(jnp.bfloat16)
        ).reshape(max_seq * mb, hd)
        o = jnp.dot(p.astype(jnp.bfloat16), v_g, preferred_element_type=jnp.float32)
        outs.append(o.reshape(mb, n_rep * hd))
    attn = outs[0] if n_kv_heads == 1 else jnp.concatenate(outs, axis=-1)  # (MB, HQ)

    h1 = x + jnp.dot(attn.astype(jnp.bfloat16), wo_ref[...],
                     preferred_element_type=jnp.float32)

    # ---- FFN RMSNorm + SwiGLU ----
    hn = h1 * lax.rsqrt(jnp.mean(h1 * h1, axis=-1, keepdims=True) + eps)
    hn = hn * ffn_nw_ref[...]
    hn16 = hn.astype(jnp.bfloat16)
    a = jnp.dot(hn16, w1_ref[...], preferred_element_type=jnp.float32)
    g = a * jax.nn.sigmoid(a)                                # SiLU
    u = jnp.dot(hn16, w3_ref[...], preferred_element_type=jnp.float32)
    h2 = h1 + jnp.dot((g * u).astype(jnp.bfloat16), w2_ref[...],
                      preferred_element_type=jnp.float32)
    h_ref[...] = h2

    # ---- final RMSNorm + vocab projection, fused into the last layer step ----
    @pl.when(layer == n_layers - 1)
    def _():
        fn = h2 * lax.rsqrt(jnp.mean(h2 * h2, axis=-1, keepdims=True) + eps)
        fn = fn * final_nw_ref[...]
        logits_ref[...] = jnp.dot(fn.astype(jnp.bfloat16), wout_ref[...],
                                  preferred_element_type=jnp.float32)
        # retire the last layer's row writes before the kernel ends
        k_wr.wait()
        v_wr.wait()


# ---------------------------------- wrapper --------------------------------------
def build_decode_call(batch):
    mb = MAX_BATCH

    def wspec(d2, d3):
        return pl.BlockSpec((None, d2, d3), lambda l: (l, 0, 0))

    def cspec(s0, s1):
        return pl.BlockSpec((s0, s1), lambda l: (0, 0))

    in_specs = [
        pl.BlockSpec(memory_space=pltpu.MemorySpace.SMEM),                 # 0 pos
        cspec(mb, DIM),                                                    # 1 x0
        cspec(mb * N_REP, mb * MAX_SEQ),                                   # 2 attn mask
        pl.BlockSpec((None, 1, DIM), lambda l: (l, 0, 0)),                 # 3 attn norms
        pl.BlockSpec((None, 1, DIM), lambda l: (l, 0, 0)),                 # 4 ffn norms
        wspec(DIM, HQ),                                                    # 5 wq
        wspec(DIM, HK),                                                    # 6 wk
        wspec(DIM, HK),                                                    # 7 wv
        wspec(HQ, DIM),                                                    # 8 wo
        wspec(DIM, FFN_HIDDEN),                                            # 9 w1
        wspec(FFN_HIDDEN, DIM),                                            # 10 w2
        wspec(DIM, FFN_HIDDEN),                                            # 11 w3
        cspec(1, HQ), cspec(1, HQ), cspec(1, HQ),                          # 12-14 q rope
        cspec(1, HK), cspec(1, HK), cspec(1, HK),                          # 15-17 k rope
        cspec(1, DIM),                                                     # 18 final norm
        cspec(DIM, VOCAB),                                                 # 19 output W
        pl.BlockSpec(memory_space=pl.ANY),                                 # 20 cache_k
        pl.BlockSpec(memory_space=pl.ANY),                                 # 21 cache_v
    ]
    out_specs = [
        cspec(mb, VOCAB),                                                  # logits
        pl.BlockSpec(memory_space=pl.ANY),                                 # cache_k alias
        pl.BlockSpec(memory_space=pl.ANY),                                 # cache_v alias
    ]
    out_shape = [
        jax.ShapeDtypeStruct((mb, VOCAB), jnp.float32),
        jax.ShapeDtypeStruct((N_LAYERS, MAX_SEQ, mb, HK), jnp.float32),
        jax.ShapeDtypeStruct((N_LAYERS, MAX_SEQ, mb, HK), jnp.float32),
    ]
    scratch_shapes = [
        pltpu.VMEM((mb, DIM), jnp.float32),                  # resident hidden state
        pltpu.VMEM((2, MAX_SEQ, mb, HK), jnp.float32),       # K-cache, 2 slots
        pltpu.VMEM((2, MAX_SEQ, mb, HK), jnp.float32),       # V-cache, 2 slots
        pltpu.VMEM((1, batch, HK), jnp.float32),             # fresh K row
        pltpu.VMEM((1, batch, HK), jnp.float32),             # fresh V row
        pltpu.SemaphoreType.DMA((2, 2)),                     # cache read sems [slot, k/v]
        pltpu.SemaphoreType.DMA((2,)),                       # row write sems
    ]
    kernel = partial(
        fused_decode_kernel, n_heads=N_HEADS, n_kv_heads=N_KV_HEADS,
        head_dim=HEAD_DIM, eps=NORM_EPS, max_seq=MAX_SEQ, batch=batch)
    n_in = len(in_specs)
    return pl.pallas_call(
        kernel,
        grid=(N_LAYERS,),
        in_specs=in_specs,
        out_specs=out_specs,
        out_shape=out_shape,
        scratch_shapes=scratch_shapes,
        input_output_aliases={n_in - 2: 1, n_in - 1: 2},     # caches updated in place
        compiler_params=pltpu.CompilerParams(
            dimension_semantics=("arbitrary",),
            vmem_limit_bytes=32 * 1024 * 1024,
        ),
    )


def transformer_forward(params, tokens, start_pos, cache_k, cache_v):
    b, s = tokens.shape
    assert s == 1, "Only one token at a time can be processed"
    assert b <= MAX_BATCH

    # token-embedding gather (plain-JAX glue), padded to a full sublane of rows
    h = params["tok_emb"][tokens[:, 0]]                                 # (B, DIM)
    h_pad = jnp.zeros((MAX_BATCH, DIM), jnp.float32).at[:b, :].set(h)

    # RoPE tables for this decode position (interleaved-pair layout).
    #   out[2i]   = x[2i]*cos_i - x[2i+1]*sin_i   -> roll(x,-1) * sin_m (even lanes)
    #   out[2i+1] = x[2i]*sin_i + x[2i+1]*cos_i   -> roll(x,+1) * sin_p (odd lanes)
    idx = jnp.arange(0, HEAD_DIM, 2, dtype=jnp.float32)
    inv_freq = 1.0 / (10000.0 ** (idx / HEAD_DIM))
    ang = start_pos.astype(jnp.float32) * inv_freq
    cos2 = jnp.repeat(jnp.cos(ang), 2)                       # [c0,c0,c1,c1,...]
    sin2 = jnp.repeat(jnp.sin(ang), 2)
    even = (jnp.arange(HEAD_DIM) % 2) == 0
    sin_p = jnp.where(even, 0.0, sin2)                       # multiplies roll(x, +1)
    sin_m = jnp.where(even, -sin2, 0.0)                      # multiplies roll(x, -1)

    def tile_row(v, n):
        return jnp.tile(v, n)[None, :].astype(jnp.float32)

    cos_q, sinp_q, sinm_q = (tile_row(cos2, N_HEADS), tile_row(sin_p, N_HEADS),
                             tile_row(sin_m, N_HEADS))
    cos_k, sinp_k, sinm_k = (tile_row(cos2, N_KV_HEADS), tile_row(sin_p, N_KV_HEADS),
                             tile_row(sin_m, N_KV_HEADS))

    # Additive attention mask over the flattened (seq*batch) key axis:
    #   query row r = b*N_REP + head, key column c = s*MAX_BATCH + b.
    rows = jnp.arange(MAX_BATCH * N_REP)[:, None]
    cols = jnp.arange(MAX_BATCH * MAX_SEQ)[None, :]
    valid = ((cols % MAX_BATCH) == (rows // N_REP)) & ((cols // MAX_BATCH) <= start_pos)
    mask = jnp.where(valid, 0.0, -1e30).astype(jnp.float32)

    pos_arr = jnp.reshape(start_pos, (1,)).astype(jnp.int32)

    call = build_decode_call(b)
    logits_pad, new_ck, new_cv = call(
        pos_arr, h_pad, mask,
        params["attn_norms"], params["ffn_norms"],
        params["wq"], params["wk"], params["wv"], params["wo"],
        params["w1"], params["w2"], params["w3"],
        cos_q, sinp_q, sinm_q, cos_k, sinp_k, sinm_k,
        params["norm"], params["output"],
        cache_k, cache_v,
    )
    return logits_pad[:b].reshape(b, 1, VOCAB), new_ck, new_cv


# --------------------------- pure-JAX reference (check) ---------------------------
def ref_forward(params, tokens, start_pos, cache_k, cache_v):
    B = tokens.shape[0]
    h = params["tok_emb"][tokens[:, 0]]
    i = jnp.arange(0, HEAD_DIM, 2, dtype=jnp.float32)
    inv_freq = 1.0 / (10000.0 ** (i / HEAD_DIM))
    ang = float(start_pos) * inv_freq
    cos, sin = jnp.cos(ang), jnp.sin(ang)

    def rope(x):                                             # (B, n, hd), interleaved
        xe, xo = x[..., 0::2], x[..., 1::2]
        re, im = xe * cos - xo * sin, xe * sin + xo * cos
        return jnp.stack([re, im], axis=-1).reshape(x.shape)

    def rms(x, w):
        return w * (x * lax.rsqrt(jnp.mean(x * x, -1, keepdims=True) + NORM_EPS))

    def f32(a):
        return a.astype(jnp.float32)

    k_rows, v_rows = [], []
    for li in range(N_LAYERS):
        xn = rms(h, params["attn_norms"][li])
        xq = (xn @ f32(params["wq"][li])).reshape(B, N_HEADS, HEAD_DIM)
        xk = (xn @ f32(params["wk"][li])).reshape(B, N_KV_HEADS, HEAD_DIM)
        xv = (xn @ f32(params["wv"][li])).reshape(B, N_KV_HEADS, HEAD_DIM)
        xq, xk = rope(xq), rope(xk)
        k_rows.append(xk.reshape(B, -1))
        v_rows.append(xv.reshape(B, -1))
        ck = cache_k[li].at[start_pos, :B, :].set(xk.reshape(B, -1))     # (S, MB, HK)
        cv = cache_v[li].at[start_pos, :B, :].set(xv.reshape(B, -1))
        T = start_pos + 1
        keys = ck[:T, :B].reshape(T, B, N_KV_HEADS, HEAD_DIM).transpose(1, 0, 2, 3)
        vals = cv[:T, :B].reshape(T, B, N_KV_HEADS, HEAD_DIM).transpose(1, 0, 2, 3)
        keys = jnp.repeat(keys, N_REP, axis=2)
        vals = jnp.repeat(vals, N_REP, axis=2)
        scores = jnp.einsum("bhd,bthd->bht", xq, keys) / math.sqrt(HEAD_DIM)
        probs = jax.nn.softmax(scores, axis=-1)
        attn = jnp.einsum("bht,bthd->bhd", probs, vals).reshape(B, -1)
        h = h + attn @ f32(params["wo"][li])
        hn = rms(h, params["ffn_norms"][li])
        a = hn @ f32(params["w1"][li])
        h = h + ((a * jax.nn.sigmoid(a)) * (hn @ f32(params["w3"][li]))) @ f32(params["w2"][li])
    hn = rms(h, params["norm"])
    logits = (hn @ f32(params["output"])).reshape(B, 1, VOCAB)
    return logits, jnp.stack(k_rows), jnp.stack(v_rows)


# ------------------------------------- main ---------------------------------------
if __name__ == "__main__":
    key = jax.random.PRNGKey(0)
    kit = iter(jax.random.split(key, 64))

    def nrm(shape, scale, dtype=jnp.float32):
        return (scale * jax.random.normal(next(kit), shape, dtype=jnp.float32)).astype(dtype)

    params = {
        "tok_emb": nrm((VOCAB, DIM), 0.5),
        "attn_norms": 1.0 + nrm((N_LAYERS, 1, DIM), 0.1),
        "ffn_norms": 1.0 + nrm((N_LAYERS, 1, DIM), 0.1),
        "wq": nrm((N_LAYERS, DIM, HQ), 0.05, jnp.bfloat16),
        "wk": nrm((N_LAYERS, DIM, HK), 0.05, jnp.bfloat16),
        "wv": nrm((N_LAYERS, DIM, HK), 0.05, jnp.bfloat16),
        "wo": nrm((N_LAYERS, HQ, DIM), 0.05, jnp.bfloat16),
        "w1": nrm((N_LAYERS, DIM, FFN_HIDDEN), 0.05, jnp.bfloat16),
        "w2": nrm((N_LAYERS, FFN_HIDDEN, DIM), 0.05, jnp.bfloat16),
        "w3": nrm((N_LAYERS, DIM, FFN_HIDDEN), 0.05, jnp.bfloat16),
        "norm": 1.0 + nrm((1, DIM), 0.1),
        "output": nrm((DIM, VOCAB), 0.05, jnp.bfloat16),
    }

    B = 2
    start_pos = 4                                    # decode position (runtime scalar)
    tokens = jax.random.randint(next(kit), (B, 1), 0, VOCAB, dtype=jnp.int32)
    # KV caches as if filled by previous decode steps. Layout: (L, S, MB, HK).
    cache_k = nrm((N_LAYERS, MAX_SEQ, MAX_BATCH, HK), 0.3)
    cache_v = nrm((N_LAYERS, MAX_SEQ, MAX_BATCH, HK), 0.3)

    ref_logits, ref_krows, ref_vrows = ref_forward(params, tokens, start_pos,
                                                   cache_k, cache_v)

    fwd = jax.jit(transformer_forward)
    logits, new_ck, new_cv = fwd(params, tokens, jnp.int32(start_pos), cache_k, cache_v)
    (logits, new_ck, new_cv) = jax.block_until_ready((logits, new_ck, new_cv))

    assert logits.shape == (B, 1, VOCAB)
    assert jnp.allclose(logits, ref_logits, atol=3e-2, rtol=3e-2), (
        f"max abs diff {jnp.max(jnp.abs(logits - ref_logits))}")

    # The in-place cache update must touch ONLY rows [0:B] at position start_pos.
    assert bool(jnp.array_equal(new_ck[:, :start_pos], cache_k[:, :start_pos]))
    assert bool(jnp.array_equal(new_ck[:, start_pos + 1:], cache_k[:, start_pos + 1:]))
    assert bool(jnp.array_equal(new_ck[:, start_pos, B:], cache_k[:, start_pos, B:]))
    assert bool(jnp.array_equal(new_cv[:, :start_pos], cache_v[:, :start_pos]))
    assert bool(jnp.array_equal(new_cv[:, start_pos + 1:], cache_v[:, start_pos + 1:]))
    assert bool(jnp.array_equal(new_cv[:, start_pos, B:], cache_v[:, start_pos, B:]))
    # And the written rows must match the reference projections.
    assert jnp.allclose(new_ck[:, start_pos, :B, :].transpose(0, 1, 2), ref_krows,
                        atol=3e-2, rtol=3e-2)
    assert jnp.allclose(new_cv[:, start_pos, :B, :], ref_vrows, atol=3e-2, rtol=3e-2)

    print("KERNEL_OK")
</pallas_src>

<mosaic_0001>
module attributes {stable_mosaic.version = 11 : i64} {
  func.func @fused_decode_kernel(%arg0: i32, %arg1: memref<1xi32, #tpu.memory_space<smem>>, %arg2: memref<8x256xf32, #tpu.memory_space<vmem>>, %arg3: memref<16x128xf32, #tpu.memory_space<vmem>>, %arg4: memref<1x1x256xf32, #tpu.memory_space<vmem>>, %arg5: memref<1x1x256xf32, #tpu.memory_space<vmem>>, %arg6: memref<1x256x256xbf16, #tpu.memory_space<vmem>>, %arg7: memref<1x256x128xbf16, #tpu.memory_space<vmem>>, %arg8: memref<1x256x128xbf16, #tpu.memory_space<vmem>>, %arg9: memref<1x256x256xbf16, #tpu.memory_space<vmem>>, %arg10: memref<1x256x768xbf16, #tpu.memory_space<vmem>>, %arg11: memref<1x768x256xbf16, #tpu.memory_space<vmem>>, %arg12: memref<1x256x768xbf16, #tpu.memory_space<vmem>>, %arg13: memref<1x256xf32, #tpu.memory_space<vmem>>, %arg14: memref<1x256xf32, #tpu.memory_space<vmem>>, %arg15: memref<1x256xf32, #tpu.memory_space<vmem>>, %arg16: memref<1x128xf32, #tpu.memory_space<vmem>>, %arg17: memref<1x128xf32, #tpu.memory_space<vmem>>, %arg18: memref<1x128xf32, #tpu.memory_space<vmem>>, %arg19: memref<1x256xf32, #tpu.memory_space<vmem>>, %arg20: memref<256x128xbf16, #tpu.memory_space<vmem>>, %arg21: memref<2x16x8x128xf32, #tpu.memory_space<any>>, %arg22: memref<2x16x8x128xf32, #tpu.memory_space<any>>, %arg23: memref<8x128xf32, #tpu.memory_space<vmem>>, %arg24: memref<2x16x8x128xf32, #tpu.memory_space<any>>, %arg25: memref<2x16x8x128xf32, #tpu.memory_space<any>>, %arg26: memref<8x256xf32, #tpu.memory_space<vmem>>, %arg27: memref<2x16x8x128xf32, #tpu.memory_space<vmem>>, %arg28: memref<2x16x8x128xf32, #tpu.memory_space<vmem>>, %arg29: memref<1x2x128xf32, #tpu.memory_space<vmem>>, %arg30: memref<1x2x128xf32, #tpu.memory_space<vmem>>, %arg31: memref<2x2x!tpu.dma_semaphore, #tpu.memory_space<semaphore_mem>>, %arg32: memref<2x!tpu.dma_semaphore, #tpu.memory_space<semaphore_mem>>) attributes {dimension_semantics = [#tpu.dimension_semantics<arbitrary>], iteration_bounds = array<i64: 2>, scalar_prefetch = 0 : i64, scratch_operands = 7 : i64, tpu.core_type = #tpu.core_type<tc>, window_params = [{transform_indices = @transform_0, window_bounds = array<i64: 1>}, {pipeline_mode = #tpu.pipeline_mode<synchronous>, transform_indices = @transform_1, window_bounds = array<i64: 8, 256>}, {pipeline_mode = #tpu.pipeline_mode<synchronous>, transform_indices = @transform_2, window_bounds = array<i64: 16, 128>}, {transform_indices = @transform_3, window_bounds = array<i64: 1, 1, 256>}, {transform_indices = @transform_4, window_bounds = array<i64: 1, 1, 256>}, {transform_indices = @transform_5, window_bounds = array<i64: 1, 256, 256>}, {transform_indices = @transform_6, window_bounds = array<i64: 1, 256, 128>}, {transform_indices = @transform_7, window_bounds = array<i64: 1, 256, 128>}, {transform_indices = @transform_8, window_bounds = array<i64: 1, 256, 256>}, {transform_indices = @transform_9, window_bounds = array<i64: 1, 256, 768>}, {transform_indices = @transform_10, window_bounds = array<i64: 1, 768, 256>}, {transform_indices = @transform_11, window_bounds = array<i64: 1, 256, 768>}, {pipeline_mode = #tpu.pipeline_mode<synchronous>, transform_indices = @transform_12, window_bounds = array<i64: 1, 256>}, {pipeline_mode = #tpu.pipeline_mode<synchronous>, transform_indices = @transform_13, window_bounds = array<i64: 1, 256>}, {pipeline_mode = #tpu.pipeline_mode<synchronous>, transform_indices = @transform_14, window_bounds = array<i64: 1, 256>}, {pipeline_mode = #tpu.pipeline_mode<synchronous>, transform_indices = @transform_15, window_bounds = array<i64: 1, 128>}, {pipeline_mode = #tpu.pipeline_mode<synchronous>, transform_indices = @transform_16, window_bounds = array<i64: 1, 128>}, {pipeline_mode = #tpu.pipeline_mode<synchronous>, transform_indices = @transform_17, window_bounds = array<i64: 1, 128>}, {pipeline_mode = #tpu.pipeline_mode<synchronous>, transform_indices = @transform_18, window_bounds = array<i64: 1, 256>}, {pipeline_mode = #tpu.pipeline_mode<synchronous>, transform_indices = @transform_19, window_bounds = array<i64: 256, 128>}, {}, {}, {pipeline_mode = #tpu.pipeline_mode<synchronous>, transform_indices = @transform_22, window_bounds = array<i64: 8, 128>}, {}, {}]} {
    %c0 = arith.constant 0 : index
    %0 = memref.load %arg1[%c0] : memref<1xi32, #tpu.memory_space<smem>>
    %c2_i32 = arith.constant 2 : i32
    %c0_i32 = arith.constant 0 : i32
    %1 = arith.cmpi eq, %c2_i32, %c0_i32 : i32
    %c1_i32 = arith.constant 1 : i32
    %2 = arith.select %1, %c1_i32, %c2_i32 : i32
    %3 = arith.remsi %arg0, %2 : i32
    %c0_i32_0 = arith.constant 0 : i32
    %4 = arith.cmpi ne, %3, %c0_i32_0 : i32
    %c0_i32_1 = arith.constant 0 : i32
    %5 = arith.cmpi slt, %3, %c0_i32_1 : i32
    %c0_i32_2 = arith.constant 0 : i32
    %6 = arith.cmpi slt, %2, %c0_i32_2 : i32
    %7 = arith.xori %5, %6 : i1
    %8 = arith.andi %7, %4 : i1
    %9 = arith.addi %3, %2 : i32
    %10 = arith.select %8, %9, %3 : i32
    %c1_i32_3 = arith.constant 1 : i32
    %11 = arith.subi %c1_i32_3, %10 : i32
    %c0_i32_4 = arith.constant 0 : i32
    %12 = arith.cmpi eq, %arg0, %c0_i32_4 : i32
    %13 = arith.extui %12 : i1 to i32
    %c0_i32_5 = arith.constant 0 : i32
    %14 = arith.cmpi ne, %13, %c0_i32_5 : i32
    scf.if %14 {
      %c0_i32_114 = arith.constant 0 : i32
      %c0_i32_115 = arith.constant 0 : i32
      %c0_i32_116 = arith.constant 0 : i32
      %c0_i32_117 = arith.constant 0 : i32
      %c0_i32_118 = arith.constant 0 : i32
      %c0_i32_119 = arith.constant 0 : i32
      %c0_i32_120 = arith.constant 0 : i32
      %188 = tpu.memref_slice %arg21[%c0_i32_114, %c0_i32_118, %c0_i32_119, %c0_i32_120] : memref<2x16x8x128xf32, #tpu.memory_space<any>> -> memref<1x16x8x128xf32, #tpu.memory_space<any>>
      %189 = tpu.memref_squeeze %188 : memref<1x16x8x128xf32, #tpu.memory_space<any>> -> memref<16x8x128xf32, #tpu.memory_space<any>>
      %c0_i32_121 = arith.constant 0 : i32
      %c0_i32_122 = arith.constant 0 : i32
      %c0_i32_123 = arith.constant 0 : i32
      %190 = tpu.memref_slice %arg27[%c0_i32_115, %c0_i32_121, %c0_i32_122, %c0_i32_123] : memref<2x16x8x128xf32, #tpu.memory_space<vmem>> -> memref<1x16x8x128xf32, #tpu.memory_space<vmem>>
      %191 = tpu.memref_squeeze %190 : memref<1x16x8x128xf32, #tpu.memory_space<vmem>> -> memref<16x8x128xf32, #tpu.memory_space<vmem>>
      %192 = tpu.memref_slice %arg31[%c0_i32_116, %c0_i32_117] : memref<2x2x!tpu.dma_semaphore, #tpu.memory_space<semaphore_mem>> -> memref<1x1x!tpu.dma_semaphore, #tpu.memory_space<semaphore_mem>>
      %193 = tpu.memref_squeeze %192 : memref<1x1x!tpu.dma_semaphore, #tpu.memory_space<semaphore_mem>> -> memref<!tpu.dma_semaphore, #tpu.memory_space<semaphore_mem>>
      tpu.enqueue_dma source(%189 : memref<16x8x128xf32, #tpu.memory_space<any>>) target(%191 : memref<16x8x128xf32, #tpu.memory_space<vmem>>) target_semaphore(%193 : memref<!tpu.dma_semaphore, #tpu.memory_space<semaphore_mem>>)
      %c0_i32_124 = arith.constant 0 : i32
      %c0_i32_125 = arith.constant 0 : i32
      %c0_i32_126 = arith.constant 0 : i32
      %c1_i32_127 = arith.constant 1 : i32
      %c0_i32_128 = arith.constant 0 : i32
      %c0_i32_129 = arith.constant 0 : i32
      %c0_i32_130 = arith.constant 0 : i32
      %194 = tpu.memref_slice %arg22[%c0_i32_124, %c0_i32_128, %c0_i32_129, %c0_i32_130] : memref<2x16x8x128xf32, #tpu.memory_space<any>> -> memref<1x16x8x128xf32, #tpu.memory_space<any>>
      %195 = tpu.memref_squeeze %194 : memref<1x16x8x128xf32, #tpu.memory_space<any>> -> memref<16x8x128xf32, #tpu.memory_space<any>>
      %c0_i32_131 = arith.constant 0 : i32
      %c0_i32_132 = arith.constant 0 : i32
      %c0_i32_133 = arith.constant 0 : i32
      %196 = tpu.memref_slice %arg28[%c0_i32_125, %c0_i32_131, %c0_i32_132, %c0_i32_133] : memref<2x16x8x128xf32, #tpu.memory_space<vmem>> -> memref<1x16x8x128xf32, #tpu.memory_space<vmem>>
      %197 = tpu.memref_squeeze %196 : memref<1x16x8x128xf32, #tpu.memory_space<vmem>> -> memref<16x8x128xf32, #tpu.memory_space<vmem>>
      %198 = tpu.memref_slice %arg31[%c0_i32_126, %c1_i32_127] : memref<2x2x!tpu.dma_semaphore, #tpu.memory_space<semaphore_mem>> -> memref<1x1x!tpu.dma_semaphore, #tpu.memory_space<semaphore_mem>>
      %199 = tpu.memref_squeeze %198 : memref<1x1x!tpu.dma_semaphore, #tpu.memory_space<semaphore_mem>> -> memref<!tpu.dma_semaphore, #tpu.memory_space<semaphore_mem>>
      tpu.enqueue_dma source(%195 : memref<16x8x128xf32, #tpu.memory_space<any>>) target(%197 : memref<16x8x128xf32, #tpu.memory_space<vmem>>) target_semaphore(%199 : memref<!tpu.dma_semaphore, #tpu.memory_space<semaphore_mem>>)
      %c0_134 = arith.constant 0 : index
      %c0_135 = arith.constant 0 : index
      %200 = vector.load %arg2[%c0_134, %c0_135] : memref<8x256xf32, #tpu.memory_space<vmem>>, vector<8x256xf32>
      %c0_136 = arith.constant 0 : index
      %c0_137 = arith.constant 0 : index
      %201 = vector.load %arg26[%c0_136, %c0_137] : memref<8x256xf32, #tpu.memory_space<vmem>>, vector<8x256xf32>
      tpu.vector_store %arg26[%c0_136, %c0_137], %200 {strides = array<i32>} : memref<8x256xf32, #tpu.memory_space<vmem>>, vector<8x256xf32>,
    } else {
    }
    %c1_i32_6 = arith.constant 1 : i32
    %15 = arith.addi %arg0, %c1_i32_6 : i32
    %c2_i32_7 = arith.constant 2 : i32
    %16 = arith.cmpi slt, %15, %c2_i32_7 : i32
    %17 = arith.extui %16 : i1 to i32
    %c0_i32_8 = arith.constant 0 : i32
    %18 = arith.cmpi ne, %17, %c0_i32_8 : i32
    scf.if %18 {
      %c1_i32_114 = arith.constant 1 : i32
      %188 = arith.addi %arg0, %c1_i32_114 : i32
      %c0_i32_115 = arith.constant 0 : i32
      %c0_i32_116 = arith.constant 0 : i32
      %c0_i32_117 = arith.constant 0 : i32
      %c0_i32_118 = arith.constant 0 : i32
      %189 = tpu.memref_slice %arg21[%188, %c0_i32_116, %c0_i32_117, %c0_i32_118] : memref<2x16x8x128xf32, #tpu.memory_space<any>> -> memref<1x16x8x128xf32, #tpu.memory_space<any>>
      %190 = tpu.memref_squeeze %189 : memref<1x16x8x128xf32, #tpu.memory_space<any>> -> memref<16x8x128xf32, #tpu.memory_space<any>>
      %c0_i32_119 = arith.constant 0 : i32
      %c0_i32_120 = arith.constant 0 : i32
      %c0_i32_121 = arith.constant 0 : i32
      %191 = tpu.memref_slice %arg27[%11, %c0_i32_119, %c0_i32_120, %c0_i32_121] : memref<2x16x8x128xf32, #tpu.memory_space<vmem>> -> memref<1x16x8x128xf32, #tpu.memory_space<vmem>>
      %192 = tpu.memref_squeeze %191 : memref<1x16x8x128xf32, #tpu.memory_space<vmem>> -> memref<16x8x128xf32, #tpu.memory_space<vmem>>
      %193 = tpu.memref_slice %arg31[%11, %c0_i32_115] : memref<2x2x!tpu.dma_semaphore, #tpu.memory_space<semaphore_mem>> -> memref<1x1x!tpu.dma_semaphore, #tpu.memory_space<semaphore_mem>>
      %194 = tpu.memref_squeeze %193 : memref<1x1x!tpu.dma_semaphore, #tpu.memory_space<semaphore_mem>> -> memref<!tpu.dma_semaphore, #tpu.memory_space<semaphore_mem>>
      tpu.enqueue_dma source(%190 : memref<16x8x128xf32, #tpu.memory_space<any>>) target(%192 : memref<16x8x128xf32, #tpu.memory_space<vmem>>) target_semaphore(%194 : memref<!tpu.dma_semaphore, #tpu.memory_space<semaphore_mem>>)
      %c1_i32_122 = arith.constant 1 : i32
      %c0_i32_123 = arith.constant 0 : i32
      %c0_i32_124 = arith.constant 0 : i32
      %c0_i32_125 = arith.constant 0 : i32
      %195 = tpu.memref_slice %arg22[%188, %c0_i32_123, %c0_i32_124, %c0_i32_125] : memref<2x16x8x128xf32, #tpu.memory_space<any>> -> memref<1x16x8x128xf32, #tpu.memory_space<any>>
      %196 = tpu.memref_squeeze %195 : memref<1x16x8x128xf32, #tpu.memory_space<any>> -> memref<16x8x128xf32, #tpu.memory_space<any>>
      %c0_i32_126 = arith.constant 0 : i32
      %c0_i32_127 = arith.constant 0 : i32
      %c0_i32_128 = arith.constant 0 : i32
      %197 = tpu.memref_slice %arg28[%11, %c0_i32_126, %c0_i32_127, %c0_i32_128] : memref<2x16x8x128xf32, #tpu.memory_space<vmem>> -> memref<1x16x8x128xf32, #tpu.memory_space<vmem>>
      %198 = tpu.memref_squeeze %197 : memref<1x16x8x128xf32, #tpu.memory_space<vmem>> -> memref<16x8x128xf32, #tpu.memory_space<vmem>>
      %199 = tpu.memref_slice %arg31[%11, %c1_i32_122] : memref<2x2x!tpu.dma_semaphore, #tpu.memory_space<semaphore_mem>> -> memref<1x1x!tpu.dma_semaphore, #tpu.memory_space<semaphore_mem>>
      %200 = tpu.memref_squeeze %199 : memref<1x1x!tpu.dma_semaphore, #tpu.memory_space<semaphore_mem>> -> memref<!tpu.dma_semaphore, #tpu.memory_space<semaphore_mem>>
      tpu.enqueue_dma source(%196 : memref<16x8x128xf32, #tpu.memory_space<any>>) target(%198 : memref<16x8x128xf32, #tpu.memory_space<vmem>>) target_semaphore(%200 : memref<!tpu.dma_semaphore, #tpu.memory_space<semaphore_mem>>)
    } else {
    }
    %c0_9 = arith.constant 0 : index
    %c0_10 = arith.constant 0 : index
    %19 = vector.load %arg26[%c0_9, %c0_10] : memref<8x256xf32, #tpu.memory_space<vmem>>, vector<8x256xf32>
    %20 = arith.mulf %19, %19 : vector<8x256xf32>
    %cst = arith.constant dense<0.000000e+00> : vector<8xf32>
    %21 = vector.multi_reduction <add>, %20, %cst [1] : vector<8x256xf32> to vector<8xf32>
    %22 = vector.shape_cast %21 : vector<8xf32> to vector<8x1xf32>
    %cst_11 = arith.constant 2.560000e+02 : f32
    %23 = vector.broadcast %cst_11 : f32 to vector<8x1xf32>
    %24 = arith.divf %22, %23 : vector<8x1xf32>
    %cst_12 = arith.constant 9.99999974E-6 : f32
    %25 = vector.broadcast %cst_12 : f32 to vector<8x1xf32>
    %26 = arith.addf %24, %25 : vector<8x1xf32>
    %27 = math.rsqrt %26 : vector<8x1xf32>
    %28 = vector.broadcast %27 : vector<8x1xf32> to vector<8x256xf32>
    %29 = arith.mulf %19, %28 : vector<8x256xf32>
    %c0_13 = arith.constant 0 : index
    %c0_14 = arith.constant 0 : index
    %c0_15 = arith.constant 0 : index
    %30 = vector.load %arg4[%c0_13, %c0_14, %c0_15] : memref<1x1x256xf32, #tpu.memory_space<vmem>>, vector<1x1x256xf32>
    %31 = vector.shape_cast %30 : vector<1x1x256xf32> to vector<1x256xf32>
    %32 = vector.broadcast %31 : vector<1x256xf32> to vector<8x256xf32>
    %33 = arith.mulf %29, %32 : vector<8x256xf32>
    %34 = arith.truncf %33 : vector<8x256xf32> to vector<8x256xbf16>
    %c0_16 = arith.constant 0 : index
    %c0_17 = arith.constant 0 : index
    %c0_18 = arith.constant 0 : index
    %35 = vector.load %arg6[%c0_16, %c0_17, %c0_18] : memref<1x256x256xbf16, #tpu.memory_space<vmem>>, vector<1x256x256xbf16>
    %36 = vector.shape_cast %35 : vector<1x256x256xbf16> to vector<256x256xbf16>
    %cst_19 = arith.constant dense<0.000000e+00> : vector<8x256xf32>
    %37 = tpu.matmul %34, %36, %cst_19 {dimension_numbers = #tpu.dot_dimension_numbers<[1], [0], [0], [1], [0, 0, 1, 1], [], []>} : vector<8x256xbf16>, vector<256x256xbf16>, vector<8x256xf32> -> vector<8x256xf32>
    %c0_20 = arith.constant 0 : index
    %c0_21 = arith.constant 0 : index
    %c0_22 = arith.constant 0 : index
    %38 = vector.load %arg7[%c0_20, %c0_21, %c0_22] : memref<1x256x128xbf16, #tpu.memory_space<vmem>>, vector<1x256x128xbf16>
    %39 = vector.shape_cast %38 : vector<1x256x128xbf16> to vector<256x128xbf16>
    %cst_23 = arith.constant dense<0.000000e+00> : vector<8x128xf32>
    %40 = tpu.matmul %34, %39, %cst_23 {dimension_numbers = #tpu.dot_dimension_numbers<[1], [0], [0], [1], [0, 0, 1, 1], [], []>} : vector<8x256xbf16>, vector<256x128xbf16>, vector<8x128xf32> -> vector<8x128xf32>
    %c0_24 = arith.constant 0 : index
    %c0_25 = arith.constant 0 : index
    %c0_26 = arith.constant 0 : index
    %41 = vector.load %arg8[%c0_24, %c0_25, %c0_26] : memref<1x256x128xbf16, #tpu.memory_space<vmem>>, vector<1x256x128xbf16>
    %42 = vector.shape_cast %41 : vector<1x256x128xbf16> to vector<256x128xbf16>
    %cst_27 = arith.constant dense<0.000000e+00> : vector<8x128xf32>
    %43 = tpu.matmul %34, %42, %cst_27 {dimension_numbers = #tpu.dot_dimension_numbers<[1], [0], [0], [1], [0, 0, 1, 1], [], []>} : vector<8x256xbf16>, vector<256x128xbf16>, vector<8x128xf32> -> vector<8x128xf32>
    %c0_28 = arith.constant 0 : index
    %c0_29 = arith.constant 0 : index
    %44 = vector.load %arg13[%c0_28, %c0_29] : memref<1x256xf32, #tpu.memory_space<vmem>>, vector<1x256xf32>
    %c0_30 = arith.constant 0 : index
    %c0_31 = arith.constant 0 : index
    %45 = vector.load %arg14[%c0_30, %c0_31] : memref<1x256xf32, #tpu.memory_space<vmem>>, vector<1x256xf32>
    %c0_32 = arith.constant 0 : index
    %c0_33 = arith.constant 0 : index
    %46 = vector.load %arg15[%c0_32, %c0_33] : memref<1x256xf32, #tpu.memory_space<vmem>>, vector<1x256xf32>
    %47 = vector.broadcast %44 : vector<1x256xf32> to vector<8x256xf32>
    %48 = arith.mulf %37, %47 : vector<8x256xf32>
    %c1_i32_34 = arith.constant 1 : i32
    %49 = tpu.dynamic_rotate %37 by %c1_i32_34 dim 1 : vector<8x256xf32>, i32 -> vector<8x256xf32>
    %50 = vector.broadcast %45 : vector<1x256xf32> to vector<8x256xf32>
    %51 = arith.mulf %49, %50 : vector<8x256xf32>
    %52 = arith.addf %48, %51 : vector<8x256xf32>
    %c255_i32 = arith.constant 255 : i32
    %53 = tpu.dynamic_rotate %37 by %c255_i32 dim 1 : vector<8x256xf32>, i32 -> vector<8x256xf32>
    %54 = vector.broadcast %46 : vector<1x256xf32> to vector<8x256xf32>
    %55 = arith.mulf %53, %54 : vector<8x256xf32>
    %56 = arith.addf %52, %55 : vector<8x256xf32>
    %c0_35 = arith.constant 0 : index
    %c0_36 = arith.constant 0 : index
    %57 = vector.load %arg16[%c0_35, %c0_36] : memref<1x128xf32, #tpu.memory_space<vmem>>, vector<1x128xf32>
    %c0_37 = arith.constant 0 : index
    %c0_38 = arith.constant 0 : index
    %58 = vector.load %arg17[%c0_37, %c0_38] : memref<1x128xf32, #tpu.memory_space<vmem>>, vector<1x128xf32>
    %c0_39 = arith.constant 0 : index
    %c0_40 = arith.constant 0 : index
    %59 = vector.load %arg18[%c0_39, %c0_40] : memref<1x128xf32, #tpu.memory_space<vmem>>, vector<1x128xf32>
    %60 = vector.broadcast %57 : vector<1x128xf32> to vector<8x128xf32>
    %61 = arith.mulf %40, %60 : vector<8x128xf32>
    %c1_i32_41 = arith.constant 1 : i32
    %62 = tpu.dynamic_rotate %40 by %c1_i32_41 dim 1 : vector<8x128xf32>, i32 -> vector<8x128xf32>
    %63 = vector.broadcast %58 : vector<1x128xf32> to vector<8x128xf32>
    %64 = arith.mulf %62, %63 : vector<8x128xf32>
    %65 = arith.addf %61, %64 : vector<8x128xf32>
    %c127_i32 = arith.constant 127 : i32
    %66 = tpu.dynamic_rotate %40 by %c127_i32 dim 1 : vector<8x128xf32>, i32 -> vector<8x128xf32>
    %67 = vector.broadcast %59 : vector<1x128xf32> to vector<8x128xf32>
    %68 = arith.mulf %66, %67 : vector<8x128xf32>
    %69 = arith.addf %65, %68 : vector<8x128xf32>
    %70 = arith.truncf %69 : vector<8x128xf32> to vector<8x128xbf16>
    %71 = arith.truncf %43 : vector<8x128xf32> to vector<8x128xbf16>
    %c0_i32_42 = arith.constant 0 : i32
    %72 = arith.cmpi sgt, %arg0, %c0_i32_42 : i32
    %73 = arith.extui %72 : i1 to i32
    %c0_i32_43 = arith.constant 0 : i32
    %74 = arith.cmpi ne, %73, %c0_i32_43 : i32
    scf.if %74 {
      %c1_i32_114 = arith.constant 1 : i32
      %188 = arith.subi %arg0, %c1_i32_114 : i32
      %c0_i32_115 = arith.constant 0 : i32
      %c0_i32_116 = arith.constant 0 : i32
      %c0_i32_117 = arith.constant 0 : i32
      %189 = tpu.memref_slice %arg24[%188, %0, %c0_i32_116, %c0_i32_117] : memref<2x16x8x128xf32, #tpu.memory_space<any>> -> memref<1x1x2x128xf32, #tpu.memory_space<any>>
      %190 = tpu.memref_squeeze %189 : memref<1x1x2x128xf32, #tpu.memory_space<any>> -> memref<1x2x128xf32, #tpu.memory_space<any>>
      %191 = tpu.memref_slice %arg32[%c0_i32_115] : memref<2x!tpu.dma_semaphore, #tpu.memory_space<semaphore_mem>> -> memref<1x!tpu.dma_semaphore, #tpu.memory_space<semaphore_mem>>
      %192 = tpu.memref_squeeze %191 : memref<1x!tpu.dma_semaphore, #tpu.memory_space<semaphore_mem>> -> memref<!tpu.dma_semaphore, #tpu.memory_space<semaphore_mem>>
      tpu.wait_dma2 semaphore(%192 : memref<!tpu.dma_semaphore, #tpu.memory_space<semaphore_mem>>) src(%arg29 : memref<1x2x128xf32, #tpu.memory_space<vmem>>) dst(%190 : memref<1x2x128xf32, #tpu.memory_space<any>>)
      %c1_i32_118 = arith.constant 1 : i32
      %c0_i32_119 = arith.constant 0 : i32
      %c0_i32_120 = arith.constant 0 : i32
      %193 = tpu.memref_slice %arg25[%188, %0, %c0_i32_119, %c0_i32_120] : memref<2x16x8x128xf32, #tpu.memory_space<any>> -> memref<1x1x2x128xf32, #tpu.memory_space<any>>
      %194 = tpu.memref_squeeze %193 : memref<1x1x2x128xf32, #tpu.memory_space<any>> -> memref<1x2x128xf32, #tpu.memory_space<any>>
      %195 = tpu.memref_slice %arg32[%c1_i32_118] : memref<2x!tpu.dma_semaphore, #tpu.memory_space<semaphore_mem>> -> memref<1x!tpu.dma_semaphore, #tpu.memory_space<semaphore_mem>>
      %196 = tpu.memref_squeeze %195 : memref<1x!tpu.dma_semaphore, #tpu.memory_space<semaphore_mem>> -> memref<!tpu.dma_semaphore, #tpu.memory_space<semaphore_mem>>
      tpu.wait_dma2 semaphore(%196 : memref<!tpu.dma_semaphore, #tpu.memory_space<semaphore_mem>>) src(%arg30 : memref<1x2x128xf32, #tpu.memory_space<vmem>>) dst(%194 : memref<1x2x128xf32, #tpu.memory_space<any>>)
    } else {
    }
    %75 = vector.extract_strided_slice %69 {offsets = [0, 0], sizes = [2, 128], strides = [1, 1]} : vector<8x128xf32> to vector<2x128xf32>
    %76 = vector.shape_cast %75 : vector<2x128xf32> to vector<1x2x128xf32>
    %c0_44 = arith.constant 0 : index
    %c0_45 = arith.constant 0 : index
    %c0_46 = arith.constant 0 : index
    %77 = vector.load %arg29[%c0_44, %c0_45, %c0_46] : memref<1x2x128xf32, #tpu.memory_space<vmem>>, vector<1x2x128xf32>
    tpu.vector_store %arg29[%c0_44, %c0_45, %c0_46], %76 {strides = array<i32>} : memref<1x2x128xf32, #tpu.memory_space<vmem>>, vector<1x2x128xf32>,
    %78 = vector.extract_strided_slice %43 {offsets = [0, 0], sizes = [2, 128], strides = [1, 1]} : vector<8x128xf32> to vector<2x128xf32>
    %79 = vector.shape_cast %78 : vector<2x128xf32> to vector<1x2x128xf32>
    %c0_47 = arith.constant 0 : index
    %c0_48 = arith.constant 0 : index
    %c0_49 = arith.constant 0 : index
    %80 = vector.load %arg30[%c0_47, %c0_48, %c0_49] : memref<1x2x128xf32, #tpu.memory_space<vmem>>, vector<1x2x128xf32>
    tpu.vector_store %arg30[%c0_47, %c0_48, %c0_49], %79 {strides = array<i32>} : memref<1x2x128xf32, #tpu.memory_space<vmem>>, vector<1x2x128xf32>,
    %c0_i32_50 = arith.constant 0 : i32
    %c0_i32_51 = arith.constant 0 : i32
    %c0_i32_52 = arith.constant 0 : i32
    %81 = tpu.memref_slice %arg24[%arg0, %0, %c0_i32_51, %c0_i32_52] : memref<2x16x8x128xf32, #tpu.memory_space<any>> -> memref<1x1x2x128xf32, #tpu.memory_space<any>>
    %82 = tpu.memref_squeeze %81 : memref<1x1x2x128xf32, #tpu.memory_space<any>> -> memref<1x2x128xf32, #tpu.memory_space<any>>
    %83 = tpu.memref_slice %arg32[%c0_i32_50] : memref<2x!tpu.dma_semaphore, #tpu.memory_space<semaphore_mem>> -> memref<1x!tpu.dma_semaphore, #tpu.memory_space<semaphore_mem>>
    %84 = tpu.memref_squeeze %83 : memref<1x!tpu.dma_semaphore, #tpu.memory_space<semaphore_mem>> -> memref<!tpu.dma_semaphore, #tpu.memory_space<semaphore_mem>>
    tpu.enqueue_dma source(%arg29 : memref<1x2x128xf32, #tpu.memory_space<vmem>>) target(%82 : memref<1x2x128xf32, #tpu.memory_space<any>>) target_semaphore(%84 : memref<!tpu.dma_semaphore, #tpu.memory_space<semaphore_mem>>)
    %c1_i32_53 = arith.constant 1 : i32
    %c0_i32_54 = arith.constant 0 : i32
    %c0_i32_55 = arith.constant 0 : i32
    %85 = tpu.memref_slice %arg25[%arg0, %0, %c0_i32_54, %c0_i32_55] : memref<2x16x8x128xf32, #tpu.memory_space<any>> -> memref<1x1x2x128xf32, #tpu.memory_space<any>>
    %86 = tpu.memref_squeeze %85 : memref<1x1x2x128xf32, #tpu.memory_space<any>> -> memref<1x2x128xf32, #tpu.memory_space<any>>
    %87 = tpu.memref_slice %arg32[%c1_i32_53] : memref<2x!tpu.dma_semaphore, #tpu.memory_space<semaphore_mem>> -> memref<1x!tpu.dma_semaphore, #tpu.memory_space<semaphore_mem>>
    %88 = tpu.memref_squeeze %87 : memref<1x!tpu.dma_semaphore, #tpu.memory_space<semaphore_mem>> -> memref<!tpu.dma_semaphore, #tpu.memory_space<semaphore_mem>>
    tpu.enqueue_dma source(%arg30 : memref<1x2x128xf32, #tpu.memory_space<vmem>>) target(%86 : memref<1x2x128xf32, #tpu.memory_space<any>>) target_semaphore(%88 : memref<!tpu.dma_semaphore, #tpu.memory_space<semaphore_mem>>)
    %c0_i32_56 = arith.constant 0 : i32
    %c0_i32_57 = arith.constant 0 : i32
    %c0_i32_58 = arith.constant 0 : i32
    %c0_i32_59 = arith.constant 0 : i32
    %c0_i32_60 = arith.constant 0 : i32
    %89 = tpu.memref_slice %arg21[%c0_i32_56, %c0_i32_58, %c0_i32_59, %c0_i32_60] : memref<2x16x8x128xf32, #tpu.memory_space<any>> -> memref<1x16x8x128xf32, #tpu.memory_space<any>>
    %90 = tpu.memref_squeeze %89 : memref<1x16x8x128xf32, #tpu.memory_space<any>> -> memref<16x8x128xf32, #tpu.memory_space<any>>
    %c0_i32_61 = arith.constant 0 : i32
    %c0_i32_62 = arith.constant 0 : i32
    %c0_i32_63 = arith.constant 0 : i32
    %91 = tpu.memref_slice %arg27[%10, %c0_i32_61, %c0_i32_62, %c0_i32_63] : memref<2x16x8x128xf32, #tpu.memory_space<vmem>> -> memref<1x16x8x128xf32, #tpu.memory_space<vmem>>
    %92 = tpu.memref_squeeze %91 : memref<1x16x8x128xf32, #tpu.memory_space<vmem>> -> memref<16x8x128xf32, #tpu.memory_space<vmem>>
    %93 = tpu.memref_slice %arg31[%10, %c0_i32_57] : memref<2x2x!tpu.dma_semaphore, #tpu.memory_space<semaphore_mem>> -> memref<1x1x!tpu.dma_semaphore, #tpu.memory_space<semaphore_mem>>
    %94 = tpu.memref_squeeze %93 : memref<1x1x!tpu.dma_semaphore, #tpu.memory_space<semaphore_mem>> -> memref<!tpu.dma_semaphore, #tpu.memory_space<semaphore_mem>>
    tpu.wait_dma2 semaphore(%94 : memref<!tpu.dma_semaphore, #tpu.memory_space<semaphore_mem>>) src(%90 : memref<16x8x128xf32, #tpu.memory_space<any>>) dst(%92 : memref<16x8x128xf32, #tpu.memory_space<vmem>>)
    %c0_i32_64 = arith.constant 0 : i32
    %c1_i32_65 = arith.constant 1 : i32
    %c0_i32_66 = arith.constant 0 : i32
    %c0_i32_67 = arith.constant 0 : i32
    %c0_i32_68 = arith.constant 0 : i32
    %95 = tpu.memref_slice %arg22[%c0_i32_64, %c0_i32_66, %c0_i32_67, %c0_i32_68] : memref<2x16x8x128xf32, #tpu.memory_space<any>> -> memref<1x16x8x128xf32, #tpu.memory_space<any>>
    %96 = tpu.memref_squeeze %95 : memref<1x16x8x128xf32, #tpu.memory_space<any>> -> memref<16x8x128xf32, #tpu.memory_space<any>>
    %c0_i32_69 = arith.constant 0 : i32
    %c0_i32_70 = arith.constant 0 : i32
    %c0_i32_71 = arith.constant 0 : i32
    %97 = tpu.memref_slice %arg28[%10, %c0_i32_69, %c0_i32_70, %c0_i32_71] : memref<2x16x8x128xf32, #tpu.memory_space<vmem>> -> memref<1x16x8x128xf32, #tpu.memory_space<vmem>>
    %98 = tpu.memref_squeeze %97 : memref<1x16x8x128xf32, #tpu.memory_space<vmem>> -> memref<16x8x128xf32, #tpu.memory_space<vmem>>
    %99 = tpu.memref_slice %arg31[%10, %c1_i32_65] : memref<2x2x!tpu.dma_semaphore, #tpu.memory_space<semaphore_mem>> -> memref<1x1x!tpu.dma_semaphore, #tpu.memory_space<semaphore_mem>>
    %100 = tpu.memref_squeeze %99 : memref<1x1x!tpu.dma_semaphore, #tpu.memory_space<semaphore_mem>> -> memref<!tpu.dma_semaphore, #tpu.memory_space<semaphore_mem>>
    tpu.wait_dma2 semaphore(%100 : memref<!tpu.dma_semaphore, #tpu.memory_space<semaphore_mem>>) src(%96 : memref<16x8x128xf32, #tpu.memory_space<any>>) dst(%98 : memref<16x8x128xf32, #tpu.memory_space<vmem>>)
    %101 = tpu.iota {dimensions = array<i32: 0>} : vector<16x1x1xi32>
    %102 = vector.broadcast %0 : i32 to vector<16x1x1xi32>
    %103 = arith.cmpi eq, %101, %102 : vector<16x1x1xi32>
    %104 = vector.shape_cast %70 : vector<8x128xbf16> to vector<1x8x128xbf16>
    %105 = arith.index_cast %10 : i32 to index
    %c0_72 = arith.constant 0 : index
    %c0_73 = arith.constant 0 : index
    %c0_74 = arith.constant 0 : index
    %106 = vector.load %arg27[%105, %c0_72, %c0_73, %c0_74] : memref<2x16x8x128xf32, #tpu.memory_space<vmem>>, vector<1x16x8x128xf32>
    %107 = vector.shape_cast %106 : vector<1x16x8x128xf32> to vector<16x8x128xf32>
    %108 = arith.truncf %107 : vector<16x8x128xf32> to vector<16x8x128xbf16>
    %109 = vector.shape_cast %103 : vector<16x1x1xi1> to vector<16x1x1xi1>
    %110 = vector.broadcast %109 : vector<16x1x1xi1> to vector<16x8x128xi1>
    %111 = vector.shape_cast %104 : vector<1x8x128xbf16> to vector<1x8x128xbf16>
    %112 = vector.broadcast %111 : vector<1x8x128xbf16> to vector<16x8x128xbf16>
    %113 = arith.select %110, %112, %108 : vector<16x8x128xi1>, vector<16x8x128xbf16>
    %c0_75 = arith.constant 0 : index
    %c0_76 = arith.constant 0 : index
    %114 = vector.load %arg3[%c0_75, %c0_76] : memref<16x128xf32, #tpu.memory_space<vmem>>, vector<16x128xf32>
    %115 = vector.shape_cast %113 : vector<16x8x128xbf16> to vector<128x128xbf16>
    %116 = vector.shape_cast %56 : vector<8x256xf32> to vector<16x128xf32>
    %117 = arith.truncf %116 : vector<16x128xf32> to vector<16x128xbf16>
    %cst_77 = arith.constant dense<0.000000e+00> : vector<16x128xf32>
    %118 = tpu.matmul %117, %115, %cst_77 {dimension_numbers = #tpu.dot_dimension_numbers<[1], [1], [0], [0], [0, 0, 1, 0], [], []>} : vector<16x128xbf16>, vector<128x128xbf16>, vector<16x128xf32> -> vector<16x128xf32>
    %cst_78 = arith.constant 0.0883883461 : f32
    %119 = vector.broadcast %cst_78 : f32 to vector<16x128xf32>
    %120 = arith.mulf %118, %119 : vector<16x128xf32>
    %121 = arith.addf %120, %114 : vector<16x128xf32>
    %cst_79 = arith.constant dense<0xFF800000> : vector<16xf32>
    %122 = vector.multi_reduction <maximumf>, %121, %cst_79 [1] : vector<16x128xf32> to vector<16xf32>
    %123 = vector.shape_cast %122 : vector<16xf32> to vector<16x1xf32>
    %124 = vector.broadcast %123 : vector<16x1xf32> to vector<16x128xf32>
    %125 = arith.subf %121, %124 : vector<16x128xf32>
    %126 = math.exp %125 : vector<16x128xf32>
    %cst_80 = arith.constant dense<0.000000e+00> : vector<16xf32>
    %127 = vector.multi_reduction <add>, %126, %cst_80 [1] : vector<16x128xf32> to vector<16xf32>
    %128 = vector.shape_cast %127 : vector<16xf32> to vector<16x1xf32>
    %129 = tpu.reciprocal %128 {approx = true} : vector<16x1xf32> -> vector<16x1xf32>
    %130 = vector.broadcast %129 : vector<16x1xf32> to vector<16x128xf32>
    %131 = arith.mulf %126, %130 : vector<16x128xf32>
    %132 = vector.shape_cast %71 : vector<8x128xbf16> to vector<1x8x128xbf16>
    %133 = arith.index_cast %10 : i32 to index
    %c0_81 = arith.constant 0 : index
    %c0_82 = arith.constant 0 : index
    %c0_83 = arith.constant 0 : index
    %134 = vector.load %arg28[%133, %c0_81, %c0_82, %c0_83] : memref<2x16x8x128xf32, #tpu.memory_space<vmem>>, vector<1x16x8x128xf32>
    %135 = vector.shape_cast %134 : vector<1x16x8x128xf32> to vector<16x8x128xf32>
    %136 = arith.truncf %135 : vector<16x8x128xf32> to vector<16x8x128xbf16>
    %137 = vector.shape_cast %103 : vector<16x1x1xi1> to vector<16x1x1xi1>
    %138 = vector.broadcast %137 : vector<16x1x1xi1> to vector<16x8x128xi1>
    %139 = vector.shape_cast %132 : vector<1x8x128xbf16> to vector<1x8x128xbf16>
    %140 = vector.broadcast %139 : vector<1x8x128xbf16> to vector<16x8x128xbf16>
    %141 = arith.select %138, %140, %136 : vector<16x8x128xi1>, vector<16x8x128xbf16>
    %142 = vector.shape_cast %141 : vector<16x8x128xbf16> to vector<128x128xbf16>
    %143 = arith.truncf %131 : vector<16x128xf32> to vector<16x128xbf16>
    %cst_84 = arith.constant dense<0.000000e+00> : vector<16x128xf32>
    %144 = tpu.matmul %143, %142, %cst_84 {dimension_numbers = #tpu.dot_dimension_numbers<[1], [0], [0], [1], [0, 0, 1, 1], [], []>} : vector<16x128xbf16>, vector<128x128xbf16>, vector<16x128xf32> -> vector<16x128xf32>
    %145 = vector.shape_cast %144 : vector<16x128xf32> to vector<8x256xf32>
    %146 = arith.truncf %145 : vector<8x256xf32> to vector<8x256xbf16>
    %c0_85 = arith.constant 0 : index
    %c0_86 = arith.constant 0 : index
    %c0_87 = arith.constant 0 : index
    %147 = vector.load %arg9[%c0_85, %c0_86, %c0_87] : memref<1x256x256xbf16, #tpu.memory_space<vmem>>, vector<1x256x256xbf16>
    %148 = vector.shape_cast %147 : vector<1x256x256xbf16> to vector<256x256xbf16>
    %cst_88 = arith.constant dense<0.000000e+00> : vector<8x256xf32>
    %149 = tpu.matmul %146, %148, %cst_88 {dimension_numbers = #tpu.dot_dimension_numbers<[1], [0], [0], [1], [0, 0, 1, 1], [], []>} : vector<8x256xbf16>, vector<256x256xbf16>, vector<8x256xf32> -> vector<8x256xf32>
    %150 = arith.addf %19, %149 : vector<8x256xf32>
    %151 = arith.mulf %150, %150 : vector<8x256xf32>
    %cst_89 = arith.constant dense<0.000000e+00> : vector<8xf32>
    %152 = vector.multi_reduction <add>, %151, %cst_89 [1] : vector<8x256xf32> to vector<8xf32>
    %153 = vector.shape_cast %152 : vector<8xf32> to vector<8x1xf32>
    %cst_90 = arith.constant 2.560000e+02 : f32
    %154 = vector.broadcast %cst_90 : f32 to vector<8x1xf32>
    %155 = arith.divf %153, %154 : vector<8x1xf32>
    %cst_91 = arith.constant 9.99999974E-6 : f32
    %156 = vector.broadcast %cst_91 : f32 to vector<8x1xf32>
    %157 = arith.addf %155, %156 : vector<8x1xf32>
    %158 = math.rsqrt %157 : vector<8x1xf32>
    %159 = vector.broadcast %158 : vector<8x1xf32> to vector<8x256xf32>
    %160 = arith.mulf %150, %159 : vector<8x256xf32>
    %c0_92 = arith.constant 0 : index
    %c0_93 = arith.constant 0 : index
    %c0_94 = arith.constant 0 : index
    %161 = vector.load %arg5[%c0_92, %c0_93, %c0_94] : memref<1x1x256xf32, #tpu.memory_space<vmem>>, vector<1x1x256xf32>
    %162 = vector.shape_cast %161 : vector<1x1x256xf32> to vector<1x256xf32>
    %163 = vector.broadcast %162 : vector<1x256xf32> to vector<8x256xf32>
    %164 = arith.mulf %160, %163 : vector<8x256xf32>
    %165 = arith.truncf %164 : vector<8x256xf32> to vector<8x256xbf16>
    %c0_95 = arith.constant 0 : index
    %c0_96 = arith.constant 0 : index
    %c0_97 = arith.constant 0 : index
    %166 = vector.load %arg10[%c0_95, %c0_96, %c0_97] : memref<1x256x768xbf16, #tpu.memory_space<vmem>>, vector<1x256x768xbf16>
    %167 = vector.shape_cast %166 : vector<1x256x768xbf16> to vector<256x768xbf16>
    %cst_98 = arith.constant dense<0.000000e+00> : vector<8x768xf32>
    %168 = tpu.matmul %165, %167, %cst_98 {dimension_numbers = #tpu.dot_dimension_numbers<[1], [0], [0], [1], [0, 0, 1, 1], [], []>} : vector<8x256xbf16>, vector<256x768xbf16>, vector<8x768xf32> -> vector<8x768xf32>
    %169 = arith.negf %168 : vector<8x768xf32>
    %170 = math.exp %169 : vector<8x768xf32>
    %cst_99 = arith.constant 1.000000e+00 : f32
    %171 = vector.broadcast %cst_99 : f32 to vector<8x768xf32>
    %172 = arith.addf %171, %170 : vector<8x768xf32>
    %173 = arith.divf %171, %172 : vector<8x768xf32>
    %174 = arith.mulf %168, %173 : vector<8x768xf32>
    %c0_100 = arith.constant 0 : index
    %c0_101 = arith.constant 0 : index
    %c0_102 = arith.constant 0 : index
    %175 = vector.load %arg12[%c0_100, %c0_101, %c0_102] : memref<1x256x768xbf16, #tpu.memory_space<vmem>>, vector<1x256x768xbf16>
    %176 = vector.shape_cast %175 : vector<1x256x768xbf16> to vector<256x768xbf16>
    %cst_103 = arith.constant dense<0.000000e+00> : vector<8x768xf32>
    %177 = tpu.matmul %165, %176, %cst_103 {dimension_numbers = #tpu.dot_dimension_numbers<[1], [0], [0], [1], [0, 0, 1, 1], [], []>} : vector<8x256xbf16>, vector<256x768xbf16>, vector<8x768xf32> -> vector<8x768xf32>
    %178 = arith.mulf %174, %177 : vector<8x768xf32>
    %179 = arith.truncf %178 : vector<8x768xf32> to vector<8x768xbf16>
    %c0_104 = arith.constant 0 : index
    %c0_105 = arith.constant 0 : index
    %c0_106 = arith.constant 0 : index
    %180 = vector.load %arg11[%c0_104, %c0_105, %c0_106] : memref<1x768x256xbf16, #tpu.memory_space<vmem>>, vector<1x768x256xbf16>
    %181 = vector.shape_cast %180 : vector<1x768x256xbf16> to vector<768x256xbf16>
    %cst_107 = arith.constant dense<0.000000e+00> : vector<8x256xf32>
    %182 = tpu.matmul %179, %181, %cst_107 {dimension_numbers = #tpu.dot_dimension_numbers<[1], [0], [0], [1], [0, 0, 1, 1], [], []>} : vector<8x768xbf16>, vector<768x256xbf16>, vector<8x256xf32> -> vector<8x256xf32>
    %183 = arith.addf %150, %182 : vector<8x256xf32>
    %c0_108 = arith.constant 0 : index
    %c0_109 = arith.constant 0 : index
    %184 = vector.load %arg26[%c0_108, %c0_109] : memref<8x256xf32, #tpu.memory_space<vmem>>, vector<8x256xf32>
    tpu.vector_store %arg26[%c0_108, %c0_109], %183 {strides = array<i32>} : memref<8x256xf32, #tpu.memory_space<vmem>>, vector<8x256xf32>,
    %c1_i32_110 = arith.constant 1 : i32
    %185 = arith.cmpi eq, %arg0, %c1_i32_110 : i32
    %186 = arith.extui %185 : i1 to i32
    %c0_i32_111 = arith.constant 0 : i32
    %c1_i32_112 = arith.constant 1 : i32
    %c0_i32_113 = arith.constant 0 : i32
    %187 = arith.cmpi ne, %186, %c0_i32_113 : i32
    scf.if %187 {
      %188 = arith.mulf %183, %183 : vector<8x256xf32>
      %cst_114 = arith.constant dense<0.000000e+00> : vector<8xf32>
      %189 = vector.multi_reduction <add>, %188, %cst_114 [1] : vector<8x256xf32> to vector<8xf32>
      %190 = vector.shape_cast %189 : vector<8xf32> to vector<8x1xf32>
      %cst_115 = arith.constant 2.560000e+02 : f32
      %191 = vector.broadcast %cst_115 : f32 to vector<8x1xf32>
      %192 = arith.divf %190, %191 : vector<8x1xf32>
      %cst_116 = arith.constant 9.99999974E-6 : f32
      %193 = vector.broadcast %cst_116 : f32 to vector<8x1xf32>
      %194 = arith.addf %192, %193 : vector<8x1xf32>
      %195 = math.rsqrt %194 : vector<8x1xf32>
      %196 = vector.broadcast %195 : vector<8x1xf32> to vector<8x256xf32>
      %197 = arith.mulf %183, %196 : vector<8x256xf32>
      %c0_117 = arith.constant 0 : index
      %c0_118 = arith.constant 0 : index
      %198 = vector.load %arg19[%c0_117, %c0_118] : memref<1x256xf32, #tpu.memory_space<vmem>>, vector<1x256xf32>
      %199 = vector.broadcast %198 : vector<1x256xf32> to vector<8x256xf32>
      %200 = arith.mulf %197, %199 : vector<8x256xf32>
      %201 = arith.truncf %200 : vector<8x256xf32> to vector<8x256xbf16>
      %c0_119 = arith.constant 0 : index
      %c0_120 = arith.constant 0 : index
      %202 = vector.load %arg20[%c0_119, %c0_120] : memref<256x128xbf16, #tpu.memory_space<vmem>>, vector<256x128xbf16>
      %cst_121 = arith.constant dense<0.000000e+00> : vector<8x128xf32>
      %203 = tpu.matmul %201, %202, %cst_121 {dimension_numbers = #tpu.dot_dimension_numbers<[1], [0], [0], [1], [0, 0, 1, 1], [], []>} : vector<8x256xbf16>, vector<256x128xbf16>, vector<8x128xf32> -> vector<8x128xf32>
      %c0_122 = arith.constant 0 : index
      %c0_123 = arith.constant 0 : index
      %204 = vector.load %arg23[%c0_122, %c0_123] : memref<8x128xf32, #tpu.memory_space<vmem>>, vector<8x128xf32>
      tpu.vector_store %arg23[%c0_122, %c0_123], %203 {strides = array<i32>} : memref<8x128xf32, #tpu.memory_space<vmem>>, vector<8x128xf32>,
      %c0_i32_124 = arith.constant 0 : i32
      %c0_i32_125 = arith.constant 0 : i32
      %205 = tpu.memref_slice %arg24[%arg0, %0, %c0_i32_124, %c0_i32_125] : memref<2x16x8x128xf32, #tpu.memory_space<any>> -> memref<1x1x2x128xf32, #tpu.memory_space<any>>
      %206 = tpu.memref_squeeze %205 : memref<1x1x2x128xf32, #tpu.memory_space<any>> -> memref<1x2x128xf32, #tpu.memory_space<any>>
      %207 = tpu.memref_slice %arg32[%c0_i32_111] : memref<2x!tpu.dma_semaphore, #tpu.memory_space<semaphore_mem>> -> memref<1x!tpu.dma_semaphore, #tpu.memory_space<semaphore_mem>>
      %208 = tpu.memref_squeeze %207 : memref<1x!tpu.dma_semaphore, #tpu.memory_space<semaphore_mem>> -> memref<!tpu.dma_semaphore, #tpu.memory_space<semaphore_mem>>
      tpu.wait_dma2 semaphore(%208 : memref<!tpu.dma_semaphore, #tpu.memory_space<semaphore_mem>>) src(%arg29 : memref<1x2x128xf32, #tpu.memory_space<vmem>>) dst(%206 : memref<1x2x128xf32, #tpu.memory_space<any>>)
      %c0_i32_126 = arith.constant 0 : i32
      %c0_i32_127 = arith.constant 0 : i32
      %209 = tpu.memref_slice %arg25[%arg0, %0, %c0_i32_126, %c0_i32_127] : memref<2x16x8x128xf32, #tpu.memory_space<any>> -> memref<1x1x2x128xf32, #tpu.memory_space<any>>
      %210 = tpu.memref_squeeze %209 : memref<1x1x2x128xf32, #tpu.memory_space<any>> -> memref<1x2x128xf32, #tpu.memory_space<any>>
      %211 = tpu.memref_slice %arg32[%c1_i32_112] : memref<2x!tpu.dma_semaphore, #tpu.memory_space<semaphore_mem>> -> memref<1x!tpu.dma_semaphore, #tpu.memory_space<semaphore_mem>>
      %212 = tpu.memref_squeeze %211 : memref<1x!tpu.dma_semaphore, #tpu.memory_space<semaphore_mem>> -> memref<!tpu.dma_semaphore, #tpu.memory_space<semaphore_mem>>
      tpu.wait_dma2 semaphore(%212 : memref<!tpu.dma_semaphore, #tpu.memory_space<semaphore_mem>>) src(%arg30 : memref<1x2x128xf32, #tpu.memory_space<vmem>>) dst(%210 : memref<1x2x128xf32, #tpu.memory_space<any>>)
    } else {
    }
    return
  }
  func.func @transform_0(%arg0: i32) -> i32 {
    %c0_i32 = arith.constant 0 : i32
    %c0_i32_0 = arith.constant 0 : i32
    return %c0_i32 : i32
  }
  func.func @transform_1(%arg0: i32) -> (i32, i32) {
    %c0_i32 = arith.constant 0 : i32
    %c0_i32_0 = arith.constant 0 : i32
    %c0_i32_1 = arith.constant 0 : i32
    return %c0_i32, %c0_i32_0 : i32, i32
  }
  func.func @transform_2(%arg0: i32) -> (i32, i32) {
    %c0_i32 = arith.constant 0 : i32
    %c0_i32_0 = arith.constant 0 : i32
    %c0_i32_1 = arith.constant 0 : i32
    return %c0_i32, %c0_i32_0 : i32, i32
  }
  func.func @transform_3(%arg0: i32) -> (i32, i32, i32) {
    %c0_i32 = arith.constant 0 : i32
    %c0_i32_0 = arith.constant 0 : i32
    %c0_i32_1 = arith.constant 0 : i32
    return %arg0, %c0_i32, %c0_i32_0 : i32, i32, i32
  }
  func.func @transform_4(%arg0: i32) -> (i32, i32, i32) {
    %c0_i32 = arith.constant 0 : i32
    %c0_i32_0 = arith.constant 0 : i32
    %c0_i32_1 = arith.constant 0 : i32
    return %arg0, %c0_i32, %c0_i32_0 : i32, i32, i32
  }
  func.func @transform_5(%arg0: i32) -> (i32, i32, i32) {
    %c0_i32 = arith.constant 0 : i32
    %c0_i32_0 = arith.constant 0 : i32
    %c0_i32_1 = arith.constant 0 : i32
    return %arg0, %c0_i32, %c0_i32_0 : i32, i32, i32
  }
  func.func @transform_6(%arg0: i32) -> (i32, i32, i32) {
    %c0_i32 = arith.constant 0 : i32
    %c0_i32_0 = arith.constant 0 : i32
    %c0_i32_1 = arith.constant 0 : i32
    return %arg0, %c0_i32, %c0_i32_0 : i32, i32, i32
  }
  func.func @transform_7(%arg0: i32) -> (i32, i32, i32) {
    %c0_i32 = arith.constant 0 : i32
    %c0_i32_0 = arith.constant 0 : i32
    %c0_i32_1 = arith.constant 0 : i32
    return %arg0, %c0_i32, %c0_i32_0 : i32, i32, i32
  }
  func.func @transform_8(%arg0: i32) -> (i32, i32, i32) {
    %c0_i32 = arith.constant 0 : i32
    %c0_i32_0 = arith.constant 0 : i32
    %c0_i32_1 = arith.constant 0 : i32
    return %arg0, %c0_i32, %c0_i32_0 : i32, i32, i32
  }
  func.func @transform_9(%arg0: i32) -> (i32, i32, i32) {
    %c0_i32 = arith.constant 0 : i32
    %c0_i32_0 = arith.constant 0 : i32
    %c0_i32_1 = arith.constant 0 : i32
    return %arg0, %c0_i32, %c0_i32_0 : i32, i32, i32
  }
  func.func @transform_10(%arg0: i32) -> (i32, i32, i32) {
    %c0_i32 = arith.constant 0 : i32
    %c0_i32_0 = arith.constant 0 : i32
    %c0_i32_1 = arith.constant 0 : i32
    return %arg0, %c0_i32, %c0_i32_0 : i32, i32, i32
  }
  func.func @transform_11(%arg0: i32) -> (i32, i32, i32) {
    %c0_i32 = arith.constant 0 : i32
    %c0_i32_0 = arith.constant 0 : i32
    %c0_i32_1 = arith.constant 0 : i32
    return %arg0, %c0_i32, %c0_i32_0 : i32, i32, i32
  }
  func.func @transform_12(%arg0: i32) -> (i32, i32) {
    %c0_i32 = arith.constant 0 : i32
    %c0_i32_0 = arith.constant 0 : i32
    %c0_i32_1 = arith.constant 0 : i32
    return %c0_i32, %c0_i32_0 : i32, i32
  }
  func.func @transform_13(%arg0: i32) -> (i32, i32) {
    %c0_i32 = arith.constant 0 : i32
    %c0_i32_0 = arith.constant 0 : i32
    %c0_i32_1 = arith.constant 0 : i32
    return %c0_i32, %c0_i32_0 : i32, i32
  }
  func.func @transform_14(%arg0: i32) -> (i32, i32) {
    %c0_i32 = arith.constant 0 : i32
    %c0_i32_0 = arith.constant 0 : i32
    %c0_i32_1 = arith.constant 0 : i32
    return %c0_i32, %c0_i32_0 : i32, i32
  }
  func.func @transform_15(%arg0: i32) -> (i32, i32) {
    %c0_i32 = arith.constant 0 : i32
    %c0_i32_0 = arith.constant 0 : i32
    %c0_i32_1 = arith.constant 0 : i32
    return %c0_i32, %c0_i32_0 : i32, i32
  }
  func.func @transform_16(%arg0: i32) -> (i32, i32) {
    %c0_i32 = arith.constant 0 : i32
    %c0_i32_0 = arith.constant 0 : i32
    %c0_i32_1 = arith.constant 0 : i32
    return %c0_i32, %c0_i32_0 : i32, i32
  }
  func.func @transform_17(%arg0: i32) -> (i32, i32) {
    %c0_i32 = arith.constant 0 : i32
    %c0_i32_0 = arith.constant 0 : i32
    %c0_i32_1 = arith.constant 0 : i32
    return %c0_i32, %c0_i32_0 : i32, i32
  }
  func.func @transform_18(%arg0: i32) -> (i32, i32) {
    %c0_i32 = arith.constant 0 : i32
    %c0_i32_0 = arith.constant 0 : i32
    %c0_i32_1 = arith.constant 0 : i32
    return %c0_i32, %c0_i32_0 : i32, i32
  }
  func.func @transform_19(%arg0: i32) -> (i32, i32) {
    %c0_i32 = arith.constant 0 : i32
    %c0_i32_0 = arith.constant 0 : i32
    %c0_i32_1 = arith.constant 0 : i32
    return %c0_i32, %c0_i32_0 : i32, i32
  }
  func.func @transform_22(%arg0: i32) -> (i32, i32) {
    %c0_i32 = arith.constant 0 : i32
    %c0_i32_0 = arith.constant 0 : i32
    %c0_i32_1 = arith.constant 0 : i32
    return %c0_i32, %c0_i32_0 : i32, i32
  }
}

</mosaic_0001>

<bundles_post_ra>
// kernel: tile.28
= control target key start
LH: loop header
LB: loop body
LE: loop exit
PB: predicated region body
PF: predicated region fallthrough
CT: control target
= control target key end

     0   :  { %s22_s0 = inlined_call_operand.vmem [shape: f32[128], index: 0, kind: input, shape index: {}]   ;;  %s23_s1 = inlined_call_operand.vmem [shape: f32[2,128], index: 1, kind: output, shape index: {}]  }
   0x1   :  { %v4_v0 = vld [vmem:[%s22_s0] ss:$0 sm:$0xff] }
   0x2   :  { %5 = vst [vmem:[%s23_s1] sm:$0x3] %v4_v0 }

// kernel: transformer_forward.1
= control target key start
LH: loop header
LB: loop body
LE: loop exit
PB: predicated region body
PF: predicated region fallthrough
CT: control target
= control target key end

     0   :  { %s8404_s0 = inlined_call_operand.<no memory space> [shape: s32[1], index: 0, kind: input, shape index: {}]   ;;  %s8405_s1 = inlined_call_operand.vmem [shape: f32[8,256], index: 1, kind: input, shape index: {}]   ;;  %s8406_s2 = inlined_call_operand.vmem [shape: f32[16,128], index: 2, kind: input, shape index: {}]   ;;  %s8407_s3 = inlined_call_operand.vmem [shape: f32[2,1,256], index: 3, kind: input, shape index: {}]   ;;  %s8408_s4 = inlined_call_operand.vmem [shape: f32[2,1,256], index: 4, kind: input, shape index: {}]   ;;  %s8409_s5 = inlined_call_operand.hbm [shape: bf16[2,256,256], index: 5, kind: input, shape index: {}]   ;;  %s8410_s6 = inlined_call_operand.hbm [shape: bf16[2,256,128], index: 6, kind: input, shape index: {}]   ;;  %s8411_s7 = inlined_call_operand.hbm [shape: bf16[2,256,128], index: 7, kind: input, shape index: {}]   ;;  %s8412_s8 = inlined_call_operand.hbm [shape: bf16[2,256,256], index: 8, kind: input, shape index: {}]   ;;  %s8413_s9 = inlined_call_operand.vmem [shape: bf16[2,256,768], index: 9, kind: input, shape index: {}]   ;;  %s8414_s10 = inlined_call_operand.hbm [shape: bf16[2,768,256], index: 10, kind: input, shape index: {}]   ;;  %s8415_s11 = inlined_call_operand.hbm [shape: bf16[2,256,768], index: 11, kind: input, shape index: {}]   ;;  %s8416_s12 = inlined_call_operand.vmem [shape: f32[1,256], index: 12, kind: input, shape index: {}]   ;;  %s8417_s13 = inlined_call_operand.vmem [shape: f32[1,256], index: 13, kind: input, shape index: {}]   ;;  %s8418_s14 = inlined_call_operand.vmem [shape: f32[1,256], index: 14, kind: input, shape index: {}]   ;;  %s8419_s15 = inlined_call_operand.vmem [shape: f32[1,128], index: 15, kind: input, shape index: {}]   ;;  %s8420_s16 = inlined_call_operand.vmem [shape: f32[1,128], index: 16, kind: input, shape index: {}]   ;;  %s8421_s17 = inlined_call_operand.vmem [shape: f32[1,128], index: 17, kind: input, shape index: {}]   ;;  %s8422_s18 = inlined_call_operand.vmem [shape: f32[1,256], index: 18, kind: input, shape index: {}]   ;;  %s8423_s19 = inlined_call_operand.hbm [shape: bf16[256,128], index: 19, kind: input, shape index: {}]   ;;  %s8424_s20 = inlined_call_operand.vmem [shape: f32[2,16,8,128], index: 20, kind: input, shape index: {}, may-alias: {20,23}]   ;;  %s8425_s21 = inlined_call_operand.vmem [shape: f32[2,16,8,128], index: 21, kind: input, shape index: {}, may-alias: {21,24}]   ;;  %s8426_s22 = inlined_call_operand.vmem [shape: f32[8,128], index: 22, kind: output, shape index: {0}]   ;;  %s8427_s23 = inlined_call_operand.vmem [shape: f32[2,16,8,128], index: 23, kind: output, shape index: {1}, may-alias: {20,23}]   ;;  %s8428_s24 = inlined_call_operand.vmem [shape: f32[2,16,8,128], index: 24, kind: output, shape index: {2}, may-alias: {21,24}]  }
   0x1   :  { %8459 = sst [smem:[#allocation43_spill]] %s8404_s0 }
   0x2   :  { %8460 = sst [smem:[#allocation44_spill]] %s8405_s1  ;;  %s8483_s27 = sld [smem:[#allocation43_spill]] }
   0x3   :  { %8461 = sst [smem:[#allocation45_spill]] %s8406_s2 }
   0x4   :  { %8462 = sst [smem:[#allocation46_spill]] %s8407_s3 }
   0x5   :  { %8463 = sst [smem:[#allocation47_spill]] %s8408_s4 }
   0x6   :  { %8464 = sst [smem:[#allocation48_spill]] %s8409_s5 }
   0x7   :  { %8465 = sst [smem:[#allocation49_spill]] %s8410_s6 }
   0x8   :  { %8466 = sst [smem:[#allocation50_spill]] %s8411_s7 }
   0x9   :  { %8467 = sst [smem:[#allocation51_spill]] %s8412_s8 }
   0xa   :  { %8468 = sst [smem:[#allocation52_spill]] %s8413_s9 }
   0xb   :  { %8469 = sst [smem:[#allocation53_spill]] %s8414_s10 }
   0xc   :  { %8470 = sst [smem:[#allocation54_spill]] %s8416_s12 }
   0xd   :  { %8471 = sst [smem:[#allocation55_spill]] %s8417_s13 }
   0xe   :  { %8472 = sst [smem:[#allocation56_spill]] %s8418_s14 }
   0xf   :  { %8473 = sst [smem:[#allocation57_spill]] %s8419_s15 }
  0x10   :  { %8474 = sst [smem:[#allocation58_spill]] %s8420_s16 }
  0x11   :  { %8475 = sst [smem:[#allocation59_spill]] %s8421_s17 }
  0x12   :  { %8476 = sst [smem:[#allocation60_spill]] %s8422_s18 }
  0x13   :  { %8477 = sst [smem:[#allocation61_spill]] %s8423_s19 }
  0x14   :  { %8478 = sst [smem:[#allocation62_spill]] %s8424_s20 }
  0x15   :  { %8479 = sst [smem:[#allocation63_spill]] %s8425_s21 }
  0x16   :  { %8480 = sst [smem:[#allocation64_spill]] %s8426_s22 }
  0x17   :  { %8481 = sst [smem:[#allocation65_spill]] %s8427_s23 }
  0x18   :  { %8482 = sst [smem:[#allocation66_spill]] %s8428_s24 }
  0x19   :  { %30 = sst [smem:[#allocation9]] %s8483_s27 }
  0x1a   :  { %31 = vsyncpa [#allocation11], 0 }
  0x1b   :  { %33 = vsyncpa [#allocation11 + $0x1], 0 }
  0x1c   :  { %34 = vsyncpa [#allocation13], 0 }
  0x1d   :  { %36 = vsyncpa [#allocation13 + $0x1], 0 }
  0x1e   :  { %37 = vsyncpa [#allocation16], 0 }
  0x1f   :  { %39 = vsyncpa [#allocation16 + $0x1], 0 }
  0x20   :  { %40 = vsyncpa [#allocation19], 0 }
  0x21   :  { %42 = vsyncpa [#allocation19 + $0x1], 0  ;;  %s7144_s28 = smov 0   ;;  %s7146_s6 = smov 0  }
  0x22   :  { %s7148_s2 = smov 0   ;;  %s7150_s29 = smov 0  }
  0x23 LB: > { %8484 = sst [smem:[#allocation38_spill]] %s6991_s2  ;;  %s7163_s0 = sadd.s32 4294967295, %s6995_s29   ;;  %s6995_s29 = sphi %s7150_s29, %s8536_s29   ;;  %s6991_s2 = sphi %s7148_s2, %s8538_s2   ;;  %s6987_s6 = sphi %s7146_s6, %s8540_s6   ;;  %s6983_s28 = sphi %s7144_s28, %s8539_s28  }
  0x24   : > { %8485 = sst [smem:[#allocation39_spill]] %s7163_s0  ;;  %s7166_s7 = sadd.s32 1, %s6995_s29  }
  0x25   : > { %8486 = sst [smem:[#allocation40_spill]] %s7166_s7  ;;  %s167_s30 = ssub.s32 %s6995_s29, %s7166_s7 }
  0x26   : > { %s170_s3 = sadd.s32 1, %s6991_s2  ;;  %p168_p0 = scmp.eq.s32.totalorder %s167_s30, 0 }
  0x27   : > { %p177_p1 = scmp.ne.s32.totalorder %s6991_s2, %s6987_s6  ;;  %p178_p2 = scmp.eq.s32.totalorder %s6995_s29, 0 }
  0x28   : > { %p183_p3 = scmp.ne.s32.totalorder %s6987_s6, %s6983_s28  ;;  %p8438_p5 = scmp.eq.s32.totalorder %s7163_s0, 0 }
  0x29   : > { %s7176_s25 = scalar_select %p168_p0, %s6991_s2, %s170_s3  }
  0x2a   : > { %p7178_p4 = por %p178_p2, %p177_p1  ;;  %p5372_p6 = scmp.ge.s32.totalorder %s6995_s29, 1 }
  0x2b   : > { %8487 = sst [smem:[#allocation41_spill]] %s7176_s25  ;;  %p539_p7 = scmp.lt.s32.totalorder %s6995_s29, 3 }
  0x2c   : > { %p7187_p8 = por %p8438_p5, %p183_p3  ;;  %s6997_s5 = smov [#allocation20]  }
  0x2d   : > { %p7192_p10 = pnand %p5372_p6, %p539_p7  ;;  %s581_s26 = sshll.u32 %s6997_s5, 4  ;;  %s582_s26 = int_to_ptr.vmem [resolvable:$true] %s581_s26 }
  0x2e   : > { %s8489_s4 = scalar_select %p7187_p8, 1, 0 }
  0x2f   : > { %s8491_s1 = scalar_select %p7192_p10, 1, 0 }
  0x30   : > { %8490 = sst [smem:[#allocation42_spill]] %s8489_s4  ;;  %p6035_p11 = pneg %p7192_p10 }
  0x31   : > { %p6059_p13 = scmp.lt.s32.totalorder %s6995_s29, 2  ;;  %s7206_s28 = sand.u32 1, %s6991_s2  }
  0x32   : > { %p7200_p12 = pnand %p6035_p11, %p8438_p5  ;;  %s7209_s30 = sand.u32 1, %s6995_s29  }
  0x33   : > { %p7213_p0 = pnand %p6059_p13, %p7178_p4  ;;  %s8494_s19 = sld [smem:[#allocation61_spill]] }
  0x34   : > { %p6723_p2 = pneg %p7200_p12 }
  0x35   : > { %s8493_s3 = scalar_select %p7213_p0, 1, 0 }
  0x39   : > { %s6721_s7 = scalar_lea.hbm %s8494_s19, 2048 }
  0x3a   : > { %p6722_p1 = scmp.ne.s32.totalorder %s8494_s19, %s6721_s7  ;;  %p6728_p7 = scmp.lt.u32.totalorder %s6721_s7, %s8494_s19 }
  0x3c   : > { %p6724_p3 = pnand %p6723_p2, %p6722_p1 }
  0x3e   : > { %p6725_p6 = pneg %p6724_p3 }
  0x40   : > { %p6730_p4 = pnand %p6728_p7, %p6725_p6 }
  0x42   : > { %6733 = shalt.err (!%p6730_p4)
}
  0x43   : > { %s6734_s8 = scalar_lea.vmem %s582_s26, 2048  ;;  %p6742_p5 = scmp.lt.s32.totalorder %s582_s26, %s582_s26 }
  0x44   : > { %p6735_p11 = scmp.ne.s32.totalorder %s582_s26, %s6734_s8  ;;  %p6743_p8 = scmp.lt.s32.totalorder %s6734_s8, %s6734_s8 }
  0x46   : > { %p6737_p13 = pnand %p6735_p11, %p6723_p2  ;;  %p6744_p10 = por %p6743_p8, %p6742_p5 }
  0x48   : > { %p6738_p9 = pneg %p6737_p13 }
  0x4a   : > { %p6745_p0 = pnand %p6744_p10, %p6738_p9 }
  0x4c   : > { %6748 = shalt.err (!%p6745_p0)
}
  0x4d   : > { %s8442_s18 = smov 64   ;;  %s8445_s22 = smov 4  }
  0x4e   : > { %6038 = dma.hbm_to_vmem [thread:$0]  (!%p7200_p12), %s8494_s19, 2048, %s582_s26, [#allocation19], %s8442_s18, %s8442_s18, %s8445_s22  }
  0x4f   : > { %s8444_s7 = sshll.u32 %s7206_s28, 7  ;;  %s5883_s25 = sshll.u32 %s6995_s29, 11 }
  0x50   : > { %s8495_s23 = sld [smem:[#allocation49_spill]]  ;;  %s634_s27 = scalar_lea.vmem [#allocation12], %s8444_s7 }
  0x51   : > { %s641_s17 = sshll.u32 %s634_s27, 4  ;;  %s8496_s24 = sld [smem:[#allocation50_spill]]  ;;  %s7245_s17 = int_to_ptr.vmem [resolvable:$true] %s641_s17 }
  0x52   : > { %s8448_s2 = scalar_lea.sflag [#allocation13], %s7209_s30  ;;  %p8497_p8 = scmp.ne.s32.totalorder %s8493_s3, 0 }
  0x54   : > { %p7257_p9 = pneg %p8497_p8 }
  0x56   : > { %s7241_s14 = scalar_lea.hbm %s8495_s23, %s5883_s25  ;;  %s6754_s7 = scalar_lea.hbm %s8495_s23, 4096 }
  0x57   : > { %s7250_s26 = scalar_lea.hbm %s8496_s24, %s5883_s25  ;;  %s6749_s18 = scalar_lea.hbm %s7241_s14, 2048 }
  0x58   : > { %p6750_p5 = scmp.ne.s32.totalorder %s7241_s14, %s6749_s18  ;;  %p6755_p0 = scmp.lt.u32.totalorder %s7241_s14, %s8495_s23 }
  0x59   : > { %p6756_p1 = scmp.lt.u32.totalorder %s6754_s7, %s6749_s18  ;;  %p6758_p3 = scmp.lt.u32.totalorder %s6749_s18, %s7241_s14 }
  0x5a   : > { %p6752_p10 = pnand %p7257_p9, %p6750_p5 }
  0x5b   : > { %p6757_p2 = por %p6756_p1, %p6755_p0 }
  0x5c   : > { %p6753_p12 = pneg %p6752_p10 }
  0x5d   : > { %p6759_p6 = por %p6758_p3, %p6757_p2 }
  0x5f   : > { %p6760_p7 = pnand %p6759_p6, %p6753_p12 }
  0x61   : > { %6763 = shalt.err (!%p6760_p7)
}
  0x62   : > { %s6764_s15 = scalar_lea.vmem %s7245_s17, 2048  ;;  %s7000_s25 = smov [#allocation12]  }
  0x63   : > { %p6765_p4 = scmp.ne.s32.totalorder %s7245_s17, %s6764_s15  ;;  %s6769_s8 = sshll.u32 %s7000_s25, 4  ;;  %s6770_s8 = int_to_ptr.vmem [resolvable:$false] %s6769_s8 }
  0x64   : > { %s6771_s22 = scalar_lea.vmem %s6770_s8, 4096  ;;  %p6772_p5 = scmp.lt.s32.totalorder %s7245_s17, %s6770_s8 }
  0x65   : > { %p6767_p11 = pnand %p6765_p4, %p7257_p9  ;;  %p6773_p10 = scmp.lt.s32.totalorder %s6771_s22, %s6764_s15 }
  0x67   : > { %p6768_p13 = pneg %p6767_p11  ;;  %p6774_p0 = por %p6773_p10, %p6772_p5 }
  0x69   : > { %p6775_p1 = pnand %p6774_p0, %p6768_p13 }
  0x6b   : > { %6778 = shalt.err (!%p6775_p1)
}
  0x6c   : > { %s8499_s18 = smov 4   ;;  %s8500_s7 = smov 64  }
  0x6d   : > { %6045 = dma.hbm_to_vmem [thread:$0]  (!%p8497_p8), %s7241_s14, 2048, %s7245_s17, %s8448_s2, %s8500_s7, %s8500_s7, %s8499_s18  }
  0x6e   : > { %s8501_s27 = sshll.u32 %s7206_s28, 7  ;;  %s5375_s25 = sshll.u32 %s7206_s28, 8 }
  0x6f   : > { %s655_s12 = scalar_lea.vmem [#allocation14], %s8501_s27  ;;  %s8449_s8 = sshll.u32 %s6995_s29, 12 }
  0x70   : > { %s662_s15 = sshll.u32 %s655_s12, 4  ;;  %s8502_s23 = sld [smem:[#allocation51_spill]]  ;;  %s7288_s15 = int_to_ptr.vmem [resolvable:$true] %s662_s15 }
  0x71   : > { %s676_s16 = scalar_lea.vmem [#allocation15], %s5375_s25  ;;  %s673_s17 = scalar_lea.sflag [#allocation16], %s7209_s30 }
  0x72   : > { %s683_s14 = sshll.u32 %s676_s16, 4  ;;  %s7300_s14 = int_to_ptr.vmem [resolvable:$true] %s683_s14 }
  0x76   : > { %s7296_s13 = scalar_lea.hbm %s8502_s23, %s8449_s8  ;;  %s6784_s19 = scalar_lea.hbm %s8502_s23, 8192 }
  0x77   : > { %s6779_s27 = scalar_lea.hbm %s7296_s13, 4096  ;;  %p6785_p6 = scmp.lt.u32.totalorder %s7296_s13, %s8502_s23 }
  0x78   : > { %p6780_p12 = scmp.ne.s32.totalorder %s7296_s13, %s6779_s27  ;;  %p6786_p7 = scmp.lt.u32.totalorder %s6784_s19, %s6779_s27 }
  0x79   : > { %p6788_p11 = scmp.lt.u32.totalorder %s6779_s27, %s7296_s13 }
  0x7a   : > { %p6782_p2 = pnand %p6780_p12, %p7257_p9  ;;  %p6787_p4 = por %p6786_p7, %p6785_p6 }
  0x7c   : > { %p6783_p3 = pneg %p6782_p2  ;;  %p6789_p13 = por %p6788_p11, %p6787_p4 }
  0x7e   : > { %p6790_p5 = pnand %p6789_p13, %p6783_p3 }
  0x80   : > { %6793 = shalt.err (!%p6790_p5)
}
  0x81   : > { %s6794_s16 = scalar_lea.vmem %s7300_s14, 4096  ;;  %s7001_s2 = smov [#allocation15]  }
  0x82   : > { %p6795_p10 = scmp.ne.s32.totalorder %s7300_s14, %s6794_s16  ;;  %s6799_s12 = sshll.u32 %s7001_s2, 4  ;;  %s6800_s12 = int_to_ptr.vmem [resolvable:$false] %s6799_s12 }
  0x83   : > { %s6801_s8 = scalar_lea.vmem %s6800_s12, 8192  ;;  %p6802_p12 = scmp.lt.s32.totalorder %s7300_s14, %s6800_s12 }
  0x84   : > { %p6797_p0 = pnand %p6795_p10, %p7257_p9  ;;  %p6803_p2 = scmp.lt.s32.totalorder %s6801_s8, %s6794_s16 }
  0x86   : > { %p6798_p1 = pneg %p6797_p0  ;;  %p6804_p6 = por %p6803_p2, %p6802_p12 }
  0x88   : > { %p6805_p7 = pnand %p6804_p6, %p6798_p1 }
  0x8a   : > { %6808 = shalt.err (!%p6805_p7)
}
  0x8b   : > { %s7002_s27 = smov 128   ;;  %s7003_s19 = smov 8  }
  0x8c   : > { %6051 = dma.hbm_to_vmem [thread:$0]  (!%p8497_p8), %s7296_s13, 4096, %s7300_s14, %s673_s17, %s7002_s27, %s7002_s27, %s7003_s19  }
  0x8d   : > { %s8503_s22 = sshll.u32 %s6995_s29, 12  ;;  %s8504_s12 = sld [smem:[#allocation48_spill]] }
  0x8e   : > { %s613_s23 = scalar_lea.vmem [#allocation10], %s5375_s25  ;;  %s6010_s20 = smul.u32 768, %s7206_s28 }
  0x8f   : > { %s620_s21 = sshll.u32 %s613_s23, 4  ;;  %s6011_s9 = smul.u32 12288, %s6995_s29  ;;  %s7339_s21 = int_to_ptr.vmem [resolvable:$true] %s620_s21 }
  0x90   : > { %s610_s0 = scalar_lea.sflag [#allocation11], %s7206_s28 }
  0x93   : > { %s7334_s8 = scalar_lea.hbm %s8504_s12, %s8503_s22  ;;  %s6814_s22 = scalar_lea.hbm %s8504_s12, 8192 }
  0x94   : > { %s6809_s4 = scalar_lea.hbm %s7334_s8, 4096  ;;  %p6815_p13 = scmp.lt.u32.totalorder %s7334_s8, %s8504_s12 }
  0x95   : > { %p6810_p3 = scmp.ne.s32.totalorder %s7334_s8, %s6809_s4  ;;  %p6816_p5 = scmp.lt.u32.totalorder %s6814_s22, %s6809_s4 }
  0x96   : > { %p6818_p0 = scmp.lt.u32.totalorder %s6809_s4, %s7334_s8 }
  0x97   : > { %p6812_p4 = pnand %p6810_p3, %p7257_p9  ;;  %p6817_p10 = por %p6816_p5, %p6815_p13 }
  0x99   : > { %p6813_p11 = pneg %p6812_p4  ;;  %p6819_p1 = por %p6818_p0, %p6817_p10 }
  0x9b   : > { %p6820_p12 = pnand %p6819_p1, %p6813_p11 }
  0x9d   : > { %6823 = shalt.err (!%p6820_p12)
}
  0x9e   : > { %s6824_s23 = scalar_lea.vmem %s7339_s21, 4096  ;;  %s7004_s25 = smov [#allocation10]  }
  0x9f   : > { %p6825_p2 = scmp.ne.s32.totalorder %s7339_s21, %s6824_s23  ;;  %s6829_s13 = sshll.u32 %s7004_s25, 4  ;;  %s6830_s13 = int_to_ptr.vmem [resolvable:$false] %s6829_s13 }
  0xa0   : > { %s6831_s14 = scalar_lea.vmem %s6830_s13, 8192  ;;  %p6832_p3 = scmp.lt.s32.totalorder %s7339_s21, %s6830_s13 }
  0xa1   : > { %p6827_p6 = pnand %p6825_p2, %p7257_p9  ;;  %p6833_p4 = scmp.lt.s32.totalorder %s6831_s14, %s6824_s23 }
  0xa3   : > { %p6828_p7 = pneg %p6827_p6  ;;  %p6834_p13 = por %p6833_p4, %p6832_p3 }
  0xa5   : > { %p6835_p5 = pnand %p6834_p13, %p6828_p7 }
  0xa7   : > { %6838 = shalt.err (!%p6835_p5)
}
  0xa8   : > { %6042 = dma.hbm_to_vmem [thread:$0]  (!%p8497_p8), %s7334_s8, 4096, %s7339_s21, %s610_s0, %s7002_s27, %s7002_s27, %s7003_s19  }
  0xa9   : > { %s6839_s4 = scalar_lea.hbm %s7250_s26, 2048  ;;  %s6844_s2 = scalar_lea.hbm %s8496_s24, 4096 }
  0xaa   : > { %p6840_p11 = scmp.ne.s32.totalorder %s7250_s26, %s6839_s4  ;;  %p6845_p1 = scmp.lt.u32.totalorder %s7250_s26, %s8496_s24 }
  0xab   : > { %p6846_p12 = scmp.lt.u32.totalorder %s6844_s2, %s6839_s4  ;;  %p6848_p6 = scmp.lt.u32.totalorder %s6839_s4, %s7250_s26 }
  0xac   : > { %p6842_p10 = pnand %p6840_p11, %p7257_p9 }
  0xad   : > { %p6847_p2 = por %p6846_p12, %p6845_p1 }
  0xae   : > { %p6843_p0 = pneg %p6842_p10 }
  0xaf   : > { %p6849_p7 = por %p6848_p6, %p6847_p2 }
  0xb1   : > { %p6850_p3 = pnand %p6849_p7, %p6843_p0 }
  0xb3   : > { %6853 = shalt.err (!%p6850_p3)
}
  0xb4   : > { %s6854_s21 = scalar_lea.vmem %s7288_s15, 2048  ;;  %s7005_s0 = smov [#allocation14]  }
  0xb5   : > { %p6855_p4 = scmp.ne.s32.totalorder %s7288_s15, %s6854_s21  ;;  %s6859_s8 = sshll.u32 %s7005_s0, 4  ;;  %s6860_s8 = int_to_ptr.vmem [resolvable:$false] %s6859_s8 }
  0xb6   : > { %s6861_s13 = scalar_lea.vmem %s6860_s8, 4096  ;;  %p6862_p11 = scmp.lt.s32.totalorder %s7288_s15, %s6860_s8 }
  0xb7   : > { %p6857_p13 = pnand %p6855_p4, %p7257_p9  ;;  %p6863_p10 = scmp.lt.s32.totalorder %s6861_s13, %s6854_s21 }
  0xb9   : > { %p6858_p5 = pneg %p6857_p13  ;;  %p6864_p1 = por %p6863_p10, %p6862_p11 }
  0xbb   : > { %p6865_p12 = pnand %p6864_p1, %p6858_p5 }
  0xbd   : > { %6868 = shalt.err (!%p6865_p12)
}
  0xbe   : > { %s8505_s14 = scalar_lea.sflag [#allocation13], %s7209_s30  ;;  %s8506_s10 = sld [smem:[#allocation53_spill]] }
  0xbf   : > { %6048 = dma.hbm_to_vmem [thread:$0]  (!%p8497_p8), %s7250_s26, 2048, %s7288_s15, %s8505_s14, %s8500_s7, %s8500_s7, %s8499_s18  }
  0xc0   : > { %s705_s2 = scalar_lea.vmem [#allocation17], %s6010_s20 }
  0xc1   : > { %s712_s23 = sshll.u32 %s705_s2, 4  ;;  %s7404_s23 = int_to_ptr.vmem [resolvable:$true] %s712_s23 }
  0xc4   : > { %s7400_s16 = scalar_lea.hbm %s8506_s10, %s6011_s9  ;;  %s6874_s7 = scalar_lea.hbm %s8506_s10, 24576 }
  0xc5   : > { %s6869_s25 = scalar_lea.hbm %s7400_s16, 12288  ;;  %p6875_p7 = scmp.lt.u32.totalorder %s7400_s16, %s8506_s10 }
  0xc6   : > { %p6870_p0 = scmp.ne.s32.totalorder %s7400_s16, %s6869_s25  ;;  %p6876_p3 = scmp.lt.u32.totalorder %s6874_s7, %s6869_s25 }
  0xc7   : > { %p6878_p13 = scmp.lt.u32.totalorder %s6869_s25, %s7400_s16 }
  0xc8   : > { %p6872_p2 = pnand %p6870_p0, %p7257_p9  ;;  %p6877_p4 = por %p6876_p3, %p6875_p7 }
  0xca   : > { %p6873_p6 = pneg %p6872_p2  ;;  %p6879_p5 = por %p6878_p13, %p6877_p4 }
  0xcc   : > { %p6880_p11 = pnand %p6879_p5, %p6873_p6 }
  0xce   : > { %6883 = shalt.err (!%p6880_p11)
}
  0xcf   : > { %s6884_s0 = scalar_lea.vmem %s7404_s23, 12288  ;;  %s7006_s8 = smov [#allocation17]  }
  0xd0   : > { %p6885_p10 = scmp.ne.s32.totalorder %s7404_s23, %s6884_s0  ;;  %s6889_s13 = sshll.u32 %s7006_s8, 4  ;;  %s6890_s13 = int_to_ptr.vmem [resolvable:$false] %s6889_s13 }
  0xd1   : > { %s6891_s14 = scalar_lea.vmem %s6890_s13, 24576  ;;  %p6892_p0 = scmp.lt.s32.totalorder %s7404_s23, %s6890_s13 }
  0xd2   : > { %p6887_p1 = pnand %p6885_p10, %p7257_p9  ;;  %p6893_p2 = scmp.lt.s32.totalorder %s6891_s14, %s6884_s0 }
  0xd4   : > { %p6888_p12 = pneg %p6887_p1  ;;  %p6894_p7 = por %p6893_p2, %p6892_p0 }
  0xd6   : > { %p6895_p3 = pnand %p6894_p7, %p6888_p12 }
  0xd8   : > { %6898 = shalt.err (!%p6895_p3)
}
  0xd9   : > { %6054 = dma.hbm_to_vmem [thread:$0]  (!%p8497_p8), %s7400_s16, 12288, %s7404_s23, %s673_s17, %s7002_s27, %s7002_s27, %s7003_s19  }
  0xda   : > { %s7437_s2 = scalar_lea.hbm %s8415_s11, %s6011_s9  ;;  %s726_s25 = scalar_lea.vmem [#allocation18], %s6010_s20 }
  0xdb   : > { %s733_s26 = sshll.u32 %s726_s25, 4  ;;  %s723_s18 = scalar_lea.sflag [#allocation19], %s7209_s30  ;;  %s7441_s26 = int_to_ptr.vmem [resolvable:$true] %s733_s26 }
  0xdc   : > { %s6899_s7 = scalar_lea.hbm %s7437_s2, 12288  ;;  %s6904_s9 = scalar_lea.hbm %s8415_s11, 24576 }
  0xdd   : > { %p6900_p6 = scmp.ne.s32.totalorder %s7437_s2, %s6899_s7  ;;  %p6905_p5 = scmp.lt.u32.totalorder %s7437_s2, %s8415_s11 }
  0xde   : > { %p6906_p11 = scmp.lt.u32.totalorder %s6904_s9, %s6899_s7  ;;  %p6908_p1 = scmp.lt.u32.totalorder %s6899_s7, %s7437_s2 }
  0xdf   : > { %p6902_p4 = pnand %p6900_p6, %p7257_p9 }
  0xe0   : > { %p6907_p10 = por %p6906_p11, %p6905_p5 }
  0xe1   : > { %p6903_p13 = pneg %p6902_p4 }
  0xe2   : > { %p6909_p12 = por %p6908_p1, %p6907_p10 }
  0xe4   : > { %p6910_p0 = pnand %p6909_p12, %p6903_p13 }
  0xe6   : > { %6913 = shalt.err (!%p6910_p0)
}
  0xe7   : > { %s6914_s20 = scalar_lea.vmem %s7441_s26, 12288  ;;  %s7007_s19 = smov [#allocation18]  }
  0xe8   : > { %p6915_p2 = scmp.ne.s32.totalorder %s7441_s26, %s6914_s20  ;;  %s6919_s16 = sshll.u32 %s7007_s19, 4  ;;  %s6920_s16 = int_to_ptr.vmem [resolvable:$false] %s6919_s16 }
  0xe9   : > { %s6921_s23 = scalar_lea.vmem %s6920_s16, 24576  ;;  %p6922_p6 = scmp.lt.s32.totalorder %s7441_s26, %s6920_s16 }
  0xea   : > { %p6917_p7 = pnand %p6915_p2, %p7257_p9  ;;  %p6923_p4 = scmp.lt.s32.totalorder %s6921_s23, %s6914_s20 }
  0xec   : > { %p6918_p3 = pneg %p6917_p7  ;;  %p6924_p5 = por %p6923_p4, %p6922_p6 }
  0xee   : > { %p6925_p11 = pnand %p6924_p5, %p6918_p3 }
  0xf0   : > { %6928 = shalt.err (!%p6925_p11)
}
  0xf1   : > { %s7008_s15 = smov 384   ;;  %s7009_s21 = smov 24  }
  0xf2   : > { %6057 = dma.hbm_to_vmem [thread:$0]  (!%p8497_p8), %s7437_s2, 12288, %s7441_s26, %s723_s18, %s7008_s15, %s7008_s15, %s7009_s21  }
  0xf3   : > { %p8507_p9 = scmp.ne.s32.totalorder %s8491_s1, 0 }
  0xf4   : > { %s8508_s5 = sld [smem:[#allocation42_spill]] (!%p8507_p9)  ;;  %s747_s0 = sand.u32 (!%p8507_p9), 1, %s6987_s6  }
  0xf5   : > { %745 = sbr.rel (%p8507_p9) target bundleno = 3060 (0xbf4), region = 100  ;;  %s5390_s8 = sshll.u32 (!%p8507_p9), %s747_s0, 8 }
  0xf6   : > { %s748_s13 = scalar_lea.sflag (!%p8507_p9), [#allocation11], %s747_s0  ;;  %s7470_s14 = scalar_lea.vmem (!%p8507_p9), [#allocation10], %s5390_s8 }
  0xfa   : > { %p8509_p13 = scmp.ne.s32.totalorder (!%p8507_p9), %s8508_s5, 0 }
  0xfc   : > { %6946 = dma.done.wait (%p8509_p13), %s748_s13, 4096  }
  0xfd   : > { %6948 = vsyncadd (%p8509_p13), %s748_s13, 4294963200  ;;  %s8510_s4 = sld [smem:[#allocation39_spill]]  ;;  %s5391_s30 = sshll.u32 %s747_s0, 7 }
  0xfe   : > { %s7477_s2 = scalar_lea.vmem [#allocation12], %s5391_s30 }
 0x103   : > { %s756_s3 = sand.u32 1, %s8510_s4  }
 0x104   : > { %s757_s22 = scalar_lea.sflag [#allocation13], %s756_s3 }
 0x105   : > { %6950 = dma.done.wait (%p8509_p13), %s757_s22, 4096  }
 0x106   : > { %6952 = vsyncadd (%p8509_p13), %s757_s22, 4294963200  ;;  %s7483_s1 = scalar_lea.vmem [#allocation14], %s5391_s30  ;;  %s775_s25 = scalar_lea.sflag [#allocation16], %s756_s3 }
 0x107   : > { %s7485_s26 = scalar_lea.vmem [#allocation15], %s5390_s8 }
 0x108   : > { %6954 = dma.done.wait (%p8509_p13), %s775_s25, 16384  }
 0x109   : > { %6956 = vsyncadd (%p8509_p13), %s775_s25, 4294950912  ;;  %s6014_s18 = smul.u32 768, %s747_s0  ;;  %s793_s29 = scalar_lea.sflag [#allocation19], %s756_s3 }
 0x10b   : > { %s7491_s7 = scalar_lea.vmem [#allocation17], %s6014_s18  ;;  %s7493_s17 = scalar_lea.vmem [#allocation18], %s6014_s18 }
 0x10c   : > { %6958 = dma.done.wait (%p8509_p13), %s793_s29, 12288  }
 0x10d   : > { %6960 = vsyncadd (%p8509_p13), %s793_s29, 4294955008  ;;  %p8511_p8 = scmp.eq.s32.totalorder %s8510_s4, 0 }
 0x10f   : > { %6962 = dma.done.wait (%p8511_p8), [#allocation19], 2048   ;;  %p8512_p10 = pmov %p8511_p8 }
 0x110   : > { %p890_p1 = scmp.lt.s32.totalorder %s8510_s4, 1  ;;  %s7504_s9 = sld [smem:[#allocation9]] }
 0x111   : > { %6964 = vsyncadd (%p8512_p10), [#allocation19], 4294965248  ;;  %s906_s27 = ssub.s32 0, %s8510_s4  ;;  %p905_p12 = scmp.lt.s32.totalorder %s8510_s4, 0 }
 0x112   : > { %s891_s28 = scalar_select %p890_p1, %s8510_s4, 1 }
 0x113   : > { %s5398_s20 = smin.u32 %s8510_s4, %s906_s27  ;;  %s8513_s21 = sld [smem:[#allocation46_spill]] }
 0x114   : > { %s5395_s19 = sshll.u32 %s891_s28, 1  ;;  %s6015_s16 = smul.u32 768, %s891_s28 }
 0x115   : > { %s8514_s13 = sld [smem:[#allocation47_spill]]  ;;  %s8515_s25 = sld [smem:[#allocation52_spill]] }
 0x116   : > { %s908_s29 = sand.u32 1, %s5398_s20   ;;  %p8516_p2 = scmp.ne.s32.totalorder %s8510_s4, 0 }
 0x117   : > { %s909_s10 = ssub.s32 0, %s908_s29  ;;  %s8517_s15 = sld [smem:[#allocation62_spill]] (!%p8516_p2) }
 0x118   : > { %s8542_s10 = smov (!%p905_p12, %s909_s10), %s908_s29  ;;  %921 = sbr.rel (%p8516_p2) target bundleno = 317 (0x13d), region = 132 }
 0x119   : > { %s7513_s5 = scalar_lea.vmem %s8513_s21, %s5395_s19  ;;  %p5400_p0 = scmp.lt.s32.totalorder %s8542_s10, 0 }
 0x11a   : > { %s915_s27 = sadd.s32 2, %s8542_s10 }
 0x11b   : > { %s7518_s3 = scalar_lea.vmem %s8514_s13, %s5395_s19  ;;  %s7523_s18 = scalar_lea.vmem %s8515_s25, %s6015_s16 }
 0x11c   : > { %s8544_s27 = smov (!%p5400_p0, %s915_s27), %s8542_s10 }
 0x11d   : > { %s917_s28 = ssub.s32 1, %s8544_s27  ;;  %v954_v0 = vld [vmem:[%s8517_s15] sm:$0xff] (!%p8516_p2)  ;;  %v956_v1 = vld [vmem:[%s8517_s15 + $0x8] sm:$0xff] (!%p8516_p2)  ;;  %v958_v2 = vld [vmem:[%s8517_s15 + $0x10] sm:$0xff] (!%p8516_p2) }
 0x11e   : > { %955 = vst [vmem:[#allocation3] sm:$0xff] (!%p8516_p2), %v954_v0  ;;  %957 = vst [vmem:[#allocation3 + $0x8] sm:$0xff] (!%p8516_p2), %v956_v1  ;;  %v960_v3 = vld [vmem:[%s8517_s15 + $0x18] sm:$0xff] (!%p8516_p2)  ;;  %v962_v4 = vld [vmem:[%s8517_s15 + $0x20] sm:$0xff] (!%p8516_p2) }
 0x11f   : > { %959 = vst [vmem:[#allocation3 + $0x10] sm:$0xff] %v958_v2  ;;  %v964_v5 = vld [vmem:[%s8517_s15 + $0x28] sm:$0xff]  ;;  %961 = vst [vmem:[#allocation3 + $0x18] sm:$0xff] %v960_v3  ;;  %v966_v6 = vld [vmem:[%s8517_s15 + $0x30] sm:$0xff] }
 0x120   : > { %963 = vst [vmem:[#allocation3 + $0x20] sm:$0xff] %v962_v4  ;;  %965 = vst [vmem:[#allocation3 + $0x28] sm:$0xff] %v964_v5  ;;  %v968_v7 = vld [vmem:[%s8517_s15 + $0x38] sm:$0xff]  ;;  %v970_v8 = vld [vmem:[%s8517_s15 + $0x40] sm:$0xff] }
 0x121   : > { %967 = vst [vmem:[#allocation3 + $0x30] sm:$0xff] %v966_v6  ;;  %969 = vst [vmem:[#allocation3 + $0x38] sm:$0xff] %v968_v7  ;;  %v972_v9 = vld [vmem:[%s8517_s15 + $0x48] sm:$0xff]  ;;  %v974_v10 = vld [vmem:[%s8517_s15 + $0x50] sm:$0xff] }
 0x122   : > { %971 = vst [vmem:[#allocation3 + $0x40] sm:$0xff] %v970_v8  ;;  %v976_v11 = vld [vmem:[%s8517_s15 + $0x58] sm:$0xff]  ;;  %973 = vst [vmem:[#allocation3 + $0x48] sm:$0xff] %v972_v9  ;;  %v978_v12 = vld [vmem:[%s8517_s15 + $0x60] sm:$0xff] }
 0x123   : > { %975 = vst [vmem:[#allocation3 + $0x50] sm:$0xff] %v974_v10  ;;  %977 = vst [vmem:[#allocation3 + $0x58] sm:$0xff] %v976_v11  ;;  %v980_v13 = vld [vmem:[%s8517_s15 + $0x68] sm:$0xff]  ;;  %v982_v14 = vld [vmem:[%s8517_s15 + $0x70] sm:$0xff] }
 0x124   : > { %979 = vst [vmem:[#allocation3 + $0x60] sm:$0xff] %v978_v12  ;;  %981 = vst [vmem:[#allocation3 + $0x68] sm:$0xff] %v980_v13  ;;  %v984_v15 = vld [vmem:[%s8517_s15 + $0x78] sm:$0xff] }
 0x125   : > { %983 = vst [vmem:[#allocation3 + $0x70] sm:$0xff] %v982_v14  ;;  %985 = vst [vmem:[#allocation3 + $0x78] sm:$0xff] %v984_v15 }
 0x126   : > { %993 = vsyncadd [#allocation7], 2048  ;;  %s8518_s10 = sld [smem:[#allocation63_spill]] }
 0x12c   : > { %v1027_v16 = vld [vmem:[%s8518_s10] sm:$0xff]  ;;  %v1029_v17 = vld [vmem:[%s8518_s10 + $0x8] sm:$0xff]  ;;  %v1031_v18 = vld [vmem:[%s8518_s10 + $0x10] sm:$0xff] }
 0x12d   : > { %1028 = vst [vmem:[#allocation4] sm:$0xff] %v1027_v16  ;;  %1030 = vst [vmem:[#allocation4 + $0x8] sm:$0xff] %v1029_v17  ;;  %v1033_v19 = vld [vmem:[%s8518_s10 + $0x18] sm:$0xff]  ;;  %v1035_v20 = vld [vmem:[%s8518_s10 + $0x20] sm:$0xff] }
 0x12e   : > { %1032 = vst [vmem:[#allocation4 + $0x10] sm:$0xff] %v1031_v18  ;;  %1034 = vst [vmem:[#allocation4 + $0x18] sm:$0xff] %v1033_v19  ;;  %v1037_v21 = vld [vmem:[%s8518_s10 + $0x28] sm:$0xff]  ;;  %v1039_v22 = vld [vmem:[%s8518_s10 + $0x30] sm:$0xff] }
 0x12f   : > { %1036 = vst [vmem:[#allocation4 + $0x20] sm:$0xff] %v1035_v20  ;;  %v1041_v23 = vld [vmem:[%s8518_s10 + $0x38] sm:$0xff]  ;;  %1038 = vst [vmem:[#allocation4 + $0x28] sm:$0xff] %v1037_v21  ;;  %v1043_v24 = vld [vmem:[%s8518_s10 + $0x40] sm:$0xff] }
 0x130   : > { %1040 = vst [vmem:[#allocation4 + $0x30] sm:$0xff] %v1039_v22  ;;  %1042 = vst [vmem:[#allocation4 + $0x38] sm:$0xff] %v1041_v23  ;;  %v1045_v25 = vld [vmem:[%s8518_s10 + $0x48] sm:$0xff]  ;;  %v1047_v26 = vld [vmem:[%s8518_s10 + $0x50] sm:$0xff] }
 0x131   : > { %1044 = vst [vmem:[#allocation4 + $0x40] sm:$0xff] %v1043_v24  ;;  %1046 = vst [vmem:[#allocation4 + $0x48] sm:$0xff] %v1045_v25  ;;  %v1049_v27 = vld [vmem:[%s8518_s10 + $0x58] sm:$0xff]  ;;  %v1051_v28 = vld [vmem:[%s8518_s10 + $0x60] sm:$0xff] }
 0x132   : > { %1048 = vst [vmem:[#allocation4 + $0x50] sm:$0xff] %v1047_v26  ;;  %v1053_v29 = vld [vmem:[%s8518_s10 + $0x68] sm:$0xff]  ;;  %1050 = vst [vmem:[#allocation4 + $0x58] sm:$0xff] %v1049_v27  ;;  %v1055_v30 = vld [vmem:[%s8518_s10 + $0x70] sm:$0xff] }
 0x133   : > { %1052 = vst [vmem:[#allocation4 + $0x60] sm:$0xff] %v1051_v28  ;;  %1054 = vst [vmem:[#allocation4 + $0x68] sm:$0xff] %v1053_v29  ;;  %v1057_v31 = vld [vmem:[%s8518_s10 + $0x78] sm:$0xff] }
 0x134   : > { %1056 = vst [vmem:[#allocation4 + $0x70] sm:$0xff] %v1055_v30  ;;  %1058 = vst [vmem:[#allocation4 + $0x78] sm:$0xff] %v1057_v31 }
 0x135   : > { %1066 = vsyncadd [#allocation7 + $0x1], 2048  ;;  %s8519_s22 = sld [smem:[#allocation44_spill]] }
 0x13b   : > { %v1067_v32 = vld [vmem:[%s8519_s22] sm:$0xff]  ;;  %v1068_v33 = vld [vmem:[%s8519_s22 + $0x8] sm:$0xff] }
 0x13c   : > { %1069 = vst [vmem:[#allocation2] sm:$0xff] %v1067_v32  ;;  %1070 = vst [vmem:[#allocation2 + $0x8] sm:$0xff] %v1068_v33 }
 0x13d PF: > { %s8520_s29 = sld [smem:[#allocation39_spill]] }
 0x143   : > { %s1071_s23 = sadd.s32 1, %s8520_s29 }
 0x144   : > { %p5402_p7 = scmp.ge.s32.totalorder %s1071_s23, 2 }
 0x145   : > { %s8521_s19 = sld [smem:[#allocation39_spill]] (!%p5402_p7)  ;;  %s7636_s21 = sshll.u32 (!%p5402_p7), %s917_s28, 7 }
 0x146   : > { %1075 = sbr.rel (%p5402_p7) target bundleno = 359 (0x167), region = 204  ;;  %s8522_s16 = sld [smem:[#allocation62_spill]] (!%p5402_p7) }
 0x147   : > { %s7647_s4 = sshll.u32 (!%p5402_p7), %s917_s28, 1  ;;  %s1079_s13 = scalar_lea.vmem (!%p5402_p7), [#allocation3], %s7636_s21 }
 0x148   : > { %s1081_s28 = scalar_lea.sflag (!%p5402_p7), [#allocation7], %s7647_s4 }
 0x14b   : > { %s5403_s10 = sshll.u32 (!%p5402_p7), %s8521_s19, 7 }
 0x14c   : > { %s7643_s8 = scalar_lea.vmem (!%p5402_p7), %s8522_s16, %s5403_s10 }
 0x14d   : > { %v5406_v34 = vld [vmem:[%s7643_s8 + $0x80] sm:$0xff]  ;;  %v5407_v35 = vld [vmem:[%s7643_s8 + $0x88] sm:$0xff]  ;;  %v5408_v36 = vld [vmem:[%s7643_s8 + $0x90] sm:$0xff] }
 0x14e   : > { %1115 = vst [vmem:[%s1079_s13] sm:$0xff] %v5406_v34  ;;  %1117 = vst [vmem:[%s1079_s13 + $0x8] sm:$0xff] %v5407_v35  ;;  %v5409_v37 = vld [vmem:[%s7643_s8 + $0x98] sm:$0xff]  ;;  %v5410_v38 = vld [vmem:[%s7643_s8 + $0xa0] sm:$0xff] }
 0x14f   : > { %1119 = vst [vmem:[%s1079_s13 + $0x10] sm:$0xff] %v5408_v36  ;;  %v5411_v39 = vld [vmem:[%s7643_s8 + $0xa8] sm:$0xff]  ;;  %1121 = vst [vmem:[%s1079_s13 + $0x18] sm:$0xff] %v5409_v37  ;;  %v5412_v40 = vld [vmem:[%s7643_s8 + $0xb0] sm:$0xff] }
 0x150   : > { %1123 = vst [vmem:[%s1079_s13 + $0x20] sm:$0xff] %v5410_v38  ;;  %1125 = vst [vmem:[%s1079_s13 + $0x28] sm:$0xff] %v5411_v39  ;;  %v5413_v41 = vld [vmem:[%s7643_s8 + $0xb8] sm:$0xff]  ;;  %v5414_v42 = vld [vmem:[%s7643_s8 + $0xc0] sm:$0xff] }
 0x151   : > { %1127 = vst [vmem:[%s1079_s13 + $0x30] sm:$0xff] %v5412_v40  ;;  %1129 = vst [vmem:[%s1079_s13 + $0x38] sm:$0xff] %v5413_v41  ;;  %v5415_v43 = vld [vmem:[%s7643_s8 + $0xc8] sm:$0xff]  ;;  %v5416_v44 = vld [vmem:[%s7643_s8 + $0xd0] sm:$0xff] }
 0x152   : > { %1131 = vst [vmem:[%s1079_s13 + $0x40] sm:$0xff] %v5414_v42  ;;  %v5417_v45 = vld [vmem:[%s7643_s8 + $0xd8] sm:$0xff]  ;;  %1133 = vst [vmem:[%s1079_s13 + $0x48] sm:$0xff] %v5415_v43  ;;  %v5418_v46 = vld [vmem:[%s7643_s8 + $0xe0] sm:$0xff] }
 0x153   : > { %1135 = vst [vmem:[%s1079_s13 + $0x50] sm:$0xff] %v5416_v44  ;;  %1137 = vst [vmem:[%s1079_s13 + $0x58] sm:$0xff] %v5417_v45  ;;  %v5419_v47 = vld [vmem:[%s7643_s8 + $0xe8] sm:$0xff]  ;;  %v5420_v48 = vld [vmem:[%s7643_s8 + $0xf0] sm:$0xff] }
 0x154   : > { %1139 = vst [vmem:[%s1079_s13 + $0x60] sm:$0xff] %v5418_v46  ;;  %1141 = vst [vmem:[%s1079_s13 + $0x68] sm:$0xff] %v5419_v47  ;;  %v5421_v49 = vld [vmem:[%s7643_s8 + $0xf8] sm:$0xff] }
 0x155   : > { %1143 = vst [vmem:[%s1079_s13 + $0x70] sm:$0xff] %v5420_v48  ;;  %1145 = vst [vmem:[%s1079_s13 + $0x78] sm:$0xff] %v5421_v49 }
 0x156   : > { %1153 = vsyncadd %s1081_s28, 2048  ;;  %s8523_s15 = sld [smem:[#allocation63_spill]]  ;;  %s7674_s23 = scalar_lea.sflag %s1081_s28, 1 [#allocation7] }
 0x157   : > { %s1155_s19 = scalar_lea.vmem [#allocation4], %s7636_s21 }
 0x15c   : > { %s7672_s29 = scalar_lea.vmem %s8523_s15, %s5403_s10 }
 0x15d   : > { %v5425_v50 = vld [vmem:[%s7672_s29 + $0x80] sm:$0xff]  ;;  %v5426_v51 = vld [vmem:[%s7672_s29 + $0x88] sm:$0xff]  ;;  %v5427_v52 = vld [vmem:[%s7672_s29 + $0x90] sm:$0xff] }
 0x15e   : > { %1191 = vst [vmem:[%s1155_s19] sm:$0xff] %v5425_v50  ;;  %1193 = vst [vmem:[%s1155_s19 + $0x8] sm:$0xff] %v5426_v51  ;;  %v5428_v53 = vld [vmem:[%s7672_s29 + $0x98] sm:$0xff]  ;;  %v5429_v54 = vld [vmem:[%s7672_s29 + $0xa0] sm:$0xff] }
 0x15f   : > { %1195 = vst [vmem:[%s1155_s19 + $0x10] sm:$0xff] %v5427_v52  ;;  %v5430_v55 = vld [vmem:[%s7672_s29 + $0xa8] sm:$0xff]  ;;  %1197 = vst [vmem:[%s1155_s19 + $0x18] sm:$0xff] %v5428_v53  ;;  %v5431_v56 = vld [vmem:[%s7672_s29 + $0xb0] sm:$0xff] }
 0x160   : > { %1199 = vst [vmem:[%s1155_s19 + $0x20] sm:$0xff] %v5429_v54  ;;  %1201 = vst [vmem:[%s1155_s19 + $0x28] sm:$0xff] %v5430_v55  ;;  %v5432_v57 = vld [vmem:[%s7672_s29 + $0xb8] sm:$0xff]  ;;  %v5433_v58 = vld [vmem:[%s7672_s29 + $0xc0] sm:$0xff] }
 0x161   : > { %1203 = vst [vmem:[%s1155_s19 + $0x30] sm:$0xff] %v5431_v56  ;;  %1205 = vst [vmem:[%s1155_s19 + $0x38] sm:$0xff] %v5432_v57  ;;  %v5434_v59 = vld [vmem:[%s7672_s29 + $0xc8] sm:$0xff]  ;;  %v5435_v60 = vld [vmem:[%s7672_s29 + $0xd0] sm:$0xff] }
 0x162   : > { %1207 = vst [vmem:[%s1155_s19 + $0x40] sm:$0xff] %v5433_v58  ;;  %v5436_v61 = vld [vmem:[%s7672_s29 + $0xd8] sm:$0xff]  ;;  %1209 = vst [vmem:[%s1155_s19 + $0x48] sm:$0xff] %v5434_v59  ;;  %v5437_v62 = vld [vmem:[%s7672_s29 + $0xe0] sm:$0xff] }
 0x163   : > { %1211 = vst [vmem:[%s1155_s19 + $0x50] sm:$0xff] %v5435_v60  ;;  %1213 = vst [vmem:[%s1155_s19 + $0x58] sm:$0xff] %v5436_v61  ;;  %v5438_v63 = vld [vmem:[%s7672_s29 + $0xe8] sm:$0xff]  ;;  %v5439_v0 = vld [vmem:[%s7672_s29 + $0xf0] sm:$0xff] }
 0x164   : > { %1215 = vst [vmem:[%s1155_s19 + $0x60] sm:$0xff] %v5437_v62  ;;  %1217 = vst [vmem:[%s1155_s19 + $0x68] sm:$0xff] %v5438_v63  ;;  %v5440_v1 = vld [vmem:[%s7672_s29 + $0xf8] sm:$0xff] }
 0x165   : > { %1219 = vst [vmem:[%s1155_s19 + $0x70] sm:$0xff] %v5439_v0  ;;  %1221 = vst [vmem:[%s1155_s19 + $0x78] sm:$0xff] %v5440_v1 }
 0x166   : > { %1229 = vsyncadd %s7674_s23, 2048 }
 0x167 PF: > { %v7694_v2 = vld [vmem:[#allocation2] sm:$0xff]  ;;  %v7696_v3 = vld [vmem:[#allocation2 + $0x8] sm:$0xff]  ;;  %v6109_v7 = vld [vmem:[%s7470_s14] ss:$8 sps:$4 sm:$0xff]   ;;  %v1245_v58 = vlaneseq  ;;  %s8525_s21 = sld [smem:[#allocation58_spill]]  ;;  %s8526_s16 = sld [smem:[#allocation55_spill]] }
 0x168   : > { %v1232_v4 = vmul.f32 %v7694_v2, %v7694_v2  ;;  %v1233_v5 = vmul.f32 %v7696_v3, %v7696_v3  ;;  %v6107_v6 = vld [vmem:[%s7470_s14 + $0x4] ss:$8 sps:$4 sm:$0xff]   ;;  %v6110_v8 = vld [vmem:[%s7470_s14 + $0x14] ss:$8 sps:$4 sm:$0xff]   ;;  %v6112_v10 = vld [vmem:[%s7470_s14 + $0x10] ss:$8 sps:$4 sm:$0xff]  }
 0x169   : > { %1451 = vmatprep.subr.bf16.mxu0 %v6107_v6  ;;  %v6113_v11 = vld [vmem:[%s7470_s14 + $0x24] ss:$8 sps:$4 sm:$0xff]   ;;  %v6115_v12 = vld [vmem:[%s7470_s14 + $0x20] ss:$8 sps:$4 sm:$0xff]   ;;  %v6116_v13 = vld [vmem:[%s7470_s14 + $0x34] ss:$8 sps:$4 sm:$0xff]  }
 0x16a   : > { %v1234_v9 = vadd.f32 %v1233_v5, %v1232_v4  ;;  %1452 = vmatpush1.bf16.msra.mxu0 %v6109_v7  ;;  %v6118_v14 = vld [vmem:[%s7470_s14 + $0x30] ss:$8 sps:$4 sm:$0xff]   ;;  %v6131_v15 = vld [vmem:[%s7477_s2 + $0x40] sm:$0xff]   ;;  %v6136_v18 = vld [vmem:[%s7477_s2 + $0x48] sm:$0xff]   ;;  %v7752_v60 = vshrl.u32 %v1245_v58, 7  ;;  %s8527_s13 = sld [smem:[#allocation57_spill]] }
 0x16b   : > { %1453 = vmatprep.subr.bf16.mxu0 %v6110_v8  ;;  %v6119_v16 = vld [vmem:[%s7470_s14 + $0x44] ss:$8 sps:$4 sm:$0xff]   ;;  %5886 = vmatprep.subr.bf16.mxu1 %v6131_v15  ;;  %v6121_v19 = vld [vmem:[%s7470_s14 + $0x40] ss:$8 sps:$4 sm:$0xff]   ;;  %v6122_v20 = vld [vmem:[%s7470_s14 + $0x54] ss:$8 sps:$4 sm:$0xff]  }
 0x16c   : > { %1235 = vadd.xlane.f32.xlu0 %v1234_v9  ;;  %v6134_v17 = vld [vmem:[%s7477_s2] sm:$0xff]   ;;  %v6139_v21 = vld [vmem:[%s7477_s2 + $0x8] sm:$0xff]   ;;  %v6141_v22 = vld [vmem:[%s7477_s2 + $0x50] sm:$0xff]   ;;  %v7755_v61 = vsub.s32 1, %v7752_v60  ;;  %v7758_v62 = vsub.s32 0, %v7752_v60  ;;  %s8528_s25 = sld [smem:[#allocation54_spill]] }
 0x16d   : > { %5887 = vmatpush3.bf16.msra.mxu1 %v6134_v17  ;;  %v6124_v23 = vld [vmem:[%s7470_s14 + $0x50] ss:$8 sps:$4 sm:$0xff]   ;;  %v6125_v25 = vld [vmem:[%s7470_s14 + $0x64] ss:$8 sps:$4 sm:$0xff]   ;;  %v6127_v27 = vld [vmem:[%s7470_s14 + $0x60] ss:$8 sps:$4 sm:$0xff]  }
 0x16e   : > { %1454 = vmatpush1.bf16.msra.mxu0 %v6112_v10  ;;  %5888 = vmatprep.subr.bf16.mxu1 %v6136_v18  ;;  %v6144_v24 = vld [vmem:[%s7477_s2 + $0x10] sm:$0xff]   ;;  %v6146_v26 = vld [vmem:[%s7477_s2 + $0x58] sm:$0xff]   ;;  %v6151_v30 = vld [vmem:[%s7477_s2 + $0x60] sm:$0xff]   ;;  %s8529_s23 = sld [smem:[#allocation59_spill]] }
 0x16f   : > { %1455 = vmatprep.subr.bf16.mxu0 %v6113_v11  ;;  %v6128_v28 = vld [vmem:[%s7470_s14 + $0x74] ss:$8 sps:$4 sm:$0xff]   ;;  %v6130_v31 = vld [vmem:[%s7470_s14 + $0x70] ss:$8 sps:$4 sm:$0xff]   ;;  %v6132_v32 = vld [vmem:[%s7470_s14 + $0x84] ss:$8 sps:$4 sm:$0xff]  }
 0x170   : > { %v6149_v29 = vld [vmem:[%s7477_s2 + $0x18] sm:$0xff]   ;;  %v6154_v33 = vld [vmem:[%s7477_s2 + $0x20] sm:$0xff]   ;;  %v6156_v34 = vld [vmem:[%s7477_s2 + $0x68] sm:$0xff]  }
 0x171   : > { %5889 = vmatpush3.bf16.msra.mxu1 %v6139_v21  ;;  %v6135_v35 = vld [vmem:[%s7470_s14 + $0x80] ss:$8 sps:$4 sm:$0xff]   ;;  %v6137_v36 = vld [vmem:[%s7470_s14 + $0x94] ss:$8 sps:$4 sm:$0xff]   ;;  %v6140_v39 = vld [vmem:[%s7470_s14 + $0x90] ss:$8 sps:$4 sm:$0xff]  }
 0x172   : > { %1456 = vmatpush1.bf16.msra.mxu0 %v6115_v12  ;;  %5890 = vmatprep.subr.bf16.mxu1 %v6141_v22  ;;  %v6159_v37 = vld [vmem:[%s7477_s2 + $0x28] sm:$0xff]   ;;  %v6161_v38 = vld [vmem:[%s7477_s2 + $0x70] sm:$0xff]   ;;  %v6166_v42 = vld [vmem:[%s7477_s2 + $0x78] sm:$0xff]  }
 0x173   : > { %1457 = vmatprep.subr.bf16.mxu0 %v6116_v13  ;;  %v6164_v40 = vld [vmem:[%s7477_s2 + $0x30] sm:$0xff]   ;;  %v6142_v41 = vld [vmem:[%s7470_s14 + $0xa4] ss:$8 sps:$4 sm:$0xff]   ;;  %v6145_v43 = vld [vmem:[%s7470_s14 + $0xa0] ss:$8 sps:$4 sm:$0xff]  }
 0x174   : > { %v6147_v44 = vld [vmem:[%s7470_s14 + $0xb4] ss:$8 sps:$4 sm:$0xff]   ;;  %v6171_v46 = vld [vmem:[%s7483_s1 + $0x40] sm:$0xff]   ;;  %v6150_v47 = vld [vmem:[%s7470_s14 + $0xb0] ss:$8 sps:$4 sm:$0xff]  }
 0x175   : > { %5891 = vmatpush3.bf16.msra.mxu1 %v6144_v24  ;;  %v6169_v45 = vld [vmem:[%s7477_s2 + $0x38] sm:$0xff]   ;;  %v6152_v48 = vld [vmem:[%s7470_s14 + $0xc4] ss:$8 sps:$4 sm:$0xff]   ;;  %v6155_v49 = vld [vmem:[%s7470_s14 + $0xc0] ss:$8 sps:$4 sm:$0xff]   ;;  %s7010_s2 = smov 1  }
 0x176   : > { %1458 = vmatpush1.bf16.msra.mxu0 %v6118_v14  ;;  %5892 = vmatprep.subr.bf16.mxu1 %v6146_v26  ;;  %v6157_v50 = vld [vmem:[%s7470_s14 + $0xd4] ss:$8 sps:$4 sm:$0xff]   ;;  %v6160_v51 = vld [vmem:[%s7470_s14 + $0xd0] ss:$8 sps:$4 sm:$0xff]   ;;  %v6162_v52 = vld [vmem:[%s7470_s14 + $0xe4] ss:$8 sps:$4 sm:$0xff]  }
 0x177   : > { %1459 = vmatprep.subr.bf16.mxu0 %v6119_v16  ;;  %v6165_v53 = vld [vmem:[%s7470_s14 + $0xe0] ss:$8 sps:$4 sm:$0xff]   ;;  %v6167_v54 = vld [vmem:[%s7470_s14 + $0xf4] ss:$8 sps:$4 sm:$0xff]   ;;  %v6170_v55 = vld [vmem:[%s7470_s14 + $0xf0] ss:$8 sps:$4 sm:$0xff]  }
 0x178   : > { %v1243_v63 = vld [vmem:[%s7513_s5] sm:$0x3]  ;;  %v6172_v11 = vld [vmem:[%s7483_s1] sm:$0xff]   ;;  %v6175_v14 = vld [vmem:[%s7483_s1 + $0x50] sm:$0xff]   ;;  %s8524_s14 = sld [smem:[#allocation39_spill]]  ;;  %s7011_s5 = smov 127  }
 0x179   : > { %5893 = vmatpush3.bf16.msra.mxu1 %v6149_v29  ;;  %v1252_v0 = vrot.slane %v1243_v63, %v7755_v61  ;;  %v1248_v1 = vrot.slane %v1243_v63, %v7758_v62  ;;  %v6173_v12 = vld [vmem:[%s7483_s1 + $0x48] sm:$0xff]   ;;  %v6176_v15 = vld [vmem:[%s7483_s1 + $0x10] sm:$0xff]   ;;  %v6177_v16 = vld [vmem:[%s7483_s1 + $0x58] sm:$0xff]  }
 0x17a   : > { %1460 = vmatpush1.bf16.msra.mxu0 %v6121_v19  ;;  %5894 = vmatprep.subr.bf16.mxu1 %v6151_v30  ;;  %v6174_v13 = vld [vmem:[%s7483_s1 + $0x8] sm:$0xff]   ;;  %v6178_v17 = vld [vmem:[%s7483_s1 + $0x18] sm:$0xff]   ;;  %v6179_v18 = vld [vmem:[%s7483_s1 + $0x60] sm:$0xff]  }
 0x17b   : > { %1461 = vmatprep.subr.bf16.mxu0 %v6122_v20  ;;  %v6180_v19 = vld [vmem:[%s7483_s1 + $0x20] sm:$0xff]   ;;  %v6181_v20 = vld [vmem:[%s7483_s1 + $0x68] sm:$0xff]   ;;  %v6183_v22 = vld [vmem:[%s7483_s1 + $0x70] sm:$0xff]  }
 0x17c   : > { %v6182_v21 = vld [vmem:[%s7483_s1 + $0x28] sm:$0xff]   ;;  %v6185_v24 = vld [vmem:[%s7483_s1 + $0x78] sm:$0xff]  }
 0x17d   : > { %5895 = vmatpush3.bf16.msra.mxu1 %v6154_v33 }
 0x17e   : > { %1462 = vmatpush1.bf16.msra.mxu0 %v6124_v23  ;;  %5896 = vmatprep.subr.bf16.mxu1 %v6156_v34  ;;  %v6184_v23 = vld [vmem:[%s7483_s1 + $0x30] sm:$0xff]   ;;  %p6061_p3 = scmp.gt.s32.totalorder %s8524_s14, 0 }
 0x17f   : > { %1463 = vmatprep.subr.bf16.mxu0 %v6125_v25  ;;  %v6186_v25 = vld [vmem:[%s7483_s1 + $0x38] sm:$0xff]  }
 0x181   : > { %5897 = vmatpush3.bf16.msra.mxu1 %v6159_v37 }
 0x182   : > { %1464 = vmatpush1.bf16.msra.mxu0 %v6127_v27  ;;  %5898 = vmatprep.subr.bf16.mxu1 %v6161_v38 }
 0x183   : > { %1465 = vmatprep.subr.bf16.mxu0 %v6128_v28 }
 0x185   : > { %5899 = vmatpush3.bf16.msra.mxu1 %v6164_v40 }
 0x186   : > { %1466 = vmatpush1.bf16.msra.mxu0 %v6130_v31  ;;  %5900 = vmatprep.subr.bf16.mxu1 %v6166_v42  ;;  %v1849_v42 = vand.u32 127, %v1245_v58 }
 0x187   : > { %1467 = vmatprep.subr.bf16.mxu0 %v6132_v32 }
 0x188   : > { %vm1850_vm0 = vcmp.lt.s32.totalorder %v1849_v42, 1  ;;  %vm1872_vm1 = vcmp.lt.s32.totalorder %v1849_v42, 127 }
 0x189   : > { %5901 = vmatpush3.bf16.msra.mxu1 %v6169_v45 }
 0x18a   : > { %1468 = vmatpush1.bf16.msra.mxu0 %v6135_v35  ;;  %5908 = vmatprep.subr.bf16.mxu1 %v6171_v46  ;;  %v1829_v46 = vld [vmem:[%s8526_s16] sm:$0x3] }
 0x18b   : > { %1469 = vmatprep.subr.bf16.mxu0 %v6137_v36 }
 0x18e   : > { %1470 = vmatpush1.bf16.msra.mxu0 %v6140_v39 }
 0x18f   : > { %1471 = vmatprep.subr.bf16.mxu0 %v6142_v41 }
 0x192   : > { %1472 = vmatpush1.bf16.msra.mxu0 %v6145_v43 }
 0x193   : > { %1473 = vmatprep.subr.bf16.mxu0 %v6147_v44  ;;  %v5507_v44 = vld [vmem:[%s8525_s21] ss:$0 sm:$0xff] }
 0x196   : > { %1474 = vmatpush1.bf16.msra.mxu0 %v6150_v47  ;;  %v5506_v47 = vld [vmem:[%s8527_s13] ss:$0 sm:$0xff] }
 0x197   : > { %1475 = vmatprep.subr.bf16.mxu0 %v6152_v48 }
 0x19a   : > { %1476 = vmatpush1.bf16.msra.mxu0 %v6155_v49  ;;  %v1828_v49 = vld [vmem:[%s8528_s25] sm:$0x3] }
 0x19b   : > { %1477 = vmatprep.subr.bf16.mxu0 %v6157_v50  ;;  %v1835_v58 = vrot.slane %v1828_v49, %v7758_v62 }
 0x19e   : > { %1478 = vmatpush1.bf16.msra.mxu0 %v6160_v51  ;;  %v1857_v51 = vrot.slane %v1829_v46, %v7758_v62 }
 0x19f   : > { %1479 = vmatprep.subr.bf16.mxu0 %v6162_v52  ;;  %v1861_v52 = vrot.slane %v1829_v46, %v7755_v61 }
 0x1a2   : > { %1480 = vmatpush1.bf16.msra.mxu0 %v6165_v53  ;;  %v5508_v53 = vld [vmem:[%s8529_s23] ss:$0 sm:$0xff] }
 0x1a3   : > { %1481 = vmatprep.subr.bf16.mxu0 %v6167_v54 }
 0x1a6   : > { %1482 = vmatpush1.bf16.msra.mxu0 %v6170_v55 }
 0x1f9   : > { %v1236_v56 = vpop.xlane.xlu0 %1235 }
 0x1fa   : > { %v1238_v57 = vmul.f32 0.00390625, %v1236_v56 }
 0x1fc   : > { %v1239_v59 = vadd.f32 1e-05, %v1238_v57 }
 0x1fe   : > { %6187 = vrsqrt.f32 %v1239_v59  ;;  %v1839_v59 = vrot.slane %v1828_v49, %v7755_v61 }
 0x208   : > { %v6188_v4 = vpop.eup %6187 }
 0x209   : > { %v1242_v5 = vmul.f32 %v6188_v4, %v7696_v3  ;;  %v1241_v6 = vmul.f32 %v6188_v4, %v7694_v2 }
 0x20b   : > { %v1256_v7 = vmul.f32 %v1252_v0, %v1242_v5  ;;  %v1255_v8 = vmul.f32 %v1248_v1, %v1241_v6 }
 0x20d   : > { %v1258_v9 = vpack.c.bf16 %v1256_v7, %v1256_v7  ;;  %v1257_v10 = vpack.c.bf16 %v1255_v8, %v1255_v8 }
 0x20f   : > { %1483 = vmatprep.mubr.bf16.mxu0 %v1258_v9  ;;  %1652 = vmatprep.mubr.bf16.mxu1 %v1258_v9 }
 0x210   : > { %1484 = vmatmul.mubr.bf16.vlgmr.msra.gmra.mrb[0].mxu0 %v1257_v10  ;;  %1653 = vmatmul.mubr.bf16.vlgmr.msra.gmra.mrb[0].mxu1 %v1257_v10 }
 0x211   : > { %5909 = vmatpush3.bf16.msra.mxu1 %v6172_v11  ;;  %1820 = vmatprep.mubr.bf16.mxu1 %v1258_v9 }
 0x212   : > { %5910 = vmatprep.subr.bf16.mxu1 %v6173_v12 }
 0x215   : > { %5911 = vmatpush3.bf16.msra.mxu1 %v6174_v13 }
 0x216   : > { %5912 = vmatprep.subr.bf16.mxu1 %v6175_v14 }
 0x219   : > { %5913 = vmatpush3.bf16.msra.mxu1 %v6176_v15 }
 0x21a   : > { %5914 = vmatprep.subr.bf16.mxu1 %v6177_v16 }
 0x21d   : > { %5915 = vmatpush3.bf16.msra.mxu1 %v6178_v17 }
 0x21e   : > { %5916 = vmatprep.subr.bf16.mxu1 %v6179_v18 }
 0x221   : > { %5917 = vmatpush3.bf16.msra.mxu1 %v6180_v19 }
 0x222   : > { %5918 = vmatprep.subr.bf16.mxu1 %v6181_v20 }
 0x225   : > { %5919 = vmatpush3.bf16.msra.mxu1 %v6182_v21 }
 0x226   : > { %5920 = vmatprep.subr.bf16.mxu1 %v6183_v22 }
 0x229   : > { %5921 = vmatpush3.bf16.msra.mxu1 %v6184_v23 }
 0x22a   : > { %5922 = vmatprep.subr.bf16.mxu1 %v6185_v24 }
 0x22d   : > { %5923 = vmatpush3.bf16.msra.mxu1 %v6186_v25 }
 0x230   : > { %1821 = vmatmul.mubr.bf16.vlgmr.msra.gmra.mrb[4].mxu1 %v1257_v10 }
 0x2e3   : > { %v1485_v26 = vpop.f32.mrb[0].mxu0  ;;  %v5902_v27 = vpop.f32.mrb[0].mxu1 }
 0x2e4   : > { %v5903_v28 = vpop.f32.mrb[1].mxu1  ;;  %1844 = vrot.lane.b32.xlu1 %v1485_v26, %s7010_s2  ;;  %v1487_v29 = vpop.f32.mrb[1].mxu0  ;;  %v1842_v9 = vmul.f32 %v1835_v58, %v1485_v26 }
 0x2e5   : > { %v5904_v30 = vadd.f32 %v5903_v28, %v5902_v27  ;;  %v1489_v31 = vpop.f32.mrb[2].mxu0  ;;  %v5905_v32 = vpop.f32.mrb[2].mxu1  ;;  %v1843_v10 = vmul.f32 %v1839_v59, %v1487_v29 }
 0x2e6   : > { %v1490_v33 = vpop.f32.mrb[3].mxu0  ;;  %v5906_v34 = vpop.f32.mrb[3].mxu1 }
 0x2e7   : > { %1900 = vrot.lane.b32.xlu0 %v5904_v30, %s7010_s2  ;;  %v1899_v54 = vmul.f32 %v5904_v30, %v5506_v47 }
 0x2e8   : > { %1846 = vrot.lane.b32.xlu1 %v1487_v29, %s7010_s2 }
 0x2ec   : > { %1868 = vrot.lane.b32.xlu1 %v1485_v26, %s7011_s5 }
 0x2f0   : > { %1910 = vrot.lane.b32.xlu1 %v5904_v30, %s7011_s5 }
 0x2f4   : > { %1870 = vrot.lane.b32.xlu1 %v1487_v29, %s7011_s5  ;;  %s8530_s5 = sld [smem:[#allocation56_spill]] }
 0x2fa   : > { %v1830_v57 = vld [vmem:[%s8530_s5] sm:$0x3] }
 0x2fb   : > { %v1879_v6 = vrot.slane %v1830_v57, %v7758_v62  ;;  %v1883_v7 = vrot.slane %v1830_v57, %v7755_v61 }
 0x303   : > { %v5924_v35 = vpop.f32.mrb[4].mxu1 }
 0x304   : > { %v5925_v36 = vpop.f32.mrb[5].mxu1 }
 0x305   : > { %v5926_v37 = vadd.f32 %v5925_v36, %v5924_v35  ;;  %v5927_v38 = vpop.f32.mrb[6].mxu1 }
 0x306   : > { %v5928_v39 = vpop.f32.mrb[7].mxu1 }
 0x307   : > { %v7781_v40 = vpack.c.bf16 %v5926_v37, %v5926_v37 }
 0x356   : > { %v1845_v41 = vpop.permute.xlu1 %1844 }
 0x359   : > { %v1901_v45 = vpop.permute.xlu0 %1900 }
 0x35a   : > { %v1847_v43 = vpop.permute.xlu1 %1846  ;;  %v1908_v50 = vmul.f32 %v5507_v44, %v1901_v45 }
 0x35b   : > { %v1851_v55 = vsel %vm1850_vm0, %v1845_v41, %v1847_v43  ;;  %v1852_v56 = vsel %vm1850_vm0, %v1847_v43, %v1845_v41 }
 0x35c   : > { %v1909_v0 = vadd.f32 %v1908_v50, %v1899_v54  ;;  %v1864_v4 = vmul.f32 %v1857_v51, %v1852_v56  ;;  %v1865_v5 = vmul.f32 %v1861_v52, %v1851_v55 }
 0x35e   : > { %v1869_v48 = vpop.permute.xlu1 %1868  ;;  %v1866_v15 = vadd.f32 %v1864_v4, %v1842_v9  ;;  %v1867_v16 = vadd.f32 %v1865_v5, %v1843_v10 }
 0x362   : > { %v1911_v63 = vpop.permute.xlu1 %1910 }
 0x363   : > { %v1918_v1 = vmul.f32 %v5508_v53, %v1911_v63 }
 0x365   : > { %v1919_v8 = vadd.f32 %v1918_v1, %v1909_v0 }
 0x366   : > { %v1871_v11 = vpop.permute.xlu1 %1870 }
 0x367   : > { %v7808_v12 = vpack.c.bf16 %v1919_v8, %v1919_v8  ;;  %v1873_v13 = vsel %vm1872_vm1, %v1869_v48, %v1871_v11  ;;  %v1874_v14 = vsel %vm1872_vm1, %v1871_v11, %v1869_v48 }
 0x368   : > { %v1886_v17 = vmul.f32 %v1879_v6, %v1873_v13  ;;  %v1887_v18 = vmul.f32 %v1883_v7, %v1874_v14 }
 0x36a   : > { %v7810_v19 = vadd.f32 %v1886_v17, %v1866_v15  ;;  %v7812_v20 = vadd.f32 %v1887_v18, %v1867_v16 }
 0x36b   : > { %6966 = dma.done.wait (%p6061_p3), [#allocation8], 32 }
 0x36c   : > { %6968 = vsyncadd (%p6061_p3), [#allocation8], 4294967264 }
 0x36d   : > { %6970 = dma.done.wait (%p6061_p3), [#allocation8 + $0x1], 32 }
 0x36e   : > { %6972 = vsyncadd (%p6061_p3), [#allocation8 + $0x1], 4294967264  ;;  %s5510_s1 = sshll.u32 %s7504_s9, 3  ;;  %s5511_s10 = sshll.u32 %s8524_s14, 7  ;;  %1933 = vst [vmem:[#allocation5] sm:$0x3] %v1919_v8 }
 0x36f   : > { %1934 = vst [vmem:[#allocation6] sm:$0x3] %v5926_v37  ;;  %s1937_s21 = sadd.s32 %s5511_s10, %s5510_s1  ;;  %s8531_s16 = sld [smem:[#allocation65_spill]] }
 0x375   : > { %s1938_s8 = scalar_lea.vmem %s8531_s16, %s1937_s21  ;;  %v1956_v21 = vld [vmem:[#allocation5] sm:$0x3] }
 0x376   : > { %1957 = vst [vmem:[%s1938_s8] sm:$0x3] %v1956_v21 }
 0x377   : > { %1982 = vsyncadd [#allocation8], 32  ;;  %s8532_s28 = sld [smem:[#allocation66_spill]]  ;;  %v2002_v22 = vld [vmem:[#allocation6] sm:$0x3] }
 0x37d   : > { %s1983_s30 = scalar_lea.vmem %s8532_s28, %s1937_s21 }
 0x37e   : > { %2003 = vst [vmem:[%s1983_s30] sm:$0x3] %v2002_v22 }
 0x37f   : > { %2028 = vsyncadd [#allocation8 + $0x1], 32  ;;  %s5512_s25 = sshll.u32 %s8544_s27, 7  ;;  %s5513_s15 = sshll.u32 %s8544_s27, 1 }
 0x380   : > { %s7832_s29 = scalar_lea.vmem [#allocation3], %s5512_s25  ;;  %s2032_s23 = scalar_lea.sflag [#allocation7], %s5513_s15 }
 0x381   : > { %6973 = dma.done.wait %s2032_s23, 2048 }
 0x382   : > { %6974 = vsyncadd %s2032_s23, 4294965248  ;;  %s5236_s19 = scalar_lea.sflag %s2032_s23, 1 [#allocation7]  ;;  %s7834_s2 = scalar_lea.vmem [#allocation4], %s5512_s25 }
 0x383   : > { %6975 = dma.done.wait %s5236_s19, 2048 }
 0x384   : > { %6976 = vsyncadd %s5236_s19, 4294965248  ;;  %v7012_v23 = vmov 0.0   ;;  %vm7013_vm2 = vmmov 0   ;;  %v7841_v24 = vstv %s7504_s9  ;;  %v2059_v25 = vld [vmem:[%s7832_s29] sm:$0xff]  ;;  %v2060_v26 = vld [vmem:[%s7832_s29 + $0x8] sm:$0xff]  ;;  %s8533_s5 = sld [smem:[#allocation45_spill]] }
 0x385   : > { %5970 = vmatprep.subr.bf16.mxu0 %v7012_v23  ;;  %5986 = vmatprep.mubr.msk.bf16.mxu0 %vm7013_vm2, %v7012_v23  ;;  %vm2043_vm3 = vcmp.eq.s32.totalorder %v7841_v24, 0  ;;  %vm2044_vm4 = vcmp.eq.s32.totalorder %v7841_v24, 1  ;;  %v2061_v27 = vld [vmem:[%s7832_s29 + $0x10] sm:$0xff]  ;;  %v2075_v28 = vpack.c.bf16 %v2059_v25, %v2059_v25  ;;  %v2076_v29 = vpack.c.bf16 %v2060_v26, %v2060_v26  ;;  %v2062_v30 = vld [vmem:[%s7832_s29 + $0x18] sm:$0xff]  ;;  %v2063_v36 = vld [vmem:[%s7832_s29 + $0x20] sm:$0xff]  ;;  %p5857_p6 = scmp.ne.s32.totalorder %s8524_s14, 1 }
 0x386   : > { %5990 = vmatprep.subr.bf16.mxu1 %v7012_v23  ;;  %6006 = vmatprep.mubr.msk.bf16.mxu1 %vm7013_vm2, %v7012_v23  ;;  %v2077_v33 = vpack.c.bf16 %v2061_v27, %v2061_v27  ;;  %v2078_v34 = vpack.c.bf16 %v2062_v30, %v2062_v30  ;;  %vm2045_vm5 = vcmp.eq.s32.totalorder %v7841_v24, 2  ;;  %vm2046_vm6 = vcmp.eq.s32.totalorder %v7841_v24, 3  ;;  %v2064_v37 = vld [vmem:[%s7832_s29 + $0x28] sm:$0xff]  ;;  %v2065_v44 = vld [vmem:[%s7832_s29 + $0x30] sm:$0xff]  ;;  %v2066_v45 = vld [vmem:[%s7832_s29 + $0x38] sm:$0xff]  ;;  %s8535_s14 = sld [smem:[#allocation64_spill]] (!%p5857_p6) }
 0x387   : > { %v2123_v31 = vsel %vm2043_vm3, %v7808_v12, %v2075_v28  ;;  %v2124_v32 = vsel %vm2044_vm4, %v7808_v12, %v2076_v29  ;;  %v2079_v42 = vpack.c.bf16 %v2063_v36, %v2063_v36  ;;  %v2080_v43 = vpack.c.bf16 %v2064_v37, %v2064_v37  ;;  %v2067_v51 = vld [vmem:[%s7832_s29 + $0x40] sm:$0xff]  ;;  %v2068_v52 = vld [vmem:[%s7832_s29 + $0x48] sm:$0xff]  ;;  %v2069_v58 = vld [vmem:[%s7832_s29 + $0x50] sm:$0xff] }
 0x388   : > { %v5515_v35 = vcombine.low %v2123_v31, %v2124_v32  ;;  %v2125_v38 = vsel %vm2045_vm5, %v7808_v12, %v2077_v33  ;;  %v2126_v39 = vsel %vm2046_vm6, %v7808_v12, %v2078_v34  ;;  %vm2047_vm7 = vcmp.eq.s32.totalorder %v7841_v24, 4  ;;  %v2070_v59 = vld [vmem:[%s7832_s29 + $0x58] sm:$0xff]  ;;  %v2071_v6 = vld [vmem:[%s7832_s29 + $0x60] sm:$0xff]  ;;  %v2072_v7 = vld [vmem:[%s7832_s29 + $0x68] sm:$0xff] }
 0x389   : > { %v5516_v41 = vcombine.low %v2125_v38, %v2126_v39  ;;  %vm2048_vm8 = vcmp.eq.s32.totalorder %v7841_v24, 5  ;;  %v2127_v46 = vsel %vm2047_vm7, %v7808_v12, %v2079_v42  ;;  %v2081_v49 = vpack.c.bf16 %v2065_v44, %v2065_v44  ;;  %v2073_v14 = vld [vmem:[%s7832_s29 + $0x70] sm:$0xff]  ;;  %v2074_v15 = vld [vmem:[%s7832_s29 + $0x78] sm:$0xff] }
 0x38a   : > { %5971 = vmatpush3.bf16.xpose.msra.mxu0 %v5515_v35  ;;  %v2128_v47 = vsel %vm2048_vm8, %v7808_v12, %v2080_v43  ;;  %v2082_v50 = vpack.c.bf16 %v2066_v45, %v2066_v45  ;;  %vm2049_vm9 = vcmp.eq.s32.totalorder %v7841_v24, 6  ;;  %vm2050_vm10 = vcmp.eq.s32.totalorder %v7841_v24, 7  ;;  %v2140_v43 = vld [vmem:[%s8533_s5 + $0x8] sm:$0xff]  ;;  %v2273_v45 = vld [vmem:[%s7834_s2] sm:$0xff] }
 0x38b   : > { %5972 = vmatprep.subr.bf16.mxu0 %v7012_v23  ;;  %v5517_v48 = vcombine.low %v2127_v46, %v2128_v47  ;;  %v2129_v53 = vsel %vm2049_vm9, %v7808_v12, %v2081_v49  ;;  %v2083_v56 = vpack.c.bf16 %v2067_v51, %v2067_v51  ;;  %v2084_v57 = vpack.c.bf16 %v2068_v52, %v2068_v52  ;;  %v2274_v46 = vld [vmem:[%s7834_s2 + $0x8] sm:$0xff]  ;;  %v2275_v47 = vld [vmem:[%s7834_s2 + $0x10] sm:$0xff]  ;;  %v2277_v52 = vld [vmem:[%s7834_s2 + $0x20] sm:$0xff] }
 0x38c   : > { %v2130_v54 = vsel %vm2050_vm10, %v7808_v12, %v2082_v50  ;;  %vm2051_vm11 = vcmp.eq.s32.totalorder %v7841_v24, 8  ;;  %vm2052_vm12 = vcmp.eq.s32.totalorder %v7841_v24, 9  ;;  %v2085_v4 = vpack.c.bf16 %v2069_v58, %v2069_v58  ;;  %v2276_v50 = vld [vmem:[%s7834_s2 + $0x18] sm:$0xff] }
 0x38d   : > { %v5518_v55 = vcombine.low %v2129_v53, %v2130_v54  ;;  %v2131_v63 = vsel %vm2051_vm11, %v7808_v12, %v2083_v56  ;;  %v2132_v0 = vsel %vm2052_vm12, %v7808_v12, %v2084_v57  ;;  %v2086_v5 = vpack.c.bf16 %v2070_v59, %v2070_v59  ;;  %v2278_v53 = vld [vmem:[%s7834_s2 + $0x28] sm:$0xff] }
 0x38e   : > { %v5519_v1 = vcombine.low %v2131_v63, %v2132_v0  ;;  %vm2053_vm13 = vcmp.eq.s32.totalorder %v7841_v24, 10  ;;  %vm2054_vm14 = vcmp.eq.s32.totalorder %v7841_v24, 11  ;;  %v2087_v11 = vpack.c.bf16 %v2071_v6, %v2071_v6 }
 0x38f   : > { %v2133_v8 = vsel %vm2053_vm13, %v7808_v12, %v2085_v4  ;;  %v2134_v9 = vsel %vm2054_vm14, %v7808_v12, %v2086_v5  ;;  %v2088_v13 = vpack.c.bf16 %v2072_v7, %v2072_v7  ;;  %vm2055_vm15 = vcmp.eq.s32.totalorder %v7841_v24, 12 }
 0x390   : > { %v5520_v10 = vcombine.low %v2133_v8, %v2134_v9  ;;  %vm2056_vm0 = vcmp.eq.s32.totalorder %v7841_v24, 13  ;;  %v2135_v16 = vsel %vm2055_vm15, %v7808_v12, %v2087_v11  ;;  %v7014_v18 = vmov 1935823168  }
 0x391   : > { %v2136_v17 = vsel %vm2056_vm0, %v7808_v12, %v2088_v13  ;;  %v2148_v21 = vunpack.c.l.s4 %v7014_v18  ;;  %v2089_v25 = vpack.c.bf16 %v2073_v14, %v2073_v14  ;;  %v2090_v26 = vpack.c.bf16 %v2074_v15, %v2074_v15 }
 0x392   : > { %5973 = vmatpush3.bf16.xpose.msra.mxu0 %v5516_v41  ;;  %v5521_v22 = vcombine.low %v2135_v16, %v2136_v17  ;;  %vm2057_vm1 = vcmp.eq.s32.totalorder %v7841_v24, 14  ;;  %vm2058_vm2 = vcmp.eq.s32.totalorder %v7841_v24, 15  ;;  %v2143_v30 = vcombine.low %v7810_v19, %v7812_v20  ;;  %v2279_v16 = vld [vmem:[%s7834_s2 + $0x30] sm:$0xff]  ;;  %v2280_v17 = vld [vmem:[%s7834_s2 + $0x38] sm:$0xff] }
 0x393   : > { %5974 = vmatprep.subr.bf16.mxu0 %v7012_v23  ;;  %v2149_v27 = vunpack.c.0.s8 %v2148_v21  ;;  %v2137_v28 = vsel %vm2057_vm1, %v7808_v12, %v2089_v25  ;;  %v2138_v29 = vsel %vm2058_vm2, %v7808_v12, %v2090_v26  ;;  %v2144_v31 = vcombine.high %v7810_v19, %v7812_v20  ;;  %v2139_v12 = vld [vmem:[%s8533_s5] sm:$0xff] }
 0x394   : > { %v5522_v33 = vcombine.low %v2137_v28, %v2138_v29  ;;  %v2290_v49 = vpack.c.bf16 %v2274_v46, %v2274_v46  ;;  %v2291_v51 = vpack.c.bf16 %v2275_v47, %v2275_v47  ;;  %v2292_v54 = vpack.c.bf16 %v2276_v50, %v2276_v50  ;;  %v2282_v28 = vld [vmem:[%s7834_s2 + $0x48] sm:$0xff] }
 0x395   : > { %v2152_v32 = vsub.s32 %v2149_v27, %v7752_v60  ;;  %v2294_v59 = vpack.c.bf16 %v2278_v53, %v2278_v53  ;;  %v2295_v18 = vpack.c.bf16 %v2279_v16, %v2279_v16  ;;  %v2296_v21 = vpack.c.bf16 %v2280_v17, %v2280_v17  ;;  %v2281_v27 = vld [vmem:[%s7834_s2 + $0x40] sm:$0xff]  ;;  %v6213_v16 = vld [vmem:[%s7485_s26 + $0x80] ss:$8 sps:$4 sm:$0xff]   ;;  %v6218_v17 = vld [vmem:[%s7485_s26 + $0x94] ss:$8 sps:$4 sm:$0xff]  }
 0x396   : > { %v2306_v57 = vsel %vm2044_vm4, %v7781_v40, %v2290_v49  ;;  %v2307_v58 = vsel %vm2045_vm5, %v7781_v40, %v2291_v51  ;;  %v2308_v0 = vsel %vm2046_vm6, %v7781_v40, %v2292_v54  ;;  %v2297_v29 = vpack.c.bf16 %v2281_v27, %v2281_v27  ;;  %v6191_v53 = vld [vmem:[%s7485_s26 + $0x4] ss:$8 sps:$4 sm:$0xff]  }
 0x397   : > { %v2153_v34 = vrot.slane %v2143_v30, %v2152_v32  ;;  %v2160_v35 = vrot.slane %v2144_v31, %v2152_v32  ;;  %v2310_v5 = vsel %vm2048_vm8, %v7781_v40, %v2294_v59  ;;  %v2312_v25 = vsel %vm2050_vm10, %v7781_v40, %v2296_v21  ;;  %v6221_v21 = vld [vmem:[%s7485_s26 + $0xa4] ss:$8 sps:$4 sm:$0xff]  }
 0x398   : > { %v2298_v30 = vpack.c.bf16 %v2282_v28, %v2282_v28  ;;  %v2313_v31 = vsel %vm2051_vm11, %v7781_v40, %v2297_v29  ;;  %v6227_v27 = vld [vmem:[%s7485_s26 + $0xc4] ss:$8 sps:$4 sm:$0xff]   ;;  %v6225_v28 = vld [vmem:[%s7485_s26 + $0xc0] ss:$8 sps:$4 sm:$0xff]   ;;  %v6230_v29 = vld [vmem:[%s7485_s26 + $0xd4] ss:$8 sps:$4 sm:$0xff]  }
 0x399   : > { %v2161_v36 = vpack.c.bf16 %v2160_v35, %v2153_v34  ;;  %v2283_v34 = vld [vmem:[%s7834_s2 + $0x50] sm:$0xff]  ;;  %v2284_v35 = vld [vmem:[%s7834_s2 + $0x58] sm:$0xff] }
 0x39a   : > { %5975 = vmatpush3.bf16.xpose.msra.mxu0 %v5517_v48  ;;  %v2289_v48 = vpack.c.bf16 %v2273_v45, %v2273_v45  ;;  %v2314_v32 = vsel %vm2052_vm12, %v7781_v40, %v2298_v30  ;;  %v6228_v30 = vld [vmem:[%s7485_s26 + $0xd0] ss:$8 sps:$4 sm:$0xff]  }
 0x39b   : > { %5976 = vmatprep.subr.bf16.mxu0 %v7012_v23 }
 0x39c   : > { %v2305_v56 = vsel %vm2043_vm3, %v7781_v40, %v2289_v48 }
 0x39d   : > { %v5523_v63 = vcombine.low %v2305_v56, %v2306_v57 }
 0x39f   : > { %5991 = vmatpush3.bf16.msra.mxu1 %v5523_v63  ;;  %v6192_v63 = vld [vmem:[%s7485_s26 + $0x10] ss:$8 sps:$4 sm:$0xff]  }
 0x3a0   : > { %5992 = vmatprep.subr.bf16.mxu1 %v7012_v23 }
 0x3a2   : > { %5977 = vmatpush3.bf16.xpose.msra.mxu0 %v5518_v55  ;;  %v2293_v55 = vpack.c.bf16 %v2277_v52, %v2277_v52 }
 0x3a3   : > { %5978 = vmatprep.subr.bf16.mxu0 %v7012_v23 }
 0x3a4   : > { %v2309_v4 = vsel %vm2047_vm7, %v7781_v40, %v2293_v55 }
 0x3a5   : > { %v5525_v6 = vcombine.low %v2309_v4, %v2310_v5  ;;  %v6200_v4 = vld [vmem:[%s7485_s26 + $0x34] ss:$8 sps:$4 sm:$0xff]   ;;  %v6198_v5 = vld [vmem:[%s7485_s26 + $0x30] ss:$8 sps:$4 sm:$0xff]  }
 0x3aa   : > { %5979 = vmatpush3.bf16.xpose.msra.mxu0 %v5519_v1  ;;  %v5524_v1 = vcombine.low %v2307_v58, %v2308_v0  ;;  %v6189_v58 = vld [vmem:[%s7485_s26] ss:$8 sps:$4 sm:$0xff]   ;;  %v6197_v0 = vld [vmem:[%s7485_s26 + $0x24] ss:$8 sps:$4 sm:$0xff]  }
 0x3ab   : > { %5980 = vmatprep.subr.bf16.mxu0 %v7012_v23 }
 0x3ac   : > { %5993 = vmatpush3.bf16.msra.mxu1 %v5524_v1  ;;  %v6195_v1 = vld [vmem:[%s7485_s26 + $0x20] ss:$8 sps:$4 sm:$0xff]  }
 0x3ad   : > { %5994 = vmatprep.subr.bf16.mxu1 %v7012_v23 }
 0x3b0   : > { %5995 = vmatpush3.bf16.msra.mxu1 %v5525_v6  ;;  %v6203_v6 = vld [vmem:[%s7485_s26 + $0x44] ss:$8 sps:$4 sm:$0xff]  }
 0x3b1   : > { %5996 = vmatprep.subr.bf16.mxu1 %v7012_v23 }
 0x3b2   : > { %5981 = vmatpush3.bf16.xpose.msra.mxu0 %v5520_v10 }
 0x3b3   : > { %5982 = vmatprep.subr.bf16.mxu0 %v7012_v23 }
 0x3ba   : > { %5983 = vmatpush3.bf16.xpose.msra.mxu0 %v5521_v22  ;;  %v2311_v22 = vsel %vm2049_vm9, %v7781_v40, %v2295_v18  ;;  %v6216_v18 = vld [vmem:[%s7485_s26 + $0x90] ss:$8 sps:$4 sm:$0xff]  }
 0x3bb   : > { %5984 = vmatprep.subr.bf16.mxu0 %v7012_v23  ;;  %v5526_v26 = vcombine.low %v2311_v22, %v2312_v25  ;;  %v6219_v22 = vld [vmem:[%s7485_s26 + $0xa0] ss:$8 sps:$4 sm:$0xff]   ;;  %v6224_v25 = vld [vmem:[%s7485_s26 + $0xb4] ss:$8 sps:$4 sm:$0xff]  }
 0x3bd   : > { %5997 = vmatpush3.bf16.msra.mxu1 %v5526_v26  ;;  %v6222_v26 = vld [vmem:[%s7485_s26 + $0xb0] ss:$8 sps:$4 sm:$0xff]  }
 0x3be   : > { %5998 = vmatprep.subr.bf16.mxu1 %v7012_v23 }
 0x3c2   : > { %5985 = vmatpush3.bf16.xpose.msra.mxu0 %v5522_v33  ;;  %v5527_v33 = vcombine.low %v2313_v31, %v2314_v32  ;;  %v6233_v31 = vld [vmem:[%s7485_s26 + $0xe4] ss:$8 sps:$4 sm:$0xff]   ;;  %v6231_v32 = vld [vmem:[%s7485_s26 + $0xe0] ss:$8 sps:$4 sm:$0xff]  }
 0x3c4   : > { %5999 = vmatpush3.bf16.msra.mxu1 %v5527_v33  ;;  %v6236_v33 = vld [vmem:[%s7485_s26 + $0xf4] ss:$8 sps:$4 sm:$0xff]  }
 0x3c5   : > { %6000 = vmatprep.subr.bf16.mxu1 %v7012_v23 }
 0x3c9   : > { %5987 = vmatmul.mubr.bf16.vlgmr.msra.gmra.mrb[4].mxu0 %v2161_v36  ;;  %v2299_v36 = vpack.c.bf16 %v2283_v34, %v2283_v34  ;;  %v6234_v34 = vld [vmem:[%s7485_s26 + $0xf0] ss:$8 sps:$4 sm:$0xff]  }
 0x49c   : > { %v2244_v37 = vpop.f32.mrb[4].mxu0 }
 0x49d   : > { %v2251_v38 = vmul.f32 0.088388346, %v2244_v37  ;;  %v5988_v39 = vpop.f32.mrb[5].mxu0  ;;  %v2300_v37 = vpack.c.bf16 %v2284_v35, %v2284_v35  ;;  %v7015_v35 = vmov 1966171168  }
 0x49e   : > { %v2247_v19 = vpop.f32.mrb[6].mxu0  ;;  %v2287_v39 = vld [vmem:[%s7834_s2 + $0x70] sm:$0xff] }
 0x49f   : > { %v2252_v20 = vmul.f32 0.088388346, %v2247_v19  ;;  %v5989_v41 = vpop.f32.mrb[7].mxu0  ;;  %v2253_v42 = vadd.f32 %v2251_v38, %v2139_v12  ;;  %v2285_v12 = vld [vmem:[%s7834_s2 + $0x60] sm:$0xff]  ;;  %v2286_v38 = vld [vmem:[%s7834_s2 + $0x68] sm:$0xff]  ;;  %v2315_v19 = vsel %vm2053_vm13, %v7781_v40, %v2299_v36  ;;  %v2303_v45 = vpack.c.bf16 %v2287_v39, %v2287_v39 }
 0x4a0   : > { %v2301_v41 = vpack.c.bf16 %v2285_v12, %v2285_v12  ;;  %v2412_v36 = vunpack.c.l.s4 %v7015_v35 }
 0x4a1   : > { %2255 = vmax.xlane.f32.xlu0 %v2253_v42  ;;  %v2254_v44 = vadd.f32 %v2252_v20, %v2140_v43  ;;  %v2316_v20 = vsel %vm2054_vm14, %v7781_v40, %v2300_v37  ;;  %v2288_v43 = vld [vmem:[%s7834_s2 + $0x78] sm:$0xff]  ;;  %v2319_v50 = vsel %vm2057_vm1, %v7781_v40, %v2303_v45 }
 0x4a2   : > { %v2304_v46 = vpack.c.bf16 %v2288_v43, %v2288_v43  ;;  %v2317_v47 = vsel %vm2055_vm15, %v7781_v40, %v2301_v41  ;;  %v2413_v37 = vunpack.c.0.s8 %v2412_v36 }
 0x4a4   : > { %v2320_v51 = vsel %vm2058_vm2, %v7781_v40, %v2304_v46  ;;  %v2416_v12 = vsub.s32 %v2413_v37, %v7752_v60  ;;  %v6237_v60 = vld [vmem:[%s7523_s18] ss:$24 sps:$4 sm:$0xff]  }
 0x4a5   : > { %2257 = vmax.xlane.f32.xlu0 %v2254_v44  ;;  %v5530_v52 = vcombine.low %v2319_v50, %v2320_v51  ;;  %v6245_v50 = vld [vmem:[%s7523_s18 + $0x34] ss:$24 sps:$4 sm:$0xff]  }
 0x4a6   : > { %v6248_v51 = vld [vmem:[%s7523_s18 + $0x3c] ss:$24 sps:$4 sm:$0xff]  }
 0x52e   : > { %v2256_v7 = vpop.xlane.xlu0 %2255 }
 0x52f   : > { %v2259_v8 = vsub.f32 %v2253_v42, %v2256_v7  ;;  %v2302_v42 = vpack.c.bf16 %v2286_v38, %v2286_v38  ;;  %v6201_v7 = vld [vmem:[%s7485_s26 + $0x40] ss:$8 sps:$4 sm:$0xff]  }
 0x531   : > { %v2261_v9 = vmul.f32 1.442695, %v2259_v8  ;;  %v2318_v48 = vsel %vm2056_vm0, %v7781_v40, %v2302_v42  ;;  %v6206_v8 = vld [vmem:[%s7485_s26 + $0x54] ss:$8 sps:$4 sm:$0xff]  }
 0x532   : > { %v2258_v10 = vpop.xlane.xlu0 %2257  ;;  %v5529_v49 = vcombine.low %v2317_v47, %v2318_v48  ;;  %v6239_v47 = vld [vmem:[%s7523_s18 + $0x4] ss:$24 sps:$4 sm:$0xff]   ;;  %v6240_v48 = vld [vmem:[%s7523_s18 + $0x8] ss:$24 sps:$4 sm:$0xff]  }
 0x533   : > { %6669 = vpow2.f32 %v2261_v9  ;;  %v2260_v11 = vsub.f32 %v2254_v44, %v2258_v10  ;;  %v5528_v44 = vcombine.low %v2315_v19, %v2316_v20  ;;  %v6204_v9 = vld [vmem:[%s7485_s26 + $0x50] ss:$8 sps:$4 sm:$0xff]   ;;  %v6209_v10 = vld [vmem:[%s7485_s26 + $0x64] ss:$8 sps:$4 sm:$0xff]   ;;  %3270 = vmatprep.subr.bf16.mxu0 %v6239_v47  ;;  %v6315_v47 = vld [vmem:[%s7523_s18 + $0x270] ss:$24 sps:$4 sm:$0xff]  }
 0x534   : > { %3271 = vmatpush1.bf16.msra.mxu0 %v6237_v60  ;;  %v6320_v60 = vld [vmem:[%s7523_s18 + $0x27c] ss:$24 sps:$4 sm:$0xff]  }
 0x535   : > { %v2263_v13 = vmul.f32 1.442695, %v2260_v11  ;;  %6001 = vmatpush3.bf16.msra.mxu1 %v5528_v44  ;;  %v6207_v11 = vld [vmem:[%s7485_s26 + $0x60] ss:$8 sps:$4 sm:$0xff]   ;;  %3272 = vmatprep.subr.bf16.mxu0 %v6245_v50  ;;  %v6326_v50 = vld [vmem:[%s7523_s18 + $0x2ac] ss:$24 sps:$4 sm:$0xff]  }
 0x536   : > { %6002 = vmatprep.subr.bf16.mxu1 %v7012_v23 }
 0x537   : > { %6671 = vpow2.f32 %v2263_v13  ;;  %v6212_v13 = vld [vmem:[%s7485_s26 + $0x74] ss:$8 sps:$4 sm:$0xff]  }
 0x539   : > { %6003 = vmatpush3.bf16.msra.mxu1 %v5529_v49  ;;  %v6242_v49 = vld [vmem:[%s7523_s18 + $0xc] ss:$24 sps:$4 sm:$0xff]  }
 0x53a   : > { %6004 = vmatprep.subr.bf16.mxu1 %v7012_v23  ;;  %v6194_v23 = vld [vmem:[%s7485_s26 + $0x14] ss:$8 sps:$4 sm:$0xff]  }
 0x53d   : > { %v6670_v14 = vpop.eup %6669  ;;  %6005 = vmatpush3.bf16.msra.mxu1 %v5530_v52  ;;  %v6243_v52 = vld [vmem:[%s7523_s18 + $0x30] ss:$24 sps:$4 sm:$0xff]  }
 0x53e   : > { %2265 = vadd.xlane.f32.xlu1 %v6670_v14  ;;  %2625 = vmatprep.subr.bf16.mxu1 %v6191_v53  ;;  %v6246_v53 = vld [vmem:[%s7523_s18 + $0x38] ss:$24 sps:$4 sm:$0xff]  }
 0x53f   : > { %3273 = vmatpush1.bf16.msra.mxu0 %v6243_v52  ;;  %v6324_v52 = vld [vmem:[%s7523_s18 + $0x2a8] ss:$24 sps:$4 sm:$0xff]  }
 0x541   : > { %v6672_v15 = vpop.eup %6671 }
 0x542   : > { %2267 = vadd.xlane.f32.xlu1 %v6672_v15 }
 0x5cb   : > { %v2266_v54 = vpop.xlane.xlu1 %2265 }
 0x5cc   : > { %6673 = vrcp.f32 %v2266_v54  ;;  %v6251_v54 = vld [vmem:[%s7523_s18 + $0x64] ss:$24 sps:$4 sm:$0xff]  }
 0x5cd   : > { %3274 = vmatprep.subr.bf16.mxu0 %v6251_v54  ;;  %v6332_v54 = vld [vmem:[%s7523_s18 + $0x2dc] ss:$24 sps:$4 sm:$0xff]  }
 0x5cf   : > { %v2268_v55 = vpop.xlane.xlu1 %2267 }
 0x5d0   : > { %6675 = vrcp.f32 %v2268_v55  ;;  %v6254_v55 = vld [vmem:[%s7523_s18 + $0x6c] ss:$24 sps:$4 sm:$0xff]  }
 0x5d6   : > { %v6674_v56 = vpop.eup %6673 }
 0x5d7   : > { %v2271_v40 = vmul.f32 %v6674_v56, %v6670_v14  ;;  %v6210_v14 = vld [vmem:[%s7485_s26 + $0x70] ss:$8 sps:$4 sm:$0xff]   ;;  %v6249_v56 = vld [vmem:[%s7523_s18 + $0x60] ss:$24 sps:$4 sm:$0xff]  }
 0x5d8   : > { %3275 = vmatpush1.bf16.msra.mxu0 %v6249_v56  ;;  %v6330_v56 = vld [vmem:[%s7523_s18 + $0x2d8] ss:$24 sps:$4 sm:$0xff]  }
 0x5da   : > { %v6676_v24 = vpop.eup %6675 }
 0x5db   : > { %v2272_v57 = vmul.f32 %v6676_v24, %v6672_v15  ;;  %v6215_v15 = vld [vmem:[%s7485_s26 + $0x84] ss:$8 sps:$4 sm:$0xff]  }
 0x5dc   : > { %v6252_v24 = vld [vmem:[%s7523_s18 + $0x68] ss:$24 sps:$4 sm:$0xff]  }
 0x5dd   : > { %v2321_v59 = vpack.c.bf16 %v2272_v57, %v2271_v40  ;;  %v6257_v40 = vld [vmem:[%s7523_s18 + $0x94] ss:$24 sps:$4 sm:$0xff]  }
 0x5de   : > { %v6260_v57 = vld [vmem:[%s7523_s18 + $0x9c] ss:$24 sps:$4 sm:$0xff]   ;;  %3276 = vmatprep.subr.bf16.mxu0 %v6257_v40  ;;  %v6338_v40 = vld [vmem:[%s7493_s17 + $0x4] ss:$24 sps:$4 sm:$0xff]  }
 0x5df   : > { %6007 = vmatmul.mubr.bf16.vlgmr.msra.gmra.mrb[8].mxu1 %v2321_v59  ;;  %v6258_v59 = vld [vmem:[%s7523_s18 + $0x98] ss:$24 sps:$4 sm:$0xff]  }
 0x5e0   : > { %2626 = vmatpush1.bf16.msra.mxu1 %v6189_v58  ;;  %v6255_v58 = vld [vmem:[%s7523_s18 + $0x90] ss:$24 sps:$4 sm:$0xff]  }
 0x5e1   : > { %2627 = vmatprep.subr.bf16.mxu1 %v6194_v23  ;;  %v6263_v23 = vld [vmem:[%s7523_s18 + $0xc4] ss:$24 sps:$4 sm:$0xff]   ;;  %3277 = vmatpush1.bf16.msra.mxu0 %v6255_v58 }
 0x5e2   : > { %3278 = vmatprep.subr.bf16.mxu0 %v6263_v23  ;;  %v2678_v23 = vld [vmem:[%s7518_s3] sm:$0x3] }
 0x5e4   : > { %2628 = vmatpush1.bf16.msra.mxu1 %v6192_v63  ;;  %v6266_v63 = vld [vmem:[%s7523_s18 + $0xcc] ss:$24 sps:$4 sm:$0xff]  }
 0x5e5   : > { %2629 = vmatprep.subr.bf16.mxu1 %v6197_v0  ;;  %v6261_v0 = vld [vmem:[%s7523_s18 + $0xc0] ss:$24 sps:$4 sm:$0xff]  }
 0x5e6   : > { %3279 = vmatpush1.bf16.msra.mxu0 %v6261_v0  ;;  %v2687_v0 = vrot.slane %v2678_v23, %v7755_v61 }
 0x5e8   : > { %2630 = vmatpush1.bf16.msra.mxu1 %v6195_v1  ;;  %v6264_v1 = vld [vmem:[%s7523_s18 + $0xc8] ss:$24 sps:$4 sm:$0xff]  }
 0x5e9   : > { %2631 = vmatprep.subr.bf16.mxu1 %v6200_v4  ;;  %v6269_v4 = vld [vmem:[%s7523_s18 + $0xf4] ss:$24 sps:$4 sm:$0xff]  }
 0x5ea   : > { %3280 = vmatprep.subr.bf16.mxu0 %v6269_v4 }
 0x5ec   : > { %2632 = vmatpush1.bf16.msra.mxu1 %v6198_v5  ;;  %v6272_v5 = vld [vmem:[%s7523_s18 + $0xfc] ss:$24 sps:$4 sm:$0xff]  }
 0x5ed   : > { %2633 = vmatprep.subr.bf16.mxu1 %v6203_v6  ;;  %v6267_v6 = vld [vmem:[%s7523_s18 + $0xf0] ss:$24 sps:$4 sm:$0xff]  }
 0x5ee   : > { %3281 = vmatpush1.bf16.msra.mxu0 %v6267_v6 }
 0x5f0   : > { %2634 = vmatpush1.bf16.msra.mxu1 %v6201_v7  ;;  %v6270_v7 = vld [vmem:[%s7523_s18 + $0xf8] ss:$24 sps:$4 sm:$0xff]  }
 0x5f1   : > { %2635 = vmatprep.subr.bf16.mxu1 %v6206_v8  ;;  %v6275_v8 = vld [vmem:[%s7523_s18 + $0x124] ss:$24 sps:$4 sm:$0xff]  }
 0x5f2   : > { %3282 = vmatprep.subr.bf16.mxu0 %v6275_v8 }
 0x5f4   : > { %2636 = vmatpush1.bf16.msra.mxu1 %v6204_v9  ;;  %v6278_v9 = vld [vmem:[%s7523_s18 + $0x12c] ss:$24 sps:$4 sm:$0xff]  }
 0x5f5   : > { %2637 = vmatprep.subr.bf16.mxu1 %v6209_v10  ;;  %v6273_v10 = vld [vmem:[%s7523_s18 + $0x120] ss:$24 sps:$4 sm:$0xff]  }
 0x5f6   : > { %3283 = vmatpush1.bf16.msra.mxu0 %v6273_v10  ;;  %v6333_v10 = vld [vmem:[%s7523_s18 + $0x10] ss:$24 sps:$4 sm:$0xff]  }
 0x5f8   : > { %2638 = vmatpush1.bf16.msra.mxu1 %v6207_v11  ;;  %v6276_v11 = vld [vmem:[%s7523_s18 + $0x128] ss:$24 sps:$4 sm:$0xff]  }
 0x5f9   : > { %2639 = vmatprep.subr.bf16.mxu1 %v6212_v13  ;;  %v6281_v13 = vld [vmem:[%s7523_s18 + $0x154] ss:$24 sps:$4 sm:$0xff]  }
 0x5fa   : > { %3284 = vmatprep.subr.bf16.mxu0 %v6281_v13  ;;  %v6341_v13 = vld [vmem:[%s7523_s18 + $0x44] ss:$24 sps:$4 sm:$0xff]  }
 0x5fc   : > { %2640 = vmatpush1.bf16.msra.mxu1 %v6210_v14  ;;  %v6284_v14 = vld [vmem:[%s7523_s18 + $0x15c] ss:$24 sps:$4 sm:$0xff]  }
 0x5fd   : > { %2641 = vmatprep.subr.bf16.mxu1 %v6215_v15  ;;  %v6279_v15 = vld [vmem:[%s7523_s18 + $0x150] ss:$24 sps:$4 sm:$0xff]  }
 0x5fe   : > { %3285 = vmatpush1.bf16.msra.mxu0 %v6279_v15  ;;  %v6339_v15 = vld [vmem:[%s7523_s18 + $0x40] ss:$24 sps:$4 sm:$0xff]  }
 0x600   : > { %2642 = vmatpush1.bf16.msra.mxu1 %v6213_v16  ;;  %v6282_v16 = vld [vmem:[%s7523_s18 + $0x158] ss:$24 sps:$4 sm:$0xff]  }
 0x601   : > { %2643 = vmatprep.subr.bf16.mxu1 %v6218_v17  ;;  %v6287_v17 = vld [vmem:[%s7523_s18 + $0x184] ss:$24 sps:$4 sm:$0xff]  }
 0x602   : > { %3286 = vmatprep.subr.bf16.mxu0 %v6287_v17  ;;  %v6347_v17 = vld [vmem:[%s7523_s18 + $0x74] ss:$24 sps:$4 sm:$0xff]  }
 0x604   : > { %2644 = vmatpush1.bf16.msra.mxu1 %v6216_v18  ;;  %v6290_v18 = vld [vmem:[%s7523_s18 + $0x18c] ss:$24 sps:$4 sm:$0xff]  }
 0x605   : > { %2645 = vmatprep.subr.bf16.mxu1 %v6221_v21  ;;  %v6285_v21 = vld [vmem:[%s7523_s18 + $0x180] ss:$24 sps:$4 sm:$0xff]  }
 0x606   : > { %3287 = vmatpush1.bf16.msra.mxu0 %v6285_v21  ;;  %v6345_v21 = vld [vmem:[%s7523_s18 + $0x70] ss:$24 sps:$4 sm:$0xff]  }
 0x608   : > { %2646 = vmatpush1.bf16.msra.mxu1 %v6219_v22  ;;  %v6288_v22 = vld [vmem:[%s7523_s18 + $0x188] ss:$24 sps:$4 sm:$0xff]  }
 0x609   : > { %2647 = vmatprep.subr.bf16.mxu1 %v6224_v25  ;;  %v6293_v25 = vld [vmem:[%s7523_s18 + $0x1b4] ss:$24 sps:$4 sm:$0xff]  }
 0x60a   : > { %3288 = vmatprep.subr.bf16.mxu0 %v6293_v25  ;;  %v6353_v25 = vld [vmem:[%s7523_s18 + $0xa4] ss:$24 sps:$4 sm:$0xff]  }
 0x60c   : > { %2648 = vmatpush1.bf16.msra.mxu1 %v6222_v26  ;;  %v6296_v26 = vld [vmem:[%s7523_s18 + $0x1bc] ss:$24 sps:$4 sm:$0xff]  }
 0x60d   : > { %2649 = vmatprep.subr.bf16.mxu1 %v6227_v27  ;;  %v6291_v27 = vld [vmem:[%s7523_s18 + $0x1b0] ss:$24 sps:$4 sm:$0xff]  }
 0x60e   : > { %3289 = vmatpush1.bf16.msra.mxu0 %v6291_v27  ;;  %v6351_v27 = vld [vmem:[%s7523_s18 + $0xa0] ss:$24 sps:$4 sm:$0xff]  }
 0x610   : > { %2650 = vmatpush1.bf16.msra.mxu1 %v6225_v28  ;;  %v6294_v28 = vld [vmem:[%s7523_s18 + $0x1b8] ss:$24 sps:$4 sm:$0xff]  }
 0x611   : > { %2651 = vmatprep.subr.bf16.mxu1 %v6230_v29  ;;  %v6299_v29 = vld [vmem:[%s7523_s18 + $0x1e4] ss:$24 sps:$4 sm:$0xff]  }
 0x612   : > { %3290 = vmatprep.subr.bf16.mxu0 %v6299_v29  ;;  %v6359_v29 = vld [vmem:[%s7523_s18 + $0xd4] ss:$24 sps:$4 sm:$0xff]  }
 0x614   : > { %2652 = vmatpush1.bf16.msra.mxu1 %v6228_v30  ;;  %v6302_v30 = vld [vmem:[%s7523_s18 + $0x1ec] ss:$24 sps:$4 sm:$0xff]  }
 0x615   : > { %2653 = vmatprep.subr.bf16.mxu1 %v6233_v31  ;;  %v6297_v31 = vld [vmem:[%s7523_s18 + $0x1e0] ss:$24 sps:$4 sm:$0xff]  }
 0x616   : > { %3291 = vmatpush1.bf16.msra.mxu0 %v6297_v31  ;;  %v6357_v31 = vld [vmem:[%s7523_s18 + $0xd0] ss:$24 sps:$4 sm:$0xff]  }
 0x618   : > { %2654 = vmatpush1.bf16.msra.mxu1 %v6231_v32  ;;  %v6300_v32 = vld [vmem:[%s7523_s18 + $0x1e8] ss:$24 sps:$4 sm:$0xff]  }
 0x619   : > { %2655 = vmatprep.subr.bf16.mxu1 %v6236_v33 }
 0x61c   : > { %2656 = vmatpush1.bf16.msra.mxu1 %v6234_v34 }
 0x61d   : > { %3311 = vmatprep.subr.bf16.mxu1 %v6242_v49  ;;  %v6323_v49 = vld [vmem:[%s7523_s18 + $0x2a4] ss:$24 sps:$4 sm:$0xff]  }
 0x6b2   : > { %v2404_v38 = vpop.f32.mrb[8].mxu1 }
 0x6b3   : > { %v6008_v39 = vpop.f32.mrb[9].mxu1  ;;  %v2417_v20 = vrot.slane %v2404_v38, %v2416_v12 }
 0x6b4   : > { %v2407_v19 = vpop.f32.mrb[10].mxu1 }
 0x6b5   : > { %v2424_v41 = vrot.slane %v2407_v19, %v2416_v12  ;;  %v6009_v42 = vpop.f32.mrb[11].mxu1 }
 0x6b6   : > { %v6311_v42 = vld [vmem:[%s7523_s18 + $0x244] ss:$24 sps:$4 sm:$0xff]  }
 0x6b7   : > { %v2427_v43 = vcombine.low %v2417_v20, %v2424_v41  ;;  %v2428_v44 = vcombine.high %v2417_v20, %v2424_v41  ;;  %v6308_v20 = vld [vmem:[%s7523_s18 + $0x21c] ss:$24 sps:$4 sm:$0xff]   ;;  %v6303_v41 = vld [vmem:[%s7523_s18 + $0x210] ss:$24 sps:$4 sm:$0xff]  }
 0x6b9   : > { %v2431_v45 = vpack.c.bf16 %v2427_v43, %v2427_v43  ;;  %v2432_v46 = vpack.c.bf16 %v2428_v44, %v2428_v44  ;;  %v6314_v43 = vld [vmem:[%s7523_s18 + $0x24c] ss:$24 sps:$4 sm:$0xff]   ;;  %v6309_v44 = vld [vmem:[%s7523_s18 + $0x240] ss:$24 sps:$4 sm:$0xff]  }
 0x6bb   : > { %2657 = vmatprep.mubr.bf16.mxu1 %v2432_v46  ;;  %v6317_v46 = vld [vmem:[%s7523_s18 + $0x274] ss:$24 sps:$4 sm:$0xff]  }
 0x6bc   : > { %2658 = vmatmul.mubr.bf16.vlgmr.msra.gmra.mrb[12].mxu1 %v2431_v45  ;;  %v6312_v45 = vld [vmem:[%s7523_s18 + $0x248] ss:$24 sps:$4 sm:$0xff]  }
 0x6bd   : > { %3312 = vmatpush1.bf16.msra.mxu1 %v6240_v48  ;;  %v6318_v48 = vld [vmem:[%s7523_s18 + $0x278] ss:$24 sps:$4 sm:$0xff]  }
 0x6be   : > { %3313 = vmatprep.subr.bf16.mxu1 %v6248_v51  ;;  %v6321_v51 = vld [vmem:[%s7523_s18 + $0x2a0] ss:$24 sps:$4 sm:$0xff]  }
 0x6c1   : > { %3314 = vmatpush1.bf16.msra.mxu1 %v6246_v53  ;;  %v6329_v53 = vld [vmem:[%s7523_s18 + $0x2d4] ss:$24 sps:$4 sm:$0xff]  }
 0x6c2   : > { %3315 = vmatprep.subr.bf16.mxu1 %v6254_v55  ;;  %v6327_v55 = vld [vmem:[%s7523_s18 + $0x2d0] ss:$24 sps:$4 sm:$0xff]  }
 0x6c5   : > { %3316 = vmatpush1.bf16.msra.mxu1 %v6252_v24  ;;  %v6335_v24 = vld [vmem:[%s7523_s18 + $0x14] ss:$24 sps:$4 sm:$0xff]  }
 0x6c6   : > { %3317 = vmatprep.subr.bf16.mxu1 %v6260_v57 }
 0x6c9   : > { %3318 = vmatpush1.bf16.msra.mxu1 %v6258_v59 }
 0x6ca   : > { %3319 = vmatprep.subr.bf16.mxu1 %v6266_v63  ;;  %v2683_v63 = vrot.slane %v2678_v23, %v7758_v62  ;;  %v6413_v23 = vld [vmem:[%s7523_s18 + $0x284] ss:$24 sps:$4 sm:$0xff]  }
 0x6cd   : > { %3320 = vmatpush1.bf16.msra.mxu1 %v6264_v1 }
 0x6ce   : > { %3321 = vmatprep.subr.bf16.mxu1 %v6272_v5 }
 0x6d1   : > { %3322 = vmatpush1.bf16.msra.mxu1 %v6270_v7 }
 0x6d2   : > { %3323 = vmatprep.subr.bf16.mxu1 %v6278_v9 }
 0x6d5   : > { %3324 = vmatpush1.bf16.msra.mxu1 %v6276_v11  ;;  %v6336_v11 = vld [vmem:[%s7493_s17] ss:$24 sps:$4 sm:$0xff]  }
 0x6d6   : > { %3325 = vmatprep.subr.bf16.mxu1 %v6284_v14  ;;  %v6344_v14 = vld [vmem:[%s7493_s17 + $0x34] ss:$24 sps:$4 sm:$0xff]  }
 0x6d9   : > { %3326 = vmatpush1.bf16.msra.mxu1 %v6282_v16  ;;  %v6342_v16 = vld [vmem:[%s7493_s17 + $0x30] ss:$24 sps:$4 sm:$0xff]  }
 0x6da   : > { %3327 = vmatprep.subr.bf16.mxu1 %v6290_v18  ;;  %v6350_v18 = vld [vmem:[%s7493_s17 + $0x64] ss:$24 sps:$4 sm:$0xff]  }
 0x6dd   : > { %3328 = vmatpush1.bf16.msra.mxu1 %v6288_v22  ;;  %v6348_v22 = vld [vmem:[%s7493_s17 + $0x60] ss:$24 sps:$4 sm:$0xff]  }
 0x6de   : > { %3329 = vmatprep.subr.bf16.mxu1 %v6296_v26  ;;  %v6356_v26 = vld [vmem:[%s7493_s17 + $0x94] ss:$24 sps:$4 sm:$0xff]  }
 0x6e1   : > { %3330 = vmatpush1.bf16.msra.mxu1 %v6294_v28  ;;  %v6354_v28 = vld [vmem:[%s7493_s17 + $0x90] ss:$24 sps:$4 sm:$0xff]  }
 0x6e2   : > { %3331 = vmatprep.subr.bf16.mxu1 %v6302_v30  ;;  %v6362_v30 = vld [vmem:[%s7493_s17 + $0xc4] ss:$24 sps:$4 sm:$0xff]  }
 0x6e5   : > { %3332 = vmatpush1.bf16.msra.mxu1 %v6300_v32  ;;  %v6360_v32 = vld [vmem:[%s7493_s17 + $0xc0] ss:$24 sps:$4 sm:$0xff]  }
 0x6e6   : > { %3333 = vmatprep.subr.bf16.mxu1 %v6308_v20  ;;  %v6377_v20 = vld [vmem:[%s7523_s18 + $0x164] ss:$24 sps:$4 sm:$0xff]  }
 0x78f   : > { %v2659_v33 = vpop.f32.mrb[12].mxu1 }
 0x790   : > { %v8090_v34 = vadd.f32 %v2659_v33, %v7694_v2  ;;  %v2661_v35 = vpop.f32.mrb[13].mxu1  ;;  %v6305_v2 = vld [vmem:[%s7523_s18 + $0x214] ss:$24 sps:$4 sm:$0xff]   ;;  %v6365_v33 = vld [vmem:[%s7523_s18 + $0x104] ss:$24 sps:$4 sm:$0xff]  }
 0x791   : > { %v8093_v36 = vadd.f32 %v2661_v35, %v7696_v3  ;;  %v2663_v37 = vpop.f32.mrb[14].mxu1  ;;  %v6306_v3 = vld [vmem:[%s7523_s18 + $0x218] ss:$24 sps:$4 sm:$0xff]   ;;  %3292 = vmatprep.subr.bf16.mxu0 %v6305_v2  ;;  %v6368_v35 = vld [vmem:[%s7493_s17 + $0xf4] ss:$24 sps:$4 sm:$0xff]  }
 0x792   : > { %v2664_v12 = vpop.f32.mrb[15].mxu1  ;;  %v2668_v38 = vmul.f32 %v8090_v34, %v8090_v34  ;;  %3293 = vmatpush1.bf16.msra.mxu0 %v6303_v41  ;;  %3334 = vmatpush1.bf16.msra.mxu1 %v6306_v3  ;;  %v6363_v37 = vld [vmem:[%s7523_s18 + $0x100] ss:$24 sps:$4 sm:$0xff]   ;;  %v6372_v2 = vld [vmem:[%s7493_s17 + $0x120] ss:$24 sps:$4 sm:$0xff]  }
 0x793   : > { %v2669_v39 = vmul.f32 %v8093_v36, %v8093_v36  ;;  %3294 = vmatprep.subr.bf16.mxu0 %v6311_v42  ;;  %3335 = vmatprep.subr.bf16.mxu1 %v6314_v43  ;;  %v6366_v12 = vld [vmem:[%s7493_s17 + $0xf0] ss:$24 sps:$4 sm:$0xff]   ;;  %v6380_v41 = vld [vmem:[%s7493_s17 + $0x154] ss:$24 sps:$4 sm:$0xff]   ;;  %v6383_v43 = vld [vmem:[%s7523_s18 + $0x194] ss:$24 sps:$4 sm:$0xff]  }
 0x794   : > { %v6375_v3 = vld [vmem:[%s7523_s18 + $0x160] ss:$24 sps:$4 sm:$0xff]   ;;  %v6378_v42 = vld [vmem:[%s7493_s17 + $0x150] ss:$24 sps:$4 sm:$0xff]  }
 0x795   : > { %v2670_v19 = vadd.f32 %v2669_v39, %v2668_v38  ;;  %v6371_v38 = vld [vmem:[%s7523_s18 + $0x134] ss:$24 sps:$4 sm:$0xff]   ;;  %v6374_v39 = vld [vmem:[%s7493_s17 + $0x124] ss:$24 sps:$4 sm:$0xff]  }
 0x796   : > { %3295 = vmatpush1.bf16.msra.mxu0 %v6309_v44  ;;  %3336 = vmatpush1.bf16.msra.mxu1 %v6312_v45  ;;  %v6386_v44 = vld [vmem:[%s7493_s17 + $0x184] ss:$24 sps:$4 sm:$0xff]  }
 0x797   : > { %2671 = vadd.xlane.f32.xlu0 %v2670_v19  ;;  %3296 = vmatprep.subr.bf16.mxu0 %v6317_v46  ;;  %v6369_v19 = vld [vmem:[%s7523_s18 + $0x130] ss:$24 sps:$4 sm:$0xff]   ;;  %v6384_v46 = vld [vmem:[%s7493_s17 + $0x180] ss:$24 sps:$4 sm:$0xff]  }
 0x798   : > { %3337 = vmatprep.subr.bf16.mxu1 %v6320_v60  ;;  %v6381_v45 = vld [vmem:[%s7523_s18 + $0x190] ss:$24 sps:$4 sm:$0xff]   ;;  %v6389_v60 = vld [vmem:[%s7523_s18 + $0x1c4] ss:$24 sps:$4 sm:$0xff]  }
 0x79a   : > { %3297 = vmatpush1.bf16.msra.mxu0 %v6315_v47  ;;  %3338 = vmatpush1.bf16.msra.mxu1 %v6318_v48  ;;  %v6392_v47 = vld [vmem:[%s7493_s17 + $0x1b4] ss:$24 sps:$4 sm:$0xff]  }
 0x79b   : > { %3298 = vmatprep.subr.bf16.mxu0 %v6323_v49  ;;  %3339 = vmatprep.subr.bf16.mxu1 %v6326_v50  ;;  %v6387_v48 = vld [vmem:[%s7523_s18 + $0x1c0] ss:$24 sps:$4 sm:$0xff]   ;;  %v6390_v49 = vld [vmem:[%s7493_s17 + $0x1b0] ss:$24 sps:$4 sm:$0xff]   ;;  %v6395_v50 = vld [vmem:[%s7523_s18 + $0x1f4] ss:$24 sps:$4 sm:$0xff]  }
 0x79e   : > { %3299 = vmatpush1.bf16.msra.mxu0 %v6321_v51  ;;  %3340 = vmatpush1.bf16.msra.mxu1 %v6324_v52  ;;  %v6398_v51 = vld [vmem:[%s7493_s17 + $0x1e4] ss:$24 sps:$4 sm:$0xff]  }
 0x79f   : > { %3300 = vmatprep.subr.bf16.mxu0 %v6329_v53  ;;  %3341 = vmatprep.subr.bf16.mxu1 %v6332_v54  ;;  %v6393_v52 = vld [vmem:[%s7523_s18 + $0x1f0] ss:$24 sps:$4 sm:$0xff]   ;;  %v6396_v53 = vld [vmem:[%s7493_s17 + $0x1e0] ss:$24 sps:$4 sm:$0xff]   ;;  %v6401_v54 = vld [vmem:[%s7523_s18 + $0x224] ss:$24 sps:$4 sm:$0xff]  }
 0x7a2   : > { %3301 = vmatpush1.bf16.msra.mxu0 %v6327_v55  ;;  %3342 = vmatpush1.bf16.msra.mxu1 %v6330_v56  ;;  %v6404_v55 = vld [vmem:[%s7493_s17 + $0x214] ss:$24 sps:$4 sm:$0xff]  }
 0x7a3   : > { %3352 = vmatprep.subr.bf16.mxu0 %v6335_v24  ;;  %4011 = vmatprep.subr.bf16.mxu1 %v6338_v40  ;;  %v6399_v56 = vld [vmem:[%s7523_s18 + $0x220] ss:$24 sps:$4 sm:$0xff]   ;;  %v6402_v24 = vld [vmem:[%s7493_s17 + $0x210] ss:$24 sps:$4 sm:$0xff]   ;;  %v6407_v40 = vld [vmem:[%s7523_s18 + $0x254] ss:$24 sps:$4 sm:$0xff]  }
 0x824   : > { %v2672_v57 = vpop.xlane.xlu0 %2671 }
 0x825   : > { %v2673_v58 = vmul.f32 0.00390625, %v2672_v57  ;;  %v6410_v57 = vld [vmem:[%s7493_s17 + $0x244] ss:$24 sps:$4 sm:$0xff]  }
 0x827   : > { %v2674_v59 = vadd.f32 1e-05, %v2673_v58  ;;  %v6405_v58 = vld [vmem:[%s7523_s18 + $0x250] ss:$24 sps:$4 sm:$0xff]  }
 0x829   : > { %6677 = vrsqrt.f32 %v2674_v59  ;;  %v6408_v59 = vld [vmem:[%s7493_s17 + $0x240] ss:$24 sps:$4 sm:$0xff]  }
 0x833   : > { %v6678_v1 = vpop.eup %6677 }
 0x834   : > { %v2676_v4 = vmul.f32 %v6678_v1, %v8090_v34  ;;  %v2677_v5 = vmul.f32 %v6678_v1, %v8093_v36  ;;  %v6414_v1 = vld [vmem:[%s7493_s17 + $0x270] ss:$24 sps:$4 sm:$0xff]  }
 0x836   : > { %v2690_v6 = vmul.f32 %v2683_v63, %v2676_v4  ;;  %v2691_v7 = vmul.f32 %v2687_v0, %v2677_v5  ;;  %v6416_v63 = vld [vmem:[%s7493_s17 + $0x274] ss:$24 sps:$4 sm:$0xff]   ;;  %v6419_v4 = vld [vmem:[%s7523_s18 + $0x2b4] ss:$24 sps:$4 sm:$0xff]   ;;  %v6422_v5 = vld [vmem:[%s7493_s17 + $0x2a4] ss:$24 sps:$4 sm:$0xff]  }
 0x837   : > { %v6411_v0 = vld [vmem:[%s7523_s18 + $0x280] ss:$24 sps:$4 sm:$0xff]  }
 0x838   : > { %v8126_v8 = vpack.c.bf16 %v2690_v6, %v2690_v6  ;;  %v8128_v9 = vpack.c.bf16 %v2691_v7, %v2691_v7  ;;  %v6417_v6 = vld [vmem:[%s7523_s18 + $0x2b0] ss:$24 sps:$4 sm:$0xff]   ;;  %v6420_v7 = vld [vmem:[%s7493_s17 + $0x2a0] ss:$24 sps:$4 sm:$0xff]  }
 0x83a   : > { %3302 = vmatprep.mubr.bf16.mxu0 %v8128_v9  ;;  %3343 = vmatprep.mubr.bf16.mxu1 %v8128_v9 }
 0x83b   : > { %3303 = vmatmul.mubr.bf16.vlgmr.msra.gmra.mrb[8].mxu0 %v8126_v8  ;;  %3344 = vmatmul.mubr.bf16.vlgmr.msra.gmra.mrb[16].mxu1 %v8126_v8 }
 0x83c   : > { %3353 = vmatpush1.bf16.msra.mxu0 %v6333_v10  ;;  %4012 = vmatpush1.bf16.msra.mxu1 %v6336_v11  ;;  %v6425_v10 = vld [vmem:[%s7523_s18 + $0x2e4] ss:$24 sps:$4 sm:$0xff]   ;;  %v6428_v11 = vld [vmem:[%s7493_s17 + $0x2d4] ss:$24 sps:$4 sm:$0xff]  }
 0x83d   : > { %3384 = vmatprep.mubr.bf16.mxu0 %v8128_v9  ;;  %4043 = vmatprep.mubr.bf16.mxu1 %v8128_v9 }
 0x83e   : > { %3354 = vmatprep.subr.bf16.mxu0 %v6341_v13  ;;  %4013 = vmatprep.subr.bf16.mxu1 %v6344_v14  ;;  %v6423_v13 = vld [vmem:[%s7523_s18 + $0x2e0] ss:$24 sps:$4 sm:$0xff]   ;;  %v6426_v14 = vld [vmem:[%s7493_s17 + $0x2d0] ss:$24 sps:$4 sm:$0xff]  }
 0x840   : > { %3355 = vmatpush1.bf16.msra.mxu0 %v6339_v15  ;;  %4014 = vmatpush1.bf16.msra.mxu1 %v6342_v16  ;;  %v6431_v15 = vld [vmem:[%s7493_s17 + $0xc] ss:$24 sps:$4 sm:$0xff]  }
 0x841   : > { %3356 = vmatprep.subr.bf16.mxu0 %v6347_v17  ;;  %4015 = vmatprep.subr.bf16.mxu1 %v6350_v18  ;;  %v6434_v16 = vld [vmem:[%s7493_s17 + $0x14] ss:$24 sps:$4 sm:$0xff]   ;;  %v6429_v17 = vld [vmem:[%s7493_s17 + $0x8] ss:$24 sps:$4 sm:$0xff]  }
 0x842   : > { %v6432_v18 = vld [vmem:[%s7493_s17 + $0x10] ss:$24 sps:$4 sm:$0xff]  }
 0x844   : > { %3357 = vmatpush1.bf16.msra.mxu0 %v6345_v21  ;;  %4016 = vmatpush1.bf16.msra.mxu1 %v6348_v22  ;;  %v6437_v21 = vld [vmem:[%s7493_s17 + $0x3c] ss:$24 sps:$4 sm:$0xff]  }
 0x845   : > { %3358 = vmatprep.subr.bf16.mxu0 %v6353_v25  ;;  %4017 = vmatprep.subr.bf16.mxu1 %v6356_v26  ;;  %v6440_v22 = vld [vmem:[%s7493_s17 + $0x44] ss:$24 sps:$4 sm:$0xff]   ;;  %v6435_v25 = vld [vmem:[%s7493_s17 + $0x38] ss:$24 sps:$4 sm:$0xff]  }
 0x846   : > { %v6438_v26 = vld [vmem:[%s7493_s17 + $0x40] ss:$24 sps:$4 sm:$0xff]  }
 0x848   : > { %3359 = vmatpush1.bf16.msra.mxu0 %v6351_v27  ;;  %4018 = vmatpush1.bf16.msra.mxu1 %v6354_v28  ;;  %v6443_v27 = vld [vmem:[%s7493_s17 + $0x6c] ss:$24 sps:$4 sm:$0xff]  }
 0x849   : > { %3360 = vmatprep.subr.bf16.mxu0 %v6359_v29  ;;  %4019 = vmatprep.subr.bf16.mxu1 %v6362_v30  ;;  %v6446_v28 = vld [vmem:[%s7493_s17 + $0x74] ss:$24 sps:$4 sm:$0xff]   ;;  %v6441_v29 = vld [vmem:[%s7493_s17 + $0x68] ss:$24 sps:$4 sm:$0xff]  }
 0x84a   : > { %v6444_v30 = vld [vmem:[%s7493_s17 + $0x70] ss:$24 sps:$4 sm:$0xff]  }
 0x84c   : > { %3361 = vmatpush1.bf16.msra.mxu0 %v6357_v31  ;;  %4020 = vmatpush1.bf16.msra.mxu1 %v6360_v32  ;;  %v6449_v31 = vld [vmem:[%s7493_s17 + $0x9c] ss:$24 sps:$4 sm:$0xff]  }
 0x84d   : > { %3362 = vmatprep.subr.bf16.mxu0 %v6365_v33  ;;  %4021 = vmatprep.subr.bf16.mxu1 %v6368_v35  ;;  %v6452_v32 = vld [vmem:[%s7493_s17 + $0xa4] ss:$24 sps:$4 sm:$0xff]   ;;  %v6450_v33 = vld [vmem:[%s7493_s17 + $0xa0] ss:$24 sps:$4 sm:$0xff]  }
 0x84e   : > { %v6455_v35 = vld [vmem:[%s7493_s17 + $0xcc] ss:$24 sps:$4 sm:$0xff]  }
 0x850   : > { %3363 = vmatpush1.bf16.msra.mxu0 %v6363_v37  ;;  %4022 = vmatpush1.bf16.msra.mxu1 %v6366_v12  ;;  %v6458_v37 = vld [vmem:[%s7493_s17 + $0xd4] ss:$24 sps:$4 sm:$0xff]   ;;  %v6453_v12 = vld [vmem:[%s7493_s17 + $0xc8] ss:$24 sps:$4 sm:$0xff]  }
 0x851   : > { %3364 = vmatprep.subr.bf16.mxu0 %v6371_v38  ;;  %4023 = vmatprep.subr.bf16.mxu1 %v6374_v39  ;;  %v6456_v38 = vld [vmem:[%s7493_s17 + $0xd0] ss:$24 sps:$4 sm:$0xff]   ;;  %v6461_v39 = vld [vmem:[%s7493_s17 + $0xfc] ss:$24 sps:$4 sm:$0xff]  }
 0x854   : > { %3365 = vmatpush1.bf16.msra.mxu0 %v6369_v19  ;;  %4024 = vmatpush1.bf16.msra.mxu1 %v6372_v2  ;;  %v6464_v19 = vld [vmem:[%s7493_s17 + $0x104] ss:$24 sps:$4 sm:$0xff]   ;;  %v6459_v2 = vld [vmem:[%s7493_s17 + $0xf8] ss:$24 sps:$4 sm:$0xff]  }
 0x855   : > { %3366 = vmatprep.subr.bf16.mxu0 %v6377_v20  ;;  %4025 = vmatprep.subr.bf16.mxu1 %v6380_v41  ;;  %v6462_v20 = vld [vmem:[%s7493_s17 + $0x100] ss:$24 sps:$4 sm:$0xff]   ;;  %v6467_v41 = vld [vmem:[%s7493_s17 + $0x12c] ss:$24 sps:$4 sm:$0xff]  }
 0x858   : > { %3367 = vmatpush1.bf16.msra.mxu0 %v6375_v3  ;;  %4026 = vmatpush1.bf16.msra.mxu1 %v6378_v42  ;;  %v6470_v3 = vld [vmem:[%s7493_s17 + $0x134] ss:$24 sps:$4 sm:$0xff]   ;;  %v6465_v42 = vld [vmem:[%s7493_s17 + $0x128] ss:$24 sps:$4 sm:$0xff]  }
 0x859   : > { %3368 = vmatprep.subr.bf16.mxu0 %v6383_v43  ;;  %4027 = vmatprep.subr.bf16.mxu1 %v6386_v44  ;;  %v6468_v43 = vld [vmem:[%s7493_s17 + $0x130] ss:$24 sps:$4 sm:$0xff]   ;;  %v6473_v44 = vld [vmem:[%s7493_s17 + $0x15c] ss:$24 sps:$4 sm:$0xff]  }
 0x85c   : > { %3369 = vmatpush1.bf16.msra.mxu0 %v6381_v45  ;;  %4028 = vmatpush1.bf16.msra.mxu1 %v6384_v46  ;;  %v6476_v45 = vld [vmem:[%s7493_s17 + $0x164] ss:$24 sps:$4 sm:$0xff]   ;;  %v6471_v46 = vld [vmem:[%s7493_s17 + $0x158] ss:$24 sps:$4 sm:$0xff]  }
 0x85d   : > { %3370 = vmatprep.subr.bf16.mxu0 %v6389_v60  ;;  %4029 = vmatprep.subr.bf16.mxu1 %v6392_v47  ;;  %v6474_v60 = vld [vmem:[%s7493_s17 + $0x160] ss:$24 sps:$4 sm:$0xff]   ;;  %v6479_v47 = vld [vmem:[%s7493_s17 + $0x18c] ss:$24 sps:$4 sm:$0xff]  }
 0x860   : > { %3371 = vmatpush1.bf16.msra.mxu0 %v6387_v48  ;;  %4030 = vmatpush1.bf16.msra.mxu1 %v6390_v49  ;;  %v6482_v48 = vld [vmem:[%s7493_s17 + $0x194] ss:$24 sps:$4 sm:$0xff]   ;;  %v6477_v49 = vld [vmem:[%s7493_s17 + $0x188] ss:$24 sps:$4 sm:$0xff]  }
 0x861   : > { %3372 = vmatprep.subr.bf16.mxu0 %v6395_v50  ;;  %4031 = vmatprep.subr.bf16.mxu1 %v6398_v51  ;;  %v6480_v50 = vld [vmem:[%s7493_s17 + $0x190] ss:$24 sps:$4 sm:$0xff]   ;;  %v6485_v51 = vld [vmem:[%s7493_s17 + $0x1bc] ss:$24 sps:$4 sm:$0xff]  }
 0x864   : > { %3373 = vmatpush1.bf16.msra.mxu0 %v6393_v52  ;;  %4032 = vmatpush1.bf16.msra.mxu1 %v6396_v53  ;;  %v6488_v52 = vld [vmem:[%s7493_s17 + $0x1c4] ss:$24 sps:$4 sm:$0xff]   ;;  %v6483_v53 = vld [vmem:[%s7493_s17 + $0x1b8] ss:$24 sps:$4 sm:$0xff]  }
 0x865   : > { %3374 = vmatprep.subr.bf16.mxu0 %v6401_v54  ;;  %4033 = vmatprep.subr.bf16.mxu1 %v6404_v55  ;;  %v6486_v54 = vld [vmem:[%s7493_s17 + $0x1c0] ss:$24 sps:$4 sm:$0xff]   ;;  %v6491_v55 = vld [vmem:[%s7493_s17 + $0x1ec] ss:$24 sps:$4 sm:$0xff]  }
 0x868   : > { %3375 = vmatpush1.bf16.msra.mxu0 %v6399_v56  ;;  %4034 = vmatpush1.bf16.msra.mxu1 %v6402_v24  ;;  %v6494_v56 = vld [vmem:[%s7493_s17 + $0x1f4] ss:$24 sps:$4 sm:$0xff]   ;;  %v6489_v24 = vld [vmem:[%s7493_s17 + $0x1e8] ss:$24 sps:$4 sm:$0xff]  }
 0x869   : > { %3376 = vmatprep.subr.bf16.mxu0 %v6407_v40  ;;  %4035 = vmatprep.subr.bf16.mxu1 %v6410_v57  ;;  %v6492_v40 = vld [vmem:[%s7493_s17 + $0x1f0] ss:$24 sps:$4 sm:$0xff]   ;;  %v6497_v57 = vld [vmem:[%s7493_s17 + $0x21c] ss:$24 sps:$4 sm:$0xff]  }
 0x86c   : > { %3377 = vmatpush1.bf16.msra.mxu0 %v6405_v58  ;;  %4036 = vmatpush1.bf16.msra.mxu1 %v6408_v59  ;;  %v6500_v58 = vld [vmem:[%s7493_s17 + $0x224] ss:$24 sps:$4 sm:$0xff]   ;;  %v6495_v59 = vld [vmem:[%s7493_s17 + $0x218] ss:$24 sps:$4 sm:$0xff]  }
 0x86d   : > { %3378 = vmatprep.subr.bf16.mxu0 %v6413_v23  ;;  %4037 = vmatprep.subr.bf16.mxu1 %v6416_v63  ;;  %v6498_v23 = vld [vmem:[%s7493_s17 + $0x220] ss:$24 sps:$4 sm:$0xff]   ;;  %v6503_v63 = vld [vmem:[%s7493_s17 + $0x24c] ss:$24 sps:$4 sm:$0xff]  }
 0x870   : > { %3379 = vmatpush1.bf16.msra.mxu0 %v6411_v0  ;;  %4038 = vmatpush1.bf16.msra.mxu1 %v6414_v1  ;;  %v6506_v0 = vld [vmem:[%s7493_s17 + $0x254] ss:$24 sps:$4 sm:$0xff]   ;;  %v6501_v1 = vld [vmem:[%s7493_s17 + $0x248] ss:$24 sps:$4 sm:$0xff]  }
 0x871   : > { %3380 = vmatprep.subr.bf16.mxu0 %v6419_v4  ;;  %4039 = vmatprep.subr.bf16.mxu1 %v6422_v5  ;;  %v6504_v4 = vld [vmem:[%s7493_s17 + $0x250] ss:$24 sps:$4 sm:$0xff]   ;;  %v6509_v5 = vld [vmem:[%s7493_s17 + $0x27c] ss:$24 sps:$4 sm:$0xff]  }
 0x874   : > { %3381 = vmatpush1.bf16.msra.mxu0 %v6417_v6  ;;  %4040 = vmatpush1.bf16.msra.mxu1 %v6420_v7  ;;  %v6512_v6 = vld [vmem:[%s7493_s17 + $0x284] ss:$24 sps:$4 sm:$0xff]   ;;  %v6507_v7 = vld [vmem:[%s7493_s17 + $0x278] ss:$24 sps:$4 sm:$0xff]  }
 0x875   : > { %3382 = vmatprep.subr.bf16.mxu0 %v6425_v10  ;;  %4041 = vmatprep.subr.bf16.mxu1 %v6428_v11  ;;  %v6510_v10 = vld [vmem:[%s7493_s17 + $0x280] ss:$24 sps:$4 sm:$0xff]   ;;  %v6515_v11 = vld [vmem:[%s7493_s17 + $0x2ac] ss:$24 sps:$4 sm:$0xff]  }
 0x878   : > { %3383 = vmatpush1.bf16.msra.mxu0 %v6423_v13  ;;  %4042 = vmatpush1.bf16.msra.mxu1 %v6426_v14  ;;  %v6518_v13 = vld [vmem:[%s7493_s17 + $0x2b4] ss:$24 sps:$4 sm:$0xff]   ;;  %v6513_v14 = vld [vmem:[%s7493_s17 + $0x2a8] ss:$24 sps:$4 sm:$0xff]  }
 0x879   : > { %4052 = vmatprep.subr.bf16.mxu0 %v6431_v15  ;;  %4093 = vmatprep.subr.bf16.mxu1 %v6434_v16  ;;  %v6516_v15 = vld [vmem:[%s7493_s17 + $0x2b0] ss:$24 sps:$4 sm:$0xff]   ;;  %v6521_v16 = vld [vmem:[%s7493_s17 + $0x2dc] ss:$24 sps:$4 sm:$0xff]  }
 0x87b   : > { %3385 = vmatmul.mubr.bf16.vlgmr.msra.gmra.mrb[12].mxu0 %v8126_v8  ;;  %4044 = vmatmul.mubr.bf16.vlgmr.msra.gmra.mrb[20].mxu1 %v8126_v8 }
 0x87c   : > { %4053 = vmatpush1.bf16.msra.mxu0 %v6429_v17  ;;  %4084 = vmatprep.mubr.bf16.mxu0 %v8128_v9  ;;  %v6524_v17 = vld [vmem:[%s7493_s17 + $0x2e4] ss:$24 sps:$4 sm:$0xff]  }
 0x87d   : > { %4094 = vmatpush1.bf16.msra.mxu1 %v6432_v18  ;;  %4125 = vmatprep.mubr.bf16.mxu1 %v8128_v9  ;;  %v6447_v9 = vld [vmem:[%s7493_s17 + $0x98] ss:$24 sps:$4 sm:$0xff]  }
 0x87e   : > { %4054 = vmatprep.subr.bf16.mxu0 %v6437_v21  ;;  %4095 = vmatprep.subr.bf16.mxu1 %v6440_v22  ;;  %v6519_v18 = vld [vmem:[%s7493_s17 + $0x2d8] ss:$24 sps:$4 sm:$0xff]   ;;  %v6527_v22 = vld [vmem:[%s7491_s7 + $0x4] ss:$8 sps:$4 sm:$0xff]  }
 0x87f   : > { %v6522_v21 = vld [vmem:[%s7493_s17 + $0x2e0] ss:$24 sps:$4 sm:$0xff]   ;;  %s8534_s17 = sld [smem:[#allocation60_spill]] (!%p5857_p6) }
 0x880   : > { %4055 = vmatpush1.bf16.msra.mxu0 %v6435_v25  ;;  %v6525_v25 = vld [vmem:[%s7491_s7] ss:$8 sps:$4 sm:$0xff]  }
 0x881   : > { %4096 = vmatpush1.bf16.msra.mxu1 %v6438_v26  ;;  %4056 = vmatprep.subr.bf16.mxu0 %v6443_v27  ;;  %v6530_v26 = vld [vmem:[%s7491_s7 + $0x14] ss:$8 sps:$4 sm:$0xff]   ;;  %v6528_v27 = vld [vmem:[%s7491_s7 + $0x10] ss:$8 sps:$4 sm:$0xff]  }
 0x882   : > { %4097 = vmatprep.subr.bf16.mxu1 %v6446_v28  ;;  %v6533_v28 = vld [vmem:[%s7491_s7 + $0x24] ss:$8 sps:$4 sm:$0xff]  }
 0x884   : > { %4057 = vmatpush1.bf16.msra.mxu0 %v6441_v29  ;;  %v6531_v29 = vld [vmem:[%s7491_s7 + $0x20] ss:$8 sps:$4 sm:$0xff]  }
 0x885   : > { %4098 = vmatpush1.bf16.msra.mxu1 %v6444_v30  ;;  %4058 = vmatprep.subr.bf16.mxu0 %v6449_v31  ;;  %v6536_v30 = vld [vmem:[%s7491_s7 + $0x34] ss:$8 sps:$4 sm:$0xff]   ;;  %v6534_v31 = vld [vmem:[%s7491_s7 + $0x30] ss:$8 sps:$4 sm:$0xff]  }
 0x886   : > { %4099 = vmatprep.subr.bf16.mxu1 %v6452_v32  ;;  %v6539_v32 = vld [vmem:[%s7491_s7 + $0x44] ss:$8 sps:$4 sm:$0xff]  }
 0x888   : > { %4059 = vmatpush1.bf16.msra.mxu0 %v6447_v9  ;;  %v6542_v9 = vld [vmem:[%s7491_s7 + $0x54] ss:$8 sps:$4 sm:$0xff]  }
 0x889   : > { %4100 = vmatpush1.bf16.msra.mxu1 %v6450_v33  ;;  %4060 = vmatprep.subr.bf16.mxu0 %v6455_v35  ;;  %v6540_v33 = vld [vmem:[%s7491_s7 + $0x50] ss:$8 sps:$4 sm:$0xff]   ;;  %v6545_v35 = vld [vmem:[%s7491_s7 + $0x64] ss:$8 sps:$4 sm:$0xff]  }
 0x88a   : > { %4101 = vmatprep.subr.bf16.mxu1 %v6458_v37  ;;  %v6543_v37 = vld [vmem:[%s7491_s7 + $0x60] ss:$8 sps:$4 sm:$0xff]  }
 0x88c   : > { %4061 = vmatpush1.bf16.msra.mxu0 %v6453_v12  ;;  %v6548_v12 = vld [vmem:[%s7491_s7 + $0x74] ss:$8 sps:$4 sm:$0xff]  }
 0x88d   : > { %4102 = vmatpush1.bf16.msra.mxu1 %v6456_v38  ;;  %4062 = vmatprep.subr.bf16.mxu0 %v6461_v39  ;;  %v6546_v38 = vld [vmem:[%s7491_s7 + $0x70] ss:$8 sps:$4 sm:$0xff]   ;;  %v6575_v39 = vld [vmem:[%s7491_s7 + $0x104] ss:$8 sps:$4 sm:$0xff]  }
 0x88e   : > { %4103 = vmatprep.subr.bf16.mxu1 %v6464_v19  ;;  %v6551_v19 = vld [vmem:[%s7491_s7 + $0x84] ss:$8 sps:$4 sm:$0xff]  }
 0x890   : > { %4063 = vmatpush1.bf16.msra.mxu0 %v6459_v2  ;;  %v6573_v2 = vld [vmem:[%s7491_s7 + $0x100] ss:$8 sps:$4 sm:$0xff]  }
 0x891   : > { %4104 = vmatpush1.bf16.msra.mxu1 %v6462_v20  ;;  %4064 = vmatprep.subr.bf16.mxu0 %v6467_v41  ;;  %v6549_v20 = vld [vmem:[%s7491_s7 + $0x80] ss:$8 sps:$4 sm:$0xff]   ;;  %v6581_v41 = vld [vmem:[%s7491_s7 + $0x114] ss:$8 sps:$4 sm:$0xff]  }
 0x892   : > { %4105 = vmatprep.subr.bf16.mxu1 %v6470_v3  ;;  %v6554_v3 = vld [vmem:[%s7491_s7 + $0x94] ss:$8 sps:$4 sm:$0xff]  }
 0x894   : > { %4065 = vmatpush1.bf16.msra.mxu0 %v6465_v42  ;;  %v6579_v42 = vld [vmem:[%s7491_s7 + $0x110] ss:$8 sps:$4 sm:$0xff]  }
 0x895   : > { %4106 = vmatpush1.bf16.msra.mxu1 %v6468_v43  ;;  %4066 = vmatprep.subr.bf16.mxu0 %v6473_v44  ;;  %v6552_v43 = vld [vmem:[%s7491_s7 + $0x90] ss:$8 sps:$4 sm:$0xff]   ;;  %v6587_v44 = vld [vmem:[%s7491_s7 + $0x124] ss:$8 sps:$4 sm:$0xff]  }
 0x896   : > { %4107 = vmatprep.subr.bf16.mxu1 %v6476_v45  ;;  %v6557_v45 = vld [vmem:[%s7491_s7 + $0xa4] ss:$8 sps:$4 sm:$0xff]  }
 0x898   : > { %4067 = vmatpush1.bf16.msra.mxu0 %v6471_v46  ;;  %v6585_v46 = vld [vmem:[%s7491_s7 + $0x120] ss:$8 sps:$4 sm:$0xff]  }
 0x899   : > { %4108 = vmatpush1.bf16.msra.mxu1 %v6474_v60  ;;  %4068 = vmatprep.subr.bf16.mxu0 %v6479_v47  ;;  %v6555_v60 = vld [vmem:[%s7491_s7 + $0xa0] ss:$8 sps:$4 sm:$0xff]   ;;  %v6593_v47 = vld [vmem:[%s7491_s7 + $0x134] ss:$8 sps:$4 sm:$0xff]  }
 0x89a   : > { %4109 = vmatprep.subr.bf16.mxu1 %v6482_v48  ;;  %v6560_v48 = vld [vmem:[%s7491_s7 + $0xb4] ss:$8 sps:$4 sm:$0xff]  }
 0x89c   : > { %4069 = vmatpush1.bf16.msra.mxu0 %v6477_v49  ;;  %v6591_v49 = vld [vmem:[%s7491_s7 + $0x130] ss:$8 sps:$4 sm:$0xff]  }
 0x89d   : > { %4110 = vmatpush1.bf16.msra.mxu1 %v6480_v50  ;;  %4070 = vmatprep.subr.bf16.mxu0 %v6485_v51  ;;  %v6558_v50 = vld [vmem:[%s7491_s7 + $0xb0] ss:$8 sps:$4 sm:$0xff]   ;;  %v6599_v51 = vld [vmem:[%s7491_s7 + $0x144] ss:$8 sps:$4 sm:$0xff]  }
 0x89e   : > { %4111 = vmatprep.subr.bf16.mxu1 %v6488_v52  ;;  %v6563_v52 = vld [vmem:[%s7491_s7 + $0xc4] ss:$8 sps:$4 sm:$0xff]  }
 0x8a0   : > { %4071 = vmatpush1.bf16.msra.mxu0 %v6483_v53  ;;  %v6597_v53 = vld [vmem:[%s7491_s7 + $0x140] ss:$8 sps:$4 sm:$0xff]  }
 0x8a1   : > { %4112 = vmatpush1.bf16.msra.mxu1 %v6486_v54  ;;  %4072 = vmatprep.subr.bf16.mxu0 %v6491_v55  ;;  %v6561_v54 = vld [vmem:[%s7491_s7 + $0xc0] ss:$8 sps:$4 sm:$0xff]   ;;  %v6605_v55 = vld [vmem:[%s7491_s7 + $0x154] ss:$8 sps:$4 sm:$0xff]  }
 0x8a2   : > { %4113 = vmatprep.subr.bf16.mxu1 %v6494_v56  ;;  %v6566_v56 = vld [vmem:[%s7491_s7 + $0xd4] ss:$8 sps:$4 sm:$0xff]  }
 0x8a4   : > { %4073 = vmatpush1.bf16.msra.mxu0 %v6489_v24  ;;  %v6603_v24 = vld [vmem:[%s7491_s7 + $0x150] ss:$8 sps:$4 sm:$0xff]  }
 0x8a5   : > { %4114 = vmatpush1.bf16.msra.mxu1 %v6492_v40  ;;  %4074 = vmatprep.subr.bf16.mxu0 %v6497_v57  ;;  %v6611_v40 = vld [vmem:[%s7491_s7 + $0x164] ss:$8 sps:$4 sm:$0xff]   ;;  %v6609_v57 = vld [vmem:[%s7491_s7 + $0x160] ss:$8 sps:$4 sm:$0xff]  }
 0x8a6   : > { %4115 = vmatprep.subr.bf16.mxu1 %v6500_v58  ;;  %v6564_v58 = vld [vmem:[%s7491_s7 + $0xd0] ss:$8 sps:$4 sm:$0xff]  }
 0x8a8   : > { %4075 = vmatpush1.bf16.msra.mxu0 %v6495_v59  ;;  %v6569_v59 = vld [vmem:[%s7491_s7 + $0xe4] ss:$8 sps:$4 sm:$0xff]  }
 0x8a9   : > { %4116 = vmatpush1.bf16.msra.mxu1 %v6498_v23  ;;  %4076 = vmatprep.subr.bf16.mxu0 %v6503_v63  ;;  %v6617_v23 = vld [vmem:[%s7491_s7 + $0x174] ss:$8 sps:$4 sm:$0xff]   ;;  %v6615_v63 = vld [vmem:[%s7491_s7 + $0x170] ss:$8 sps:$4 sm:$0xff]  }
 0x8aa   : > { %4117 = vmatprep.subr.bf16.mxu1 %v6506_v0  ;;  %v6567_v0 = vld [vmem:[%s7491_s7 + $0xe0] ss:$8 sps:$4 sm:$0xff]  }
 0x8ac   : > { %4077 = vmatpush1.bf16.msra.mxu0 %v6501_v1  ;;  %v6572_v1 = vld [vmem:[%s7491_s7 + $0xf4] ss:$8 sps:$4 sm:$0xff]  }
 0x8ad   : > { %4118 = vmatpush1.bf16.msra.mxu1 %v6504_v4  ;;  %4078 = vmatprep.subr.bf16.mxu0 %v6509_v5  ;;  %v6623_v4 = vld [vmem:[%s7491_s7 + $0x184] ss:$8 sps:$4 sm:$0xff]   ;;  %v6621_v5 = vld [vmem:[%s7491_s7 + $0x180] ss:$8 sps:$4 sm:$0xff]  }
 0x8ae   : > { %4119 = vmatprep.subr.bf16.mxu1 %v6512_v6  ;;  %v6570_v6 = vld [vmem:[%s7491_s7 + $0xf0] ss:$8 sps:$4 sm:$0xff]  }
 0x8b0   : > { %4079 = vmatpush1.bf16.msra.mxu0 %v6507_v7  ;;  %v6578_v7 = vld [vmem:[%s7491_s7 + $0x204] ss:$8 sps:$4 sm:$0xff]  }
 0x8b1   : > { %4120 = vmatpush1.bf16.msra.mxu1 %v6510_v10  ;;  %4080 = vmatprep.subr.bf16.mxu0 %v6515_v11  ;;  %v6629_v10 = vld [vmem:[%s7491_s7 + $0x194] ss:$8 sps:$4 sm:$0xff]   ;;  %v6627_v11 = vld [vmem:[%s7491_s7 + $0x190] ss:$8 sps:$4 sm:$0xff]  }
 0x8b2   : > { %4121 = vmatprep.subr.bf16.mxu1 %v6518_v13  ;;  %v6635_v13 = vld [vmem:[%s7491_s7 + $0x1a4] ss:$8 sps:$4 sm:$0xff]  }
 0x8b4   : > { %4081 = vmatpush1.bf16.msra.mxu0 %v6513_v14  ;;  %v6633_v14 = vld [vmem:[%s7491_s7 + $0x1a0] ss:$8 sps:$4 sm:$0xff]  }
 0x8b5   : > { %4122 = vmatpush1.bf16.msra.mxu1 %v6516_v15  ;;  %4082 = vmatprep.subr.bf16.mxu0 %v6521_v16  ;;  %v6641_v15 = vld [vmem:[%s7491_s7 + $0x1b4] ss:$8 sps:$4 sm:$0xff]   ;;  %v6639_v16 = vld [vmem:[%s7491_s7 + $0x1b0] ss:$8 sps:$4 sm:$0xff]  }
 0x8b6   : > { %4123 = vmatprep.subr.bf16.mxu1 %v6524_v17  ;;  %v6647_v17 = vld [vmem:[%s7491_s7 + $0x1c4] ss:$8 sps:$4 sm:$0xff]  }
 0x8b8   : > { %4083 = vmatpush1.bf16.msra.mxu0 %v6519_v18  ;;  %v6645_v18 = vld [vmem:[%s7491_s7 + $0x1c0] ss:$8 sps:$4 sm:$0xff]  }
 0x8b9   : > { %4124 = vmatpush1.bf16.msra.mxu1 %v6522_v21  ;;  %4722 = vmatprep.subr.bf16.mxu0 %v6527_v22  ;;  %v6653_v21 = vld [vmem:[%s7491_s7 + $0x1d4] ss:$8 sps:$4 sm:$0xff]   ;;  %v6651_v22 = vld [vmem:[%s7491_s7 + $0x1d0] ss:$8 sps:$4 sm:$0xff]  }
 0x8ba   : > { %4763 = vmatprep.subr.bf16.mxu1 %v6575_v39 }
 0x8bb   : > { %4085 = vmatmul.mubr.bf16.vlgmr.msra.gmra.mrb[16].mxu0 %v8126_v8 }
 0x8bc   : > { %4126 = vmatmul.mubr.bf16.vlgmr.msra.gmra.mrb[24].mxu1 %v8126_v8  ;;  %4723 = vmatpush1.bf16.msra.mxu0 %v6525_v25  ;;  %v6537_v8 = vld [vmem:[%s7491_s7 + $0x40] ss:$8 sps:$4 sm:$0xff]   ;;  %v6659_v25 = vld [vmem:[%s7491_s7 + $0x1e4] ss:$8 sps:$4 sm:$0xff]  }
 0x8bd   : > { %4724 = vmatprep.subr.bf16.mxu0 %v6530_v26  ;;  %4764 = vmatpush1.bf16.msra.mxu1 %v6573_v2  ;;  %v6657_v26 = vld [vmem:[%s7491_s7 + $0x1e0] ss:$8 sps:$4 sm:$0xff]  }
 0x8be   : > { %4765 = vmatprep.subr.bf16.mxu1 %v6581_v41 }
 0x8c0   : > { %4725 = vmatpush1.bf16.msra.mxu0 %v6528_v27 }
 0x8c1   : > { %4726 = vmatprep.subr.bf16.mxu0 %v6533_v28  ;;  %4766 = vmatpush1.bf16.msra.mxu1 %v6579_v42 }
 0x8c2   : > { %4767 = vmatprep.subr.bf16.mxu1 %v6587_v44 }
 0x8c4   : > { %4727 = vmatpush1.bf16.msra.mxu0 %v6531_v29 }
 0x8c5   : > { %4728 = vmatprep.subr.bf16.mxu0 %v6536_v30  ;;  %4768 = vmatpush1.bf16.msra.mxu1 %v6585_v46 }
 0x8c6   : > { %4769 = vmatprep.subr.bf16.mxu1 %v6593_v47 }
 0x8c8   : > { %4729 = vmatpush1.bf16.msra.mxu0 %v6534_v31 }
 0x8c9   : > { %4730 = vmatprep.subr.bf16.mxu0 %v6539_v32  ;;  %4770 = vmatpush1.bf16.msra.mxu1 %v6591_v49 }
 0x8ca   : > { %4771 = vmatprep.subr.bf16.mxu1 %v6599_v51 }
 0x8cc   : > { %4731 = vmatpush1.bf16.msra.mxu0 %v6537_v8 }
 0x8cd   : > { %4732 = vmatprep.subr.bf16.mxu0 %v6542_v9  ;;  %4772 = vmatpush1.bf16.msra.mxu1 %v6597_v53  ;;  %v6576_v53 = vld [vmem:[%s7491_s7 + $0x200] ss:$8 sps:$4 sm:$0xff]  }
 0x8ce   : > { %4773 = vmatprep.subr.bf16.mxu1 %v6605_v55  ;;  %v6584_v55 = vld [vmem:[%s7491_s7 + $0x214] ss:$8 sps:$4 sm:$0xff]  }
 0x8d0   : > { %4733 = vmatpush1.bf16.msra.mxu0 %v6540_v33  ;;  %v6663_v33 = vld [vmem:[%s7491_s7 + $0x1f0] ss:$8 sps:$4 sm:$0xff]  }
 0x8d1   : > { %4734 = vmatprep.subr.bf16.mxu0 %v6545_v35  ;;  %4774 = vmatpush1.bf16.msra.mxu1 %v6603_v24  ;;  %v6665_v35 = vld [vmem:[%s7491_s7 + $0x1f4] ss:$8 sps:$4 sm:$0xff]   ;;  %v6590_v24 = vld [vmem:[%s7491_s7 + $0x224] ss:$8 sps:$4 sm:$0xff]  }
 0x8d2   : > { %4775 = vmatprep.subr.bf16.mxu1 %v6611_v40  ;;  %v6588_v40 = vld [vmem:[%s7491_s7 + $0x220] ss:$8 sps:$4 sm:$0xff]  }
 0x8d4   : > { %4735 = vmatpush1.bf16.msra.mxu0 %v6543_v37 }
 0x8d5   : > { %4736 = vmatprep.subr.bf16.mxu0 %v6548_v12  ;;  %4776 = vmatpush1.bf16.msra.mxu1 %v6609_v57  ;;  %v6596_v57 = vld [vmem:[%s7491_s7 + $0x234] ss:$8 sps:$4 sm:$0xff]  }
 0x8d6   : > { %4777 = vmatprep.subr.bf16.mxu1 %v6617_v23  ;;  %v6600_v23 = vld [vmem:[%s7491_s7 + $0x240] ss:$8 sps:$4 sm:$0xff]  }
 0x8d8   : > { %4737 = vmatpush1.bf16.msra.mxu0 %v6546_v38 }
 0x8d9   : > { %4738 = vmatprep.subr.bf16.mxu0 %v6551_v19  ;;  %4778 = vmatpush1.bf16.msra.mxu1 %v6615_v63  ;;  %v6608_v63 = vld [vmem:[%s7491_s7 + $0x254] ss:$8 sps:$4 sm:$0xff]  }
 0x8da   : > { %4779 = vmatprep.subr.bf16.mxu1 %v6623_v4 }
 0x8dc   : > { %4739 = vmatpush1.bf16.msra.mxu0 %v6549_v20 }
 0x8dd   : > { %4740 = vmatprep.subr.bf16.mxu0 %v6554_v3  ;;  %4780 = vmatpush1.bf16.msra.mxu1 %v6621_v5  ;;  %v6612_v5 = vld [vmem:[%s7491_s7 + $0x260] ss:$8 sps:$4 sm:$0xff]  }
 0x8de   : > { %4781 = vmatprep.subr.bf16.mxu1 %v6629_v10 }
 0x8e0   : > { %4741 = vmatpush1.bf16.msra.mxu0 %v6552_v43 }
 0x8e1   : > { %4742 = vmatprep.subr.bf16.mxu0 %v6557_v45  ;;  %4782 = vmatpush1.bf16.msra.mxu1 %v6627_v11 }
 0x8e2   : > { %4783 = vmatprep.subr.bf16.mxu1 %v6635_v13  ;;  %v6618_v13 = vld [vmem:[%s7491_s7 + $0x270] ss:$8 sps:$4 sm:$0xff]  }
 0x8e4   : > { %4743 = vmatpush1.bf16.msra.mxu0 %v6555_v60 }
 0x8e5   : > { %4744 = vmatprep.subr.bf16.mxu0 %v6560_v48  ;;  %4784 = vmatpush1.bf16.msra.mxu1 %v6633_v14  ;;  %v6626_v14 = vld [vmem:[%s7491_s7 + $0x284] ss:$8 sps:$4 sm:$0xff]  }
 0x8e6   : > { %4785 = vmatprep.subr.bf16.mxu1 %v6641_v15  ;;  %v6624_v15 = vld [vmem:[%s7491_s7 + $0x280] ss:$8 sps:$4 sm:$0xff]  }
 0x8e8   : > { %4745 = vmatpush1.bf16.msra.mxu0 %v6558_v50 }
 0x8e9   : > { %4746 = vmatprep.subr.bf16.mxu0 %v6563_v52  ;;  %4786 = vmatpush1.bf16.msra.mxu1 %v6639_v16  ;;  %v6632_v16 = vld [vmem:[%s7491_s7 + $0x294] ss:$8 sps:$4 sm:$0xff]  }
 0x8ea   : > { %4787 = vmatprep.subr.bf16.mxu1 %v6647_v17  ;;  %v6630_v17 = vld [vmem:[%s7491_s7 + $0x290] ss:$8 sps:$4 sm:$0xff]  }
 0x8ec   : > { %4747 = vmatpush1.bf16.msra.mxu0 %v6561_v54 }
 0x8ed   : > { %4748 = vmatprep.subr.bf16.mxu0 %v6566_v56  ;;  %4788 = vmatpush1.bf16.msra.mxu1 %v6645_v18  ;;  %v6582_v56 = vld [vmem:[%s7491_s7 + $0x210] ss:$8 sps:$4 sm:$0xff]   ;;  %v6638_v18 = vld [vmem:[%s7491_s7 + $0x2a4] ss:$8 sps:$4 sm:$0xff]  }
 0x8ee   : > { %4789 = vmatprep.subr.bf16.mxu1 %v6653_v21 }
 0x8f0   : > { %4749 = vmatpush1.bf16.msra.mxu0 %v6564_v58  ;;  %v6594_v58 = vld [vmem:[%s7491_s7 + $0x230] ss:$8 sps:$4 sm:$0xff]  }
 0x8f1   : > { %4750 = vmatprep.subr.bf16.mxu0 %v6569_v59  ;;  %4790 = vmatpush1.bf16.msra.mxu1 %v6651_v22  ;;  %v6602_v59 = vld [vmem:[%s7491_s7 + $0x244] ss:$8 sps:$4 sm:$0xff]  }
 0x8f2   : > { %4791 = vmatprep.subr.bf16.mxu1 %v6659_v25 }
 0x8f4   : > { %4751 = vmatpush1.bf16.msra.mxu0 %v6567_v0  ;;  %v6606_v0 = vld [vmem:[%s7491_s7 + $0x250] ss:$8 sps:$4 sm:$0xff]  }
 0x8f5   : > { %4752 = vmatprep.subr.bf16.mxu0 %v6572_v1  ;;  %4792 = vmatpush1.bf16.msra.mxu1 %v6657_v26  ;;  %v6614_v1 = vld [vmem:[%s7491_s7 + $0x264] ss:$8 sps:$4 sm:$0xff]   ;;  %v6636_v26 = vld [vmem:[%s7491_s7 + $0x2a0] ss:$8 sps:$4 sm:$0xff]  }
 0x8f6   : > { %4793 = vmatprep.subr.bf16.mxu1 %v6665_v35  ;;  %v6650_v35 = vld [vmem:[%s7491_s7 + $0x2c4] ss:$8 sps:$4 sm:$0xff]  }
 0x8f8   : > { %4753 = vmatpush1.bf16.msra.mxu0 %v6570_v6 }
 0x8f9   : > { %4804 = vmatprep.subr.bf16.mxu0 %v6578_v7  ;;  %4794 = vmatpush1.bf16.msra.mxu1 %v6663_v33  ;;  %v6620_v7 = vld [vmem:[%s7491_s7 + $0x274] ss:$8 sps:$4 sm:$0xff]   ;;  %v6642_v33 = vld [vmem:[%s7491_s7 + $0x2b0] ss:$8 sps:$4 sm:$0xff]  }
 0x90e   : > { %v3304_v27 = vpop.f32.mrb[8].mxu0  ;;  %v8331_v28 = vpop.f32.mrb[16].mxu1 }
 0x90f   : > { %v3306_v29 = vpop.f32.mrb[9].mxu0  ;;  %v8333_v30 = vpop.f32.mrb[17].mxu1  ;;  %v5659_v37 = vmul.f32 -1.442695, %v3304_v27  ;;  %v5661_v4 = vmul.f32 -1.442695, %v8331_v28 }
 0x910   : > { %v3308_v31 = vpop.f32.mrb[10].mxu0  ;;  %v3349_v32 = vpop.f32.mrb[18].mxu1  ;;  %v5660_v12 = vmul.f32 -1.442695, %v3306_v29  ;;  %v5662_v6 = vmul.f32 -1.442695, %v8333_v30 }
 0x911   : > { %v3309_v8 = vpop.f32.mrb[11].mxu0  ;;  %v3350_v9 = vpop.f32.mrb[19].mxu1  ;;  %6679 = vpow2.f32 %v5659_v37  ;;  %v6644_v31 = vld [vmem:[%s7491_s7 + $0x2b4] ss:$8 sps:$4 sm:$0xff]   ;;  %v6648_v37 = vld [vmem:[%s7491_s7 + $0x2c0] ss:$8 sps:$4 sm:$0xff]  }
 0x912   : > { %6681 = vpow2.f32 %v5660_v12  ;;  %v6656_v12 = vld [vmem:[%s7491_s7 + $0x2d4] ss:$8 sps:$4 sm:$0xff]  }
 0x91b   : > { %v6680_v38 = vpop.eup %6679 }
 0x91c   : > { %v6682_v39 = vpop.eup %6681  ;;  %v3411_v19 = vadd.f32 1.0, %v6680_v38  ;;  %v6654_v38 = vld [vmem:[%s7491_s7 + $0x2d0] ss:$8 sps:$4 sm:$0xff]  }
 0x91d   : > { %v3412_v2 = vadd.f32 1.0, %v6682_v39  ;;  %v6662_v39 = vld [vmem:[%s7491_s7 + $0x2e4] ss:$8 sps:$4 sm:$0xff]  }
 0x91e   : > { %6683 = vrcp.f32 %v3411_v19 }
 0x91f   : > { %6685 = vrcp.f32 %v3412_v2 }
 0x920   : > { %6687 = vpow2.f32 %v5661_v4 }
 0x921   : > { %6689 = vpow2.f32 %v5662_v6 }
 0x928   : > { %v6684_v20 = vpop.eup %6683 }
 0x929   : > { %v6686_v41 = vpop.eup %6685  ;;  %v3429_v3 = vmul.f32 %v6684_v20, %v3304_v27  ;;  %v6660_v20 = vld [vmem:[%s7491_s7 + $0x2e0] ss:$8 sps:$4 sm:$0xff]  }
 0x92a   : > { %v3430_v42 = vmul.f32 %v6686_v41, %v3306_v29  ;;  %v6688_v21 = vpop.eup %6687 }
 0x92b   : > { %v6690_v22 = vpop.eup %6689  ;;  %v3413_v29 = vadd.f32 1.0, %v6688_v21 }
 0x92c   : > { %v3414_v32 = vadd.f32 1.0, %v6690_v22 }
 0x94e   : > { %v8337_v43 = vpop.f32.mrb[12].mxu0  ;;  %v4045_v44 = vpop.f32.mrb[20].mxu1 }
 0x94f   : > { %v4134_v45 = vmul.f32 %v4045_v44, %v3429_v3  ;;  %v8339_v46 = vpop.f32.mrb[13].mxu0  ;;  %v4047_v60 = vpop.f32.mrb[21].mxu1  ;;  %v5663_v10 = vmul.f32 -1.442695, %v8337_v43  ;;  %v6668_v3 = vld [vmem:[%s7491_s7 + $0x2f4] ss:$8 sps:$4 sm:$0xff]  }
 0x950   : > { %v4135_v47 = vmul.f32 %v4047_v60, %v3430_v42  ;;  %v3390_v48 = vpop.f32.mrb[14].mxu0  ;;  %v4049_v49 = vpop.f32.mrb[22].mxu1  ;;  %v5664_v11 = vmul.f32 -1.442695, %v8339_v46 }
 0x951   : > { %v3391_v50 = vpop.f32.mrb[15].mxu0  ;;  %v4050_v51 = vpop.f32.mrb[23].mxu1  ;;  %v4140_v54 = vpack.c.bf16 %v4134_v45, %v4134_v45  ;;  %6691 = vpow2.f32 %v5663_v10  ;;  %v6666_v48 = vld [vmem:[%s7491_s7 + $0x2f0] ss:$8 sps:$4 sm:$0xff]  }
 0x952   : > { %v4141_v52 = vpack.c.bf16 %v4135_v47, %v4135_v47  ;;  %6693 = vpow2.f32 %v5664_v11 }
 0x953   : > { %6695 = vrcp.f32 %v3413_v29 }
 0x954   : > { %4754 = vmatprep.mubr.bf16.mxu0 %v4141_v52  ;;  %6697 = vrcp.f32 %v3414_v32  ;;  %v6706_v32 = vld [vmem:[#allocation20 + $0x8] sm:$0xff] (!%p5857_p6)  }
 0x955   : > { %4755 = vmatmul.mubr.bf16.vlgmr.msra.gmra.mrb[20].mxu0 %v4140_v54 }
 0x956   : > { %4805 = vmatpush1.bf16.msra.mxu0 %v6576_v53 }
 0x957   : > { %4806 = vmatprep.subr.bf16.mxu0 %v6584_v55 }
 0x95a   : > { %4807 = vmatpush1.bf16.msra.mxu0 %v6582_v56 }
 0x95b   : > { %4808 = vmatprep.subr.bf16.mxu0 %v6590_v24  ;;  %v6692_v25 = vpop.eup %6691 }
 0x95c   : > { %v6694_v27 = vpop.eup %6693  ;;  %v3415_v8 = vadd.f32 1.0, %v6692_v25 }
 0x95d   : > { %v3416_v9 = vadd.f32 1.0, %v6694_v27  ;;  %v6696_v19 = vpop.eup %6695  ;;  %v6704_v27 = vld [vmem:[#allocation20] sm:$0xff] (!%p5857_p6)  }
 0x95e   : > { %4809 = vmatpush1.bf16.msra.mxu0 %v6588_v40  ;;  %6699 = vrcp.f32 %v3415_v8  ;;  %v6698_v2 = vpop.eup %6697  ;;  %v3431_v44 = vmul.f32 %v6696_v19, %v8331_v28  ;;  %v6707_v8 = vld [vmem:[#allocation20 + $0x50] sm:$0xff] (!%p5857_p6)   ;;  %v6717_v19 = vld [vmem:[#allocation20 + $0x78] sm:$0xff] (!%p5857_p6)  }
 0x95f   : > { %4810 = vmatprep.subr.bf16.mxu0 %v6596_v57  ;;  %6701 = vrcp.f32 %v3416_v9  ;;  %v3432_v45 = vmul.f32 %v6698_v2, %v8333_v30  ;;  %v6710_v9 = vld [vmem:[#allocation20 + $0x18] sm:$0xff] (!%p5857_p6)  }
 0x960   : > { %v6718_v2 = vld [vmem:[#allocation20 + $0x38] sm:$0xff] (!%p5857_p6)  }
 0x962   : > { %4811 = vmatpush1.bf16.msra.mxu0 %v6594_v58 }
 0x963   : > { %4812 = vmatprep.subr.bf16.mxu0 %v6602_v59 }
 0x966   : > { %4813 = vmatpush1.bf16.msra.mxu0 %v6600_v23 }
 0x967   : > { %4814 = vmatprep.subr.bf16.mxu0 %v6608_v63 }
 0x968   : > { %v6700_v41 = vpop.eup %6699 }
 0x969   : > { %v6702_v42 = vpop.eup %6701  ;;  %v3433_v60 = vmul.f32 %v6700_v41, %v8337_v43 }
 0x96a   : > { %4815 = vmatpush1.bf16.msra.mxu0 %v6606_v0  ;;  %v3434_v49 = vmul.f32 %v6702_v42, %v8339_v46  ;;  %v4863_v42 = vld [vmem:[%s8534_s17] sm:$0x3] (!%p5857_p6) }
 0x96b   : > { %4816 = vmatprep.subr.bf16.mxu0 %v6614_v1 }
 0x96e   : > { %4817 = vmatpush1.bf16.msra.mxu0 %v6612_v5 }
 0x96f   : > { %4818 = vmatprep.subr.bf16.mxu0 %v6620_v7 }
 0x972   : > { %4819 = vmatpush1.bf16.msra.mxu0 %v6618_v13 }
 0x973   : > { %4820 = vmatprep.subr.bf16.mxu0 %v6626_v14 }
 0x976   : > { %4821 = vmatpush1.bf16.msra.mxu0 %v6624_v15 }
 0x977   : > { %4822 = vmatprep.subr.bf16.mxu0 %v6632_v16 }
 0x97a   : > { %4823 = vmatpush1.bf16.msra.mxu0 %v6630_v17 }
 0x97b   : > { %4824 = vmatprep.subr.bf16.mxu0 %v6638_v18 }
 0x97e   : > { %4825 = vmatpush1.bf16.msra.mxu0 %v6636_v26  ;;  %v6703_v26 = vld [vmem:[#allocation20 + $0x40] sm:$0xff] (!%p5857_p6)  }
 0x97f   : > { %4826 = vmatprep.subr.bf16.mxu0 %v6644_v31  ;;  %v6705_v31 = vld [vmem:[#allocation20 + $0x48] sm:$0xff] (!%p5857_p6)  }
 0x982   : > { %4827 = vmatpush1.bf16.msra.mxu0 %v6642_v33  ;;  %v6711_v33 = vld [vmem:[#allocation20 + $0x60] sm:$0xff] (!%p5857_p6)  }
 0x983   : > { %4828 = vmatprep.subr.bf16.mxu0 %v6650_v35  ;;  %v6712_v35 = vld [vmem:[#allocation20 + $0x20] sm:$0xff] (!%p5857_p6)  }
 0x986   : > { %4829 = vmatpush1.bf16.msra.mxu0 %v6648_v37  ;;  %v6713_v37 = vld [vmem:[#allocation20 + $0x68] sm:$0xff] (!%p5857_p6)  }
 0x987   : > { %4830 = vmatprep.subr.bf16.mxu0 %v6656_v12  ;;  %v6714_v12 = vld [vmem:[#allocation20 + $0x28] sm:$0xff] (!%p5857_p6)  }
 0x98a   : > { %4831 = vmatpush1.bf16.msra.mxu0 %v6654_v38  ;;  %v6715_v38 = vld [vmem:[#allocation20 + $0x70] sm:$0xff] (!%p5857_p6)  }
 0x98b   : > { %4832 = vmatprep.subr.bf16.mxu0 %v6662_v39  ;;  %v6716_v39 = vld [vmem:[#allocation20 + $0x30] sm:$0xff] (!%p5857_p6)  }
 0x98e   : > { %v4086_v47 = vpop.f32.mrb[16].mxu0  ;;  %4833 = vmatpush1.bf16.msra.mxu0 %v6660_v20 }
 0x98f   : > { %v4136_v50 = vmul.f32 %v4086_v47, %v3431_v44  ;;  %v4127_v51 = vpop.f32.mrb[24].mxu1  ;;  %v4088_v52 = vpop.f32.mrb[17].mxu0  ;;  %4834 = vmatprep.subr.bf16.mxu0 %v6668_v3  ;;  %v4868_v44 = vrot.slane (!%p5857_p6), %v4863_v42, %v7758_v62 }
 0x990   : > { %v4138_v53 = vmul.f32 %v4127_v51, %v3433_v60  ;;  %v4137_v54 = vmul.f32 %v4088_v52, %v3432_v45  ;;  %v4129_v55 = vpop.f32.mrb[25].mxu1  ;;  %v4090_v56 = vpop.f32.mrb[18].mxu0  ;;  %v4872_v45 = vrot.slane (!%p5857_p6), %v4863_v42, %v7755_v61 }
 0x991   : > { %v4139_v24 = vmul.f32 %v4129_v55, %v3434_v49  ;;  %v4131_v40 = vpop.f32.mrb[26].mxu1  ;;  %v4091_v28 = vpop.f32.mrb[19].mxu0  ;;  %v4142_v43 = vpack.c.bf16 %v4136_v50, %v4136_v50 }
 0x992   : > { %v4143_v57 = vpack.c.bf16 %v4137_v54, %v4137_v54  ;;  %v4132_v30 = vpop.f32.mrb[27].mxu1  ;;  %4835 = vmatpush1.bf16.msra.mxu0 %v6666_v48  ;;  %v4144_v59 = vpack.c.bf16 %v4138_v53, %v4138_v53 }
 0x993   : > { %v4145_v58 = vpack.c.bf16 %v4139_v24, %v4139_v24  ;;  %5948 = vmatprep.subr.bf16.mxu0 (!%p5857_p6), %v6703_v26 }
 0x994   : > { %4795 = vmatprep.mubr.bf16.mxu1 %v4143_v57 }
 0x995   : > { %4836 = vmatprep.mubr.bf16.mxu0 %v4145_v58  ;;  %4796 = vmatmul.mubr.bf16.vlgmr.msra.gmra.mrb[28].mxu1 %v4142_v43 }
 0x996   : > { %4837 = vmatmul.mubr.bf16.vlgmr.msra.gmra.mrb[24].mxu0 %v4144_v59 }
 0x997   : > { %5949 = vmatpush3.bf16.msra.mxu0 (!%p5857_p6), %v6704_v27 }
 0x998   : > { %5950 = vmatprep.subr.bf16.mxu0 (!%p5857_p6), %v6705_v31 }
 0x99b   : > { %5951 = vmatpush3.bf16.msra.mxu0 (!%p5857_p6), %v6706_v32 }
 0x99c   : > { %5952 = vmatprep.subr.bf16.mxu0 (!%p5857_p6), %v6707_v8 }
 0xa28   : > { %v4756_v46 = vpop.f32.mrb[20].mxu0 }
 0xa29   : > { %v4758_v23 = vpop.f32.mrb[21].mxu0 }
 0xa2a   : > { %v4760_v63 = vpop.f32.mrb[22].mxu0 }
 0xa2b   : > { %v4761_v0 = vpop.f32.mrb[23].mxu0 }
 0xa68   : > { %v4797_v1 = vpop.f32.mrb[28].mxu1 }
 0xa69   : > { %v4798_v4 = vadd.f32 %v4797_v1, %v4756_v46  ;;  %v4838_v5 = vpop.f32.mrb[24].mxu0  ;;  %v4799_v6 = vpop.f32.mrb[29].mxu1 }
 0xa6a   : > { %v4800_v7 = vadd.f32 %v4799_v6, %v4758_v23  ;;  %v4840_v10 = vpop.f32.mrb[25].mxu0  ;;  %v4801_v11 = vpop.f32.mrb[30].mxu1  ;;  %4852 = sbr.rel (%p5857_p6) target bundleno = 3060 (0xbf4), region = 340 }
 0xa6b   : > { %v4839_v13 = vadd.f32 %v4838_v5, %v4798_v4  ;;  %v4842_v14 = vpop.f32.mrb[26].mxu0  ;;  %v4802_v15 = vpop.f32.mrb[31].mxu1 }
 0xa6c   : > { %v4841_v16 = vadd.f32 %v4840_v10, %v4800_v7  ;;  %v4843_v17 = vpop.f32.mrb[27].mxu0 }
 0xa6d   : > { %v4845_v18 = vadd.f32 %v4839_v13, %v8090_v34  ;;  %v6708_v34 = vld [vmem:[#allocation20 + $0x10] sm:$0xff] (!%p5857_p6)  }
 0xa6e   : > { %v4846_v21 = vadd.f32 %v4841_v16, %v8093_v36  ;;  %5953 = vmatpush3.bf16.msra.mxu0 (!%p5857_p6), %v6708_v34  ;;  %v6709_v36 = vld [vmem:[#allocation20 + $0x58] sm:$0xff] (!%p5857_p6)  }
 0xa6f   : > { %4847 = vst [vmem:[#allocation2] sm:$0xff] %v4845_v18  ;;  %v4853_v22 = vmul.f32 (!%p5857_p6), %v4845_v18, %v4845_v18  ;;  %5954 = vmatprep.subr.bf16.mxu0 (!%p5857_p6), %v6709_v36 }
 0xa70   : > { %4848 = vst [vmem:[#allocation2 + $0x8] sm:$0xff] %v4846_v21  ;;  %v4854_v25 = vmul.f32 (!%p5857_p6), %v4846_v21, %v4846_v21 }
 0xa72   : > { %v4855_v29 = vadd.f32 %v4854_v25, %v4853_v22  ;;  %5955 = vmatpush3.bf16.msra.mxu0 %v6710_v9 }
 0xa73   : > { %5956 = vmatprep.subr.bf16.mxu0 %v6711_v33 }
 0xa74   : > { %4856 = vadd.xlane.f32.xlu0 %v4855_v29 }
 0xa76   : > { %5957 = vmatpush3.bf16.msra.mxu0 %v6712_v35 }
 0xa77   : > { %5958 = vmatprep.subr.bf16.mxu0 %v6713_v37 }
 0xa7a   : > { %5959 = vmatpush3.bf16.msra.mxu0 %v6714_v12 }
 0xa7b   : > { %5960 = vmatprep.subr.bf16.mxu0 %v6715_v38 }
 0xa7e   : > { %5961 = vmatpush3.bf16.msra.mxu0 %v6716_v39 }
 0xa7f   : > { %5962 = vmatprep.subr.bf16.mxu0 %v6717_v19 }
 0xa82   : > { %5963 = vmatpush3.bf16.msra.mxu0 %v6718_v2 }
 0xb01   : > { %v4857_v20 = vpop.xlane.xlu0 %4856 }
 0xb02   : > { %v4858_v41 = vmul.f32 0.00390625, %v4857_v20 }
 0xb04   : > { %v4859_v3 = vadd.f32 1e-05, %v4858_v41 }
 0xb06   : > { %6719 = vrsqrt.f32 %v4859_v3 }
 0xb10   : > { %v6720_v60 = vpop.eup %6719 }
 0xb11   : > { %v4862_v47 = vmul.f32 %v6720_v60, %v4846_v21  ;;  %v4861_v48 = vmul.f32 %v6720_v60, %v4845_v18 }
 0xb13   : > { %v4876_v49 = vmul.f32 %v4872_v45, %v4862_v47  ;;  %v4875_v50 = vmul.f32 %v4868_v44, %v4861_v48 }
 0xb15   : > { %v4878_v51 = vpack.c.bf16 %v4876_v49, %v4876_v49  ;;  %v4877_v52 = vpack.c.bf16 %v4875_v50, %v4875_v50 }
 0xb17   : > { %5039 = vmatprep.mubr.bf16.mxu0 %v4878_v51 }
 0xb18   : > { %5040 = vmatmul.mubr.bf16.vlgmr.msra.gmra.mrb[0].mxu0 %v4877_v52 }
 0xbeb   : > { %v5964_v53 = vpop.f32.mrb[0].mxu0 }
 0xbec   : > { %v5965_v54 = vpop.f32.mrb[1].mxu0 }
 0xbed   : > { %v5966_v55 = vadd.f32 %v5965_v54, %v5964_v53  ;;  %v5967_v56 = vpop.f32.mrb[2].mxu0 }
 0xbee   : > { %v5968_v24 = vpop.f32.mrb[3].mxu0 }
 0xbef   : > { %5047 = vst [vmem:[%s8535_s14] sm:$0xff] %v5966_v55 }
 0xbf0   : > { %6977 = dma.done.wait [#allocation8], 32 }
 0xbf1   : > { %6978 = vsyncadd [#allocation8], 4294967264 }
 0xbf2   : > { %6979 = dma.done.wait [#allocation8 + $0x1], 32 }
 0xbf3   : > { %6980 = vsyncadd [#allocation8 + $0x1], 4294967264 }
 0xbf4 PF: > { %s8536_s29 = sld [smem:[#allocation40_spill]]  ;;  %s8537_s21 = sld [smem:[#allocation38_spill]] }
 0xbf5   : > { %s8538_s2 = sld [smem:[#allocation41_spill]]  ;;  %s8539_s28 = smov %s6987_s6 }
 0xbfa   : > { %p45_p4 = scmp.ge.s32.totalorder %s8536_s29, 4   ;;  %s8540_s6 = smov %s8537_s21 }
 0xbfc   :  { %47 = sbr.rel (!%p45_p4) target bundleno = 35 (0x23), region = 493 }
 0xc03   :  { %5065 = vsyncpa [#allocation11], 1 }
 0xc04   :  { %5067 = vsyncpa [#allocation11 + $0x1], 1 }
 0xc05   :  { %5068 = vsyncpa [#allocation13], 1 }
 0xc06   :  { %5070 = vsyncpa [#allocation13 + $0x1], 1 }
 0xc07   :  { %5071 = vsyncpa [#allocation16], 1 }
 0xc08   :  { %5073 = vsyncpa [#allocation16 + $0x1], 1 }
 0xc09   :  { %5074 = vsyncpa [#allocation19], 1 }
 0xc0a   :  { %5076 = vsyncpa [#allocation19 + $0x1], 1 }
 0xc0b   :  { %5077 = vsyncmov [#allocation7] }
 0xc0e   :  { %s5078_s0 = vpop.sfrf %5077 }
 0xc0f   :  { %p5876_p5 = scmp.ne.s32.totalorder %s5078_s0, 0 }
 0xc11   :  { %5082 = shalt.err (%p5876_p5)  }
 0xc12   :  { %5084 = vsyncmov [#allocation7 + $0x1] }
 0xc15   :  { %s5085_s20 = vpop.sfrf %5084 }
 0xc16   :  { %p5877_p11 = scmp.ne.s32.totalorder %s5085_s20, 0 }
 0xc18   :  { %5089 = shalt.err (%p5877_p11)  }
 0xc19   :  { %5091 = vsyncmov [#allocation7 + $0x2] }
 0xc1c   :  { %s5092_s16 = vpop.sfrf %5091 }
 0xc1d   :  { %p5878_p9 = scmp.ne.s32.totalorder %s5092_s16, 0 }
 0xc1f   :  { %5096 = shalt.err (%p5878_p9)  }
 0xc20   :  { %5098 = vsyncmov [#allocation7 + $0x3] }
 0xc23   :  { %s5099_s11 = vpop.sfrf %5098 }
 0xc24   :  { %p5879_p13 = scmp.ne.s32.totalorder %s5099_s11, 0 }
 0xc26   :  { %5103 = shalt.err (%p5879_p13)  }
 0xc27   :  { %5104 = vsyncmov [#allocation8] }
 0xc2a   :  { %s5105_s6 = vpop.sfrf %5104 }
 0xc2b   :  { %p5880_p8 = scmp.ne.s32.totalorder %s5105_s6, 0 }
 0xc2d   :  { %5109 = shalt.err (%p5880_p8)  }
 0xc2e   :  { %5111 = vsyncmov [#allocation8 + $0x1] }
 0xc31   :  { %s5112_s24 = vpop.sfrf %5111 }
 0xc32   :  { %p5881_p10 = scmp.ne.s32.totalorder %s5112_s24, 0 }
 0xc34   :  { %5116 = shalt.err (%p5881_p10)  }

</bundles_post_ra>
